<compile_context>
chip_gen: v5e
topology: v5e:2x2
jax: 0.10.0
libtpu: 0.0.40
codegen_flags: <defaults>
</compile_context>

<pallas_src>
import functools
import numpy as np

import jax
import jax.numpy as jnp
from jax.experimental import pallas as pl
from jax.experimental.pallas import tpu as pltpu

_VMEM = pl.BlockSpec(memory_space=pltpu.MemorySpace.VMEM)
_BN_EPS = 1e-5
_LRELU_SLOPE = 0.2


# ----------------------------------------------------------------------------
# The single fused Pallas kernel
# ----------------------------------------------------------------------------
def _encoder_fused_kernel(*refs, spec, eps, alpha):
    """Runs the whole encoder.  refs = (x_flat, *params, out)."""
    x_ref, out_ref = refs[0], refs[-1]
    params = refs[1:-1]

    h = x_ref[...].astype(jnp.float32)            # (N, P*C) lane-dense slab
    n_batch = h.shape[0]

    idx = 0
    for kind, act in spec:
        if kind == "conv":
            w = params[idx][...]                  # dense (P_in*C_in, P_out*C_out)
            idx += 1
            h = jnp.dot(h, w, preferred_element_type=jnp.float32)
        else:  # "bn"  (train-mode batch statistics, biased variance)
            sel = params[idx][...]                # (P*C, C)  per-channel reduction
            sel_t = params[idx + 1][...]          # (C, P*C)  per-channel broadcast
            gamma = params[idx + 2][...]          # (1, C)
            beta = params[idx + 3][...]           # (1, C)
            idx += 4
            n_red = n_batch * (sel.shape[0] // sel.shape[1])
            s1 = jnp.dot(h, sel, preferred_element_type=jnp.float32)      # (N, C)
            s2 = jnp.dot(h * h, sel, preferred_element_type=jnp.float32)  # (N, C)
            mean = jnp.sum(s1, axis=0, keepdims=True) / n_red             # (1, C)
            var = jnp.sum(s2, axis=0, keepdims=True) / n_red - mean * mean
            scale = gamma * jax.lax.rsqrt(var + eps)
            shift = beta - mean * scale
            h = (h * jnp.dot(scale, sel_t, preferred_element_type=jnp.float32)
                 + jnp.dot(shift, sel_t, preferred_element_type=jnp.float32))
        if act == "lrelu":
            h = jnp.where(h >= 0, h, alpha * h)

    out_ref[...] = h.astype(out_ref.dtype)


def encoder_forward(x_nchw, model):
    spec, params = model["spec"], model["params"]
    hf, wf, cf = model["out_hwc"]
    n = x_nchw.shape[0]
    x_flat = x_nchw.reshape(n, -1)   # NCHW flatten; layer-1 dense matrix expects this order
    kern = functools.partial(_encoder_fused_kernel, spec=spec,
                             eps=_BN_EPS, alpha=_LRELU_SLOPE)
    out_flat = pl.pallas_call(
        kern,
        out_shape=jax.ShapeDtypeStruct((n, hf * wf * cf), jnp.float32),
        in_specs=[_VMEM] * (1 + len(params)),
        out_specs=_VMEM,
    )(x_flat, *params)
    out = out_flat.reshape(n, hf, wf, cf)         # internal flatten order is (h, w, c)
    return jnp.transpose(out, (0, 3, 1, 2))       # back to NCHW


# ----------------------------------------------------------------------------
# Build-time weight preprocessing (hoisted out of the forward path)
# ----------------------------------------------------------------------------
def _conv2d_as_dense(w, h_in, w_in, stride, padding, nchw_input):
    """Lower Conv2d(bias=False) to a dense matrix over flattened space.

    w: (C_out, C_in, KH, KW) numpy.  Column index = (oh*W_out+ow)*C_out + co.
    Row index = p*C_in + ci (channel-minor, used between fused layers) or
    ci*H*W + p (NCHW order, used only for the network input).
    """
    c_out, c_in, kh_sz, kw_sz = w.shape
    h_out = (h_in + 2 * padding - kh_sz) // stride + 1
    w_out = (w_in + 2 * padding - kw_sz) // stride + 1
    mat = np.zeros((h_in * w_in * c_in, h_out * w_out * c_out), np.float32)
    for oh in range(h_out):
        for ow in range(w_out):
            col0 = (oh * w_out + ow) * c_out
            for kh in range(kh_sz):
                ih = oh * stride - padding + kh
                if ih < 0 or ih >= h_in:
                    continue
                for kw in range(kw_sz):
                    iw = ow * stride - padding + kw
                    if iw < 0 or iw >= w_in:
                        continue
                    p = ih * w_in + iw
                    wt = w[:, :, kh, kw].T                        # (C_in, C_out)
                    if nchw_input:
                        mat[p::h_in * w_in, col0:col0 + c_out] += wt
                    else:
                        mat[p * c_in:(p + 1) * c_in, col0:col0 + c_out] += wt
    return mat, h_out, w_out


def build_encoder_params(key, isize, nz, nc, ndf, n_extra_layers=0, add_final_conv=True):
    """Mirrors Encoder.__init__; returns fused-kernel operands + raw ref params."""
    assert isize % 16 == 0, "isize has to be a multiple of 16"

    def nrm(key, shape, scale=0.02):
        key, sub = jax.random.split(key)
        return key, scale * jax.random.normal(sub, shape, jnp.float32)

    spec, params, ref_layers = [], [], []

    def add_conv(key, c_in, c_out, k, stride, padding, h, w, act, nchw_input=False):
        key, wt = nrm(key, (c_out, c_in, k, k))
        ref_layers.append({"kind": "conv", "w": wt, "stride": stride, "padding": padding})
        if act == "lrelu":
            ref_layers.append({"kind": "lrelu"})
        mat, h2, w2 = _conv2d_as_dense(np.asarray(wt), h, w, stride, padding, nchw_input)
        spec.append(("conv", act))
        params.append(jnp.asarray(mat))
        return key, h2, w2

    def add_bn(key, c, h, w, act):
        key, g = nrm(key, (1, c), 0.1)
        key, b = nrm(key, (1, c), 0.1)
        g = 1.0 + g
        ref_layers.append({"kind": "bn", "gamma": g, "beta": b})
        if act == "lrelu":
            ref_layers.append({"kind": "lrelu"})
        sel = np.tile(np.eye(c, dtype=np.float32), (h * w, 1))    # (P*C, C)
        spec.append(("bn", act))
        params.extend([jnp.asarray(sel), jnp.asarray(sel.T), g, b])
        return key

    h = w = isize
    # initial: Conv2d(nc, ndf, 4, 2, 1) + LeakyReLU(0.2)
    key, h, w = add_conv(key, nc, ndf, 4, 2, 1, h, w, act="lrelu", nchw_input=True)
    csize, cndf = isize // 2, ndf

    # extra layers: Conv2d(cndf, cndf, 3, 1, 1) + BN + LeakyReLU
    for _ in range(n_extra_layers):
        key, h, w = add_conv(key, cndf, cndf, 3, 1, 1, h, w, act=None)
        key = add_bn(key, cndf, h, w, act="lrelu")

    # pyramid: Conv2d(cndf, 2*cndf, 4, 2, 1) + BN + LeakyReLU
    while csize > 4:
        key, h, w = add_conv(key, cndf, cndf * 2, 4, 2, 1, h, w, act=None)
        key = add_bn(key, cndf * 2, h, w, act="lrelu")
        cndf, csize = cndf * 2, csize // 2

    out_c = cndf
    if add_final_conv:
        # final: Conv2d(cndf, nz, 4, 1, 0)
        key, h, w = add_conv(key, cndf, nz, 4, 1, 0, h, w, act=None)
        out_c = nz

    return {"spec": tuple(spec), "params": tuple(params),
            "out_hwc": (h, w, out_c), "ref_layers": ref_layers}


# ----------------------------------------------------------------------------
# Pure-numpy reference (PyTorch semantics) for correctness check
# ----------------------------------------------------------------------------
def _ref_forward(x, ref_layers, eps=_BN_EPS, alpha=_LRELU_SLOPE):
    h = np.asarray(x, np.float64)                                   # (N, C, H, W)
    for lyr in ref_layers:
        kind = lyr["kind"]
        if kind == "conv":
            w = np.asarray(lyr["w"], np.float64)
            s, p = lyr["stride"], lyr["padding"]
            n, _, hi, wi = h.shape
            c_out, _, kh, kw = w.shape
            ho = (hi + 2 * p - kh) // s + 1
            wo = (wi + 2 * p - kw) // s + 1
            hp = np.pad(h, ((0, 0), (0, 0), (p, p), (p, p)))
            out = np.zeros((n, c_out, ho, wo))
            for oh in range(ho):
                for ow in range(wo):
                    patch = hp[:, :, oh * s:oh * s + kh, ow * s:ow * s + kw]
                    out[:, :, oh, ow] = np.einsum("ncij,dcij->nd", patch, w)
            h = out
        elif kind == "bn":  # train-mode batch stats, biased variance
            g = np.asarray(lyr["gamma"], np.float64).reshape(-1)
            b = np.asarray(lyr["beta"], np.float64).reshape(-1)
            mean = h.mean(axis=(0, 2, 3), keepdims=True)
            var = h.var(axis=(0, 2, 3), keepdims=True)
            h = (h - mean) / np.sqrt(var + eps) * g[None, :, None, None] + b[None, :, None, None]
        else:  # LeakyReLU(0.2)
            h = np.where(h >= 0, h, alpha * h)
    return h


# ----------------------------------------------------------------------------
if __name__ == "__main__":
    # Encoder(isize=16, nz=8, nc=3, ndf=8, ngpu=1, n_extra_layers=1)
    isize, nz, nc, ndf, n_extra = 16, 8, 3, 8, 1
    n_batch = 2

    key = jax.random.PRNGKey(0)
    key, pkey, xkey = jax.random.split(key, 3)
    model = build_encoder_params(pkey, isize, nz, nc, ndf, n_extra_layers=n_extra)

    x = jax.random.normal(xkey, (n_batch, nc, isize, isize), jnp.float32)

    out = encoder_forward(x, model)
    out = jax.block_until_ready(out)

    assert out.shape == (n_batch, nz, 1, 1), out.shape
    ref = _ref_forward(np.asarray(x), model["ref_layers"])
    np.testing.assert_allclose(np.asarray(out), ref, rtol=2e-3, atol=2e-3)

    # TODO(synk): BatchNorm running-stat updates (a training-time side effect) are
    # not modeled; they do not affect the train-mode forward output.
    print("KERNEL_OK")
</pallas_src>

<mosaic_0001>
module attributes {stable_mosaic.version = 11 : i64} {
  func.func @_encoder_fused_kernel(%arg0: memref<2x768xf32, #tpu.memory_space<vmem>>, %arg1: memref<768x512xf32, #tpu.memory_space<vmem>>, %arg2: memref<512x512xf32, #tpu.memory_space<vmem>>, %arg3: memref<512x8xf32, #tpu.memory_space<vmem>>, %arg4: memref<8x512xf32, #tpu.memory_space<vmem>>, %arg5: memref<1x8xf32, #tpu.memory_space<vmem>>, %arg6: memref<1x8xf32, #tpu.memory_space<vmem>>, %arg7: memref<512x256xf32, #tpu.memory_space<vmem>>, %arg8: memref<256x16xf32, #tpu.memory_space<vmem>>, %arg9: memref<16x256xf32, #tpu.memory_space<vmem>>, %arg10: memref<1x16xf32, #tpu.memory_space<vmem>>, %arg11: memref<1x16xf32, #tpu.memory_space<vmem>>, %arg12: memref<256x8xf32, #tpu.memory_space<vmem>>, %arg13: memref<2x8xf32, #tpu.memory_space<vmem>>) attributes {dimension_semantics = [], scalar_prefetch = 0 : i64, scratch_operands = 0 : i64, tpu.core_type = #tpu.core_type<tc>} {
    %c0 = arith.constant 0 : index
    %c0_0 = arith.constant 0 : index
    %0 = vector.load %arg0[%c0, %c0_0] : memref<2x768xf32, #tpu.memory_space<vmem>>, vector<2x768xf32>
    %c0_1 = arith.constant 0 : index
    %c0_2 = arith.constant 0 : index
    %1 = vector.load %arg1[%c0_1, %c0_2] : memref<768x512xf32, #tpu.memory_space<vmem>>, vector<768x512xf32>
    %cst = arith.constant dense<0.000000e+00> : vector<2x512xf32>
    %2 = tpu.matmul %0, %1, %cst {dimension_numbers = #tpu.dot_dimension_numbers<[1], [0], [0], [1], [0, 0, 1, 1], [], []>} : vector<2x768xf32>, vector<768x512xf32>, vector<2x512xf32> -> vector<2x512xf32>
    %cst_3 = arith.constant 0.000000e+00 : f32
    %3 = vector.broadcast %cst_3 : f32 to vector<2x512xf32>
    %4 = arith.cmpf oge, %2, %3 : vector<2x512xf32>
    %cst_4 = arith.constant 2.000000e-01 : f32
    %5 = vector.broadcast %cst_4 : f32 to vector<2x512xf32>
    %6 = arith.mulf %5, %2 : vector<2x512xf32>
    %7 = arith.select %4, %2, %6 : vector<2x512xi1>, vector<2x512xf32>
    %c0_5 = arith.constant 0 : index
    %c0_6 = arith.constant 0 : index
    %8 = vector.load %arg2[%c0_5, %c0_6] : memref<512x512xf32, #tpu.memory_space<vmem>>, vector<512x512xf32>
    %cst_7 = arith.constant dense<0.000000e+00> : vector<2x512xf32>
    %9 = tpu.matmul %7, %8, %cst_7 {dimension_numbers = #tpu.dot_dimension_numbers<[1], [0], [0], [1], [0, 0, 1, 1], [], []>} : vector<2x512xf32>, vector<512x512xf32>, vector<2x512xf32> -> vector<2x512xf32>
    %c0_8 = arith.constant 0 : index
    %c0_9 = arith.constant 0 : index
    %10 = vector.load %arg3[%c0_8, %c0_9] : memref<512x8xf32, #tpu.memory_space<vmem>>, vector<512x8xf32>
    %c0_10 = arith.constant 0 : index
    %c0_11 = arith.constant 0 : index
    %11 = vector.load %arg4[%c0_10, %c0_11] : memref<8x512xf32, #tpu.memory_space<vmem>>, vector<8x512xf32>
    %c0_12 = arith.constant 0 : index
    %c0_13 = arith.constant 0 : index
    %12 = vector.load %arg5[%c0_12, %c0_13] : memref<1x8xf32, #tpu.memory_space<vmem>>, vector<1x8xf32>
    %c0_14 = arith.constant 0 : index
    %c0_15 = arith.constant 0 : index
    %13 = vector.load %arg6[%c0_14, %c0_15] : memref<1x8xf32, #tpu.memory_space<vmem>>, vector<1x8xf32>
    %cst_16 = arith.constant dense<0.000000e+00> : vector<2x8xf32>
    %14 = tpu.matmul %9, %10, %cst_16 {dimension_numbers = #tpu.dot_dimension_numbers<[1], [0], [0], [1], [0, 0, 1, 1], [], []>} : vector<2x512xf32>, vector<512x8xf32>, vector<2x8xf32> -> vector<2x8xf32>
    %15 = arith.mulf %9, %9 : vector<2x512xf32>
    %cst_17 = arith.constant dense<0.000000e+00> : vector<2x8xf32>
    %16 = tpu.matmul %15, %10, %cst_17 {dimension_numbers = #tpu.dot_dimension_numbers<[1], [0], [0], [1], [0, 0, 1, 1], [], []>} : vector<2x512xf32>, vector<512x8xf32>, vector<2x8xf32> -> vector<2x8xf32>
    %cst_18 = arith.constant dense<0.000000e+00> : vector<8xf32>
    %17 = vector.multi_reduction <add>, %14, %cst_18 [0] : vector<2x8xf32> to vector<8xf32>
    %18 = vector.shape_cast %17 : vector<8xf32> to vector<1x8xf32>
    %cst_19 = arith.constant 1.280000e+02 : f32
    %19 = vector.broadcast %cst_19 : f32 to vector<1x8xf32>
    %20 = arith.divf %18, %19 : vector<1x8xf32>
    %cst_20 = arith.constant dense<0.000000e+00> : vector<8xf32>
    %21 = vector.multi_reduction <add>, %16, %cst_20 [0] : vector<2x8xf32> to vector<8xf32>
    %22 = vector.shape_cast %21 : vector<8xf32> to vector<1x8xf32>
    %cst_21 = arith.constant 1.280000e+02 : f32
    %23 = vector.broadcast %cst_21 : f32 to vector<1x8xf32>
    %24 = arith.divf %22, %23 : vector<1x8xf32>
    %25 = arith.mulf %20, %20 : vector<1x8xf32>
    %26 = arith.subf %24, %25 : vector<1x8xf32>
    %cst_22 = arith.constant 9.99999974E-6 : f32
    %27 = vector.broadcast %cst_22 : f32 to vector<1x8xf32>
    %28 = arith.addf %26, %27 : vector<1x8xf32>
    %29 = math.rsqrt %28 : vector<1x8xf32>
    %30 = arith.mulf %12, %29 : vector<1x8xf32>
    %31 = arith.mulf %20, %30 : vector<1x8xf32>
    %32 = arith.subf %13, %31 : vector<1x8xf32>
    %cst_23 = arith.constant dense<0.000000e+00> : vector<1x512xf32>
    %33 = tpu.matmul %30, %11, %cst_23 {dimension_numbers = #tpu.dot_dimension_numbers<[1], [0], [0], [1], [0, 0, 1, 1], [], []>} : vector<1x8xf32>, vector<8x512xf32>, vector<1x512xf32> -> vector<1x512xf32>
    %34 = vector.broadcast %33 : vector<1x512xf32> to vector<2x512xf32>
    %35 = arith.mulf %9, %34 : vector<2x512xf32>
    %cst_24 = arith.constant dense<0.000000e+00> : vector<1x512xf32>
    %36 = tpu.matmul %32, %11, %cst_24 {dimension_numbers = #tpu.dot_dimension_numbers<[1], [0], [0], [1], [0, 0, 1, 1], [], []>} : vector<1x8xf32>, vector<8x512xf32>, vector<1x512xf32> -> vector<1x512xf32>
    %37 = vector.broadcast %36 : vector<1x512xf32> to vector<2x512xf32>
    %38 = arith.addf %35, %37 : vector<2x512xf32>
    %cst_25 = arith.constant 0.000000e+00 : f32
    %39 = vector.broadcast %cst_25 : f32 to vector<2x512xf32>
    %40 = arith.cmpf oge, %38, %39 : vector<2x512xf32>
    %cst_26 = arith.constant 2.000000e-01 : f32
    %41 = vector.broadcast %cst_26 : f32 to vector<2x512xf32>
    %42 = arith.mulf %41, %38 : vector<2x512xf32>
    %43 = arith.select %40, %38, %42 : vector<2x512xi1>, vector<2x512xf32>
    %c0_27 = arith.constant 0 : index
    %c0_28 = arith.constant 0 : index
    %44 = vector.load %arg7[%c0_27, %c0_28] : memref<512x256xf32, #tpu.memory_space<vmem>>, vector<512x256xf32>
    %cst_29 = arith.constant dense<0.000000e+00> : vector<2x256xf32>
    %45 = tpu.matmul %43, %44, %cst_29 {dimension_numbers = #tpu.dot_dimension_numbers<[1], [0], [0], [1], [0, 0, 1, 1], [], []>} : vector<2x512xf32>, vector<512x256xf32>, vector<2x256xf32> -> vector<2x256xf32>
    %c0_30 = arith.constant 0 : index
    %c0_31 = arith.constant 0 : index
    %46 = vector.load %arg8[%c0_30, %c0_31] : memref<256x16xf32, #tpu.memory_space<vmem>>, vector<256x16xf32>
    %c0_32 = arith.constant 0 : index
    %c0_33 = arith.constant 0 : index
    %47 = vector.load %arg9[%c0_32, %c0_33] : memref<16x256xf32, #tpu.memory_space<vmem>>, vector<16x256xf32>
    %c0_34 = arith.constant 0 : index
    %c0_35 = arith.constant 0 : index
    %48 = vector.load %arg10[%c0_34, %c0_35] : memref<1x16xf32, #tpu.memory_space<vmem>>, vector<1x16xf32>
    %c0_36 = arith.constant 0 : index
    %c0_37 = arith.constant 0 : index
    %49 = vector.load %arg11[%c0_36, %c0_37] : memref<1x16xf32, #tpu.memory_space<vmem>>, vector<1x16xf32>
    %cst_38 = arith.constant dense<0.000000e+00> : vector<2x16xf32>
    %50 = tpu.matmul %45, %46, %cst_38 {dimension_numbers = #tpu.dot_dimension_numbers<[1], [0], [0], [1], [0, 0, 1, 1], [], []>} : vector<2x256xf32>, vector<256x16xf32>, vector<2x16xf32> -> vector<2x16xf32>
    %51 = arith.mulf %45, %45 : vector<2x256xf32>
    %cst_39 = arith.constant dense<0.000000e+00> : vector<2x16xf32>
    %52 = tpu.matmul %51, %46, %cst_39 {dimension_numbers = #tpu.dot_dimension_numbers<[1], [0], [0], [1], [0, 0, 1, 1], [], []>} : vector<2x256xf32>, vector<256x16xf32>, vector<2x16xf32> -> vector<2x16xf32>
    %cst_40 = arith.constant dense<0.000000e+00> : vector<16xf32>
    %53 = vector.multi_reduction <add>, %50, %cst_40 [0] : vector<2x16xf32> to vector<16xf32>
    %54 = vector.shape_cast %53 : vector<16xf32> to vector<1x16xf32>
    %cst_41 = arith.constant 3.200000e+01 : f32
    %55 = vector.broadcast %cst_41 : f32 to vector<1x16xf32>
    %56 = arith.divf %54, %55 : vector<1x16xf32>
    %cst_42 = arith.constant dense<0.000000e+00> : vector<16xf32>
    %57 = vector.multi_reduction <add>, %52, %cst_42 [0] : vector<2x16xf32> to vector<16xf32>
    %58 = vector.shape_cast %57 : vector<16xf32> to vector<1x16xf32>
    %cst_43 = arith.constant 3.200000e+01 : f32
    %59 = vector.broadcast %cst_43 : f32 to vector<1x16xf32>
    %60 = arith.divf %58, %59 : vector<1x16xf32>
    %61 = arith.mulf %56, %56 : vector<1x16xf32>
    %62 = arith.subf %60, %61 : vector<1x16xf32>
    %cst_44 = arith.constant 9.99999974E-6 : f32
    %63 = vector.broadcast %cst_44 : f32 to vector<1x16xf32>
    %64 = arith.addf %62, %63 : vector<1x16xf32>
    %65 = math.rsqrt %64 : vector<1x16xf32>
    %66 = arith.mulf %48, %65 : vector<1x16xf32>
    %67 = arith.mulf %56, %66 : vector<1x16xf32>
    %68 = arith.subf %49, %67 : vector<1x16xf32>
    %cst_45 = arith.constant dense<0.000000e+00> : vector<1x256xf32>
    %69 = tpu.matmul %66, %47, %cst_45 {dimension_numbers = #tpu.dot_dimension_numbers<[1], [0], [0], [1], [0, 0, 1, 1], [], []>} : vector<1x16xf32>, vector<16x256xf32>, vector<1x256xf32> -> vector<1x256xf32>
    %70 = vector.broadcast %69 : vector<1x256xf32> to vector<2x256xf32>
    %71 = arith.mulf %45, %70 : vector<2x256xf32>
    %cst_46 = arith.constant dense<0.000000e+00> : vector<1x256xf32>
    %72 = tpu.matmul %68, %47, %cst_46 {dimension_numbers = #tpu.dot_dimension_numbers<[1], [0], [0], [1], [0, 0, 1, 1], [], []>} : vector<1x16xf32>, vector<16x256xf32>, vector<1x256xf32> -> vector<1x256xf32>
    %73 = vector.broadcast %72 : vector<1x256xf32> to vector<2x256xf32>
    %74 = arith.addf %71, %73 : vector<2x256xf32>
    %cst_47 = arith.constant 0.000000e+00 : f32
    %75 = vector.broadcast %cst_47 : f32 to vector<2x256xf32>
    %76 = arith.cmpf oge, %74, %75 : vector<2x256xf32>
    %cst_48 = arith.constant 2.000000e-01 : f32
    %77 = vector.broadcast %cst_48 : f32 to vector<2x256xf32>
    %78 = arith.mulf %77, %74 : vector<2x256xf32>
    %79 = arith.select %76, %74, %78 : vector<2x256xi1>, vector<2x256xf32>
    %c0_49 = arith.constant 0 : index
    %c0_50 = arith.constant 0 : index
    %80 = vector.load %arg12[%c0_49, %c0_50] : memref<256x8xf32, #tpu.memory_space<vmem>>, vector<256x8xf32>
    %cst_51 = arith.constant dense<0.000000e+00> : vector<2x8xf32>
    %81 = tpu.matmul %79, %80, %cst_51 {dimension_numbers = #tpu.dot_dimension_numbers<[1], [0], [0], [1], [0, 0, 1, 1], [], []>} : vector<2x256xf32>, vector<256x8xf32>, vector<2x8xf32> -> vector<2x8xf32>
    %c0_52 = arith.constant 0 : index
    %c0_53 = arith.constant 0 : index
    %82 = vector.load %arg13[%c0_52, %c0_53] : memref<2x8xf32, #tpu.memory_space<vmem>>, vector<2x8xf32>
    tpu.vector_store %arg13[%c0_52, %c0_53], %81 {strides = array<i32>} : memref<2x8xf32, #tpu.memory_space<vmem>>, vector<2x8xf32>,
    return
  }
}

</mosaic_0001>

<bundles_post_ra>
// kernel: tpu_custom_call.1
= control target key start
LH: loop header
LB: loop body
LE: loop exit
PB: predicated region body
PF: predicated region fallthrough
CT: control target
= control target key end

     0   :  { %18 = vsyncpa [#allocation3], 0  ;;  %s3919_s0 = inlined_call_operand.hbm [shape: f32[2,768], index: 0, kind: input, shape index: {}]   ;;  %s3920_s1 = inlined_call_operand.hbm [shape: f32[768,512], index: 1, kind: input, shape index: {}]   ;;  %s3921_s2 = inlined_call_operand.hbm [shape: f32[512,512], index: 2, kind: input, shape index: {}]   ;;  %s3922_s3 = inlined_call_operand.vmem [shape: f32[512,8], index: 3, kind: input, shape index: {}]   ;;  %s3923_s4 = inlined_call_operand.hbm [shape: f32[8,512], index: 4, kind: input, shape index: {}]   ;;  %s3924_s5 = inlined_call_operand.hbm [shape: f32[1,8], index: 5, kind: input, shape index: {}]   ;;  %s3925_s6 = inlined_call_operand.hbm [shape: f32[1,8], index: 6, kind: input, shape index: {}]   ;;  %s3926_s7 = inlined_call_operand.hbm [shape: f32[512,256], index: 7, kind: input, shape index: {}]   ;;  %s3927_s8 = inlined_call_operand.vmem [shape: f32[256,16], index: 8, kind: input, shape index: {}]   ;;  %s3928_s9 = inlined_call_operand.hbm [shape: f32[16,256], index: 9, kind: input, shape index: {}]   ;;  %s3929_s10 = inlined_call_operand.hbm [shape: f32[1,16], index: 10, kind: input, shape index: {}]   ;;  %s3930_s11 = inlined_call_operand.hbm [shape: f32[1,16], index: 11, kind: input, shape index: {}]   ;;  %s3931_s12 = inlined_call_operand.vmem [shape: f32[256,8], index: 12, kind: input, shape index: {}]   ;;  %s3932_s13 = inlined_call_operand.hbm [shape: f32[2,8], index: 13, kind: output, shape index: {}]  }
   0x1   :  { %19 = vsyncpa [#allocation6], 0 }
   0x2   :  { %20 = vsyncpa [#allocation9], 0 }
   0x3   :  { %21 = vsyncpa [#allocation12], 0 }
   0x4   :  { %22 = vsyncpa [#allocation15], 0 }
   0x5   :  { %23 = vsyncpa [#allocation18], 0  ;;  %s40_s27 = sshll.u32 %s3920_s1, 4  ;;  %s41_s27 = int_to_ptr.hbm [resolvable:$true] %s40_s27 }
   0x6   :  { %24 = vsyncpa [#allocation4], 0  ;;  %s3093_s28 = smov [#allocation5]   ;;  %s69_s15 = sshll.u32 %s3923_s4, 4  ;;  %s70_s15 = int_to_ptr.hbm [resolvable:$true] %s69_s15 }
   0x7   :  { %s42_s29 = sshll.u32 %s3093_s28, 4  ;;  %s3094_s16 = smov 512   ;;  %s43_s29 = int_to_ptr.vmem [resolvable:$true] %s42_s29 }
   0x8   :  { %s3095_s17 = smov 32   ;;  %s3096_s18 = smov [#allocation8]  }
   0x9   :  { %48 = dma.hbm_to_vmem [thread:$0]  %s41_s27, 49152, %s43_s29, [#allocation6], %s3094_s16, %s3094_s16, %s3095_s17  }
   0xa   :  { %s71_s19 = sshll.u32 %s3096_s18, 4  ;;  %s91_s21 = sshll.u32 %s3925_s6, 4  ;;  %s72_s19 = int_to_ptr.vmem [resolvable:$true] %s71_s19  ;;  %s92_s21 = int_to_ptr.hbm [resolvable:$true] %s91_s21 }
   0xb   :  { %74 = dma.hbm_to_vmem [thread:$0]  %s70_s15, 512, %s72_s19, [#allocation9]  }
   0xc   :  { %s3097_s22 = smov [#allocation11]   ;;  %s116_s25 = sshll.u32 %s3928_s9, 4  ;;  %s117_s25 = int_to_ptr.hbm [resolvable:$true] %s116_s25 }
   0xd   :  { %s93_s23 = sshll.u32 %s3097_s22, 4  ;;  %s3098_s26 = smov [#allocation14]   ;;  %s94_s23 = int_to_ptr.vmem [resolvable:$true] %s93_s23 }
   0xe   :  { %96 = dma.hbm_to_vmem [thread:$0]  %s92_s21, 16, %s94_s23, [#allocation12]  }
   0xf   :  { %s118_s27 = sshll.u32 %s3098_s26, 4  ;;  %s30_s30 = sshll.u32 %s3919_s0, 4  ;;  %s119_s27 = int_to_ptr.vmem [resolvable:$true] %s118_s27  ;;  %s31_s30 = int_to_ptr.hbm [resolvable:$true] %s30_s30 }
  0x10   :  { %s3099_s6 = smov 256   ;;  %s3100_s14 = smov 16  }
  0x11   :  { %124 = dma.hbm_to_vmem [thread:$0]  %s117_s25, 512, %s119_s27, [#allocation15], %s3099_s6, %s3099_s6, %s3100_s14  }
  0x12   :  { %s53_s19 = sshll.u32 %s3921_s2, 4  ;;  %s3101_s20 = smov [#allocation2]   ;;  %s54_s19 = int_to_ptr.hbm [resolvable:$true] %s53_s19 }
  0x13   :  { %s32_s1 = sshll.u32 %s3101_s20, 4  ;;  %s3102_s9 = smov [#allocation7]   ;;  %s33_s1 = int_to_ptr.vmem [resolvable:$true] %s32_s1 }
  0x14   :  { %35 = dma.hbm_to_vmem [thread:$0]  %s31_s30, 192, %s33_s1, [#allocation3]  }
  0x15   :  { %s55_s21 = sshll.u32 %s3102_s9, 4  ;;  %s80_s0 = sshll.u32 %s3924_s5, 4  ;;  %s56_s21 = int_to_ptr.vmem [resolvable:$true] %s55_s21  ;;  %s81_s0 = int_to_ptr.hbm [resolvable:$true] %s80_s0 }
  0x16   :  { %61 = dma.hbm_to_vmem [thread:$0]  %s54_s19, 32768, %s56_s21, [#allocation6], %s3094_s16, %s3094_s16, %s3095_s17  }
  0x17   :  { %s101_s2 = sshll.u32 %s3926_s7, 4  ;;  %s3103_s25 = smov [#allocation10]   ;;  %s102_s2 = int_to_ptr.hbm [resolvable:$true] %s101_s2 }
  0x18   :  { %s82_s26 = sshll.u32 %s3103_s25, 4  ;;  %s3104_s27 = smov [#allocation13]   ;;  %s83_s26 = int_to_ptr.vmem [resolvable:$true] %s82_s26 }
  0x19   :  { %85 = dma.hbm_to_vmem [thread:$0]  %s81_s0, 16, %s83_s26, [#allocation9]  }
  0x1a   :  { %s103_s28 = sshll.u32 %s3104_s27, 4  ;;  %s130_s5 = sshll.u32 %s3929_s10, 4  ;;  %s104_s28 = int_to_ptr.vmem [resolvable:$true] %s103_s28  ;;  %s131_s5 = int_to_ptr.hbm [resolvable:$true] %s130_s5 }
  0x1b   :  { %109 = dma.hbm_to_vmem [thread:$0]  %s102_s2, 16384, %s104_s28, [#allocation12], %s3099_s6, %s3099_s6, %s3100_s14  }
  0x1c   :  { %s141_s17 = sshll.u32 %s3930_s11, 4  ;;  %s3105_s18 = smov [#allocation16]   ;;  %s142_s17 = int_to_ptr.hbm [resolvable:$true] %s141_s17 }
  0x1d   :  { %s132_s7 = sshll.u32 %s3105_s18, 4  ;;  %s3106_s19 = smov [#allocation17]   ;;  %s133_s7 = int_to_ptr.vmem [resolvable:$true] %s132_s7 }
  0x1e   :  { %135 = dma.hbm_to_vmem [thread:$0]  %s131_s5, 16, %s133_s7, [#allocation15]  }
  0x1f   :  { %s143_s20 = sshll.u32 %s3106_s19, 4  ;;  %s144_s20 = int_to_ptr.vmem [resolvable:$true] %s143_s20 }
  0x20   :  { %146 = dma.hbm_to_vmem [thread:$0]  %s142_s17, 16, %s144_s20, [#allocation18]  }
  0x21   :  { %3079 = dma.done.wait [#allocation3], 192  }
  0x22   :  { %3080 = vsyncadd [#allocation3], 4294967104 }
  0x23   :  { %3081 = dma.done.wait [#allocation6], 81920  }
  0x24   :  { %3082 = vsyncadd [#allocation6], 4294885376 }
  0x25   :  { %3083 = dma.done.wait [#allocation9], 528  }
  0x26   :  { %3084 = vsyncadd [#allocation9], 4294966768 }
  0x27   :  { %3085 = dma.done.wait [#allocation12], 16400  }
  0x28   :  { %3086 = vsyncadd [#allocation12], 4294950896 }
  0x29   :  { %3087 = dma.done.wait [#allocation15], 528  }
  0x2a   :  { %3088 = vsyncadd [#allocation15], 4294966768 }
  0x2b   :  { %3089 = dma.done.wait [#allocation18], 16  }
  0x2c   :  { %3090 = vsyncadd [#allocation18], 4294967280  ;;  %v251_v0 = vld [vmem:[#allocation5 + $0x1e0] sm:$0xff]  ;;  %vm1894_vm4 = vcmask 58368   ;;  %vm1934_vm9 = vcmask 64512   ;;  %vm2537_vm14 = vcmask 123904  }
  0x2d   :  { %v315_v1 = vld [vmem:[#allocation5 + $0x3e0] sm:$0xff]  ;;  %592 = vmatpush.msra.mxu0 %v251_v0  ;;  %s2758_s23 = sshll.u32 %s3932_s13, 4  ;;  %s2759_s23 = int_to_ptr.hbm [resolvable:$true] %s2758_s23 }
  0x2e   :  { %v379_v2 = vld [vmem:[#allocation5 + $0x5e0] sm:$0xff]  ;;  %612 = vmatpush.msra.mxu1 %v315_v1  ;;  %v252_v1 = vld [vmem:[#allocation5 + $0x1e8] sm:$0xff] }
  0x2f   :  { %v247_v3 = vld [vmem:[#allocation5 + $0x1c0] sm:$0xff]  ;;  %632 = vmatpush.msra.mxu2 %v379_v2 }
  0x30   :  { %v311_v4 = vld [vmem:[#allocation5 + $0x3c0] sm:$0xff]  ;;  %593 = vmatpush.msra.mxu0 %v247_v3 }
  0x31   :  { %v375_v5 = vld [vmem:[#allocation5 + $0x5c0] sm:$0xff]  ;;  %613 = vmatpush.msra.mxu1 %v311_v4 }
  0x32   :  { %v443_v6 = vld [vmem:[#allocation5 + $0x7e0] sm:$0xff]  ;;  %633 = vmatpush.msra.mxu2 %v375_v5  ;;  %v248_v5 = vld [vmem:[#allocation5 + $0x1c8] sm:$0xff] }
  0x33   :  { %v243_v7 = vld [vmem:[#allocation5 + $0x1a0] sm:$0xff]  ;;  %652 = vmatpush.msra.mxu3 %v443_v6  ;;  %v316_v6 = vld [vmem:[#allocation5 + $0x3e8] sm:$0xff] }
  0x34   :  { %v307_v8 = vld [vmem:[#allocation5 + $0x3a0] sm:$0xff]  ;;  %594 = vmatpush.msra.mxu0 %v243_v7 }
  0x35   :  { %v371_v9 = vld [vmem:[#allocation5 + $0x5a0] sm:$0xff]  ;;  %614 = vmatpush.msra.mxu1 %v307_v8 }
  0x36   :  { %v439_v10 = vld [vmem:[#allocation5 + $0x7c0] sm:$0xff]  ;;  %634 = vmatpush.msra.mxu2 %v371_v9  ;;  %v244_v9 = vld [vmem:[#allocation5 + $0x1a8] sm:$0xff] }
  0x37   :  { %v239_v11 = vld [vmem:[#allocation5 + $0x180] sm:$0xff]  ;;  %653 = vmatpush.msra.mxu3 %v439_v10  ;;  %v312_v10 = vld [vmem:[#allocation5 + $0x3c8] sm:$0xff] }
  0x38   :  { %v303_v12 = vld [vmem:[#allocation5 + $0x380] sm:$0xff]  ;;  %595 = vmatpush.msra.mxu0 %v239_v11 }
  0x39   :  { %v367_v13 = vld [vmem:[#allocation5 + $0x580] sm:$0xff]  ;;  %615 = vmatpush.msra.mxu1 %v303_v12 }
  0x3a   :  { %v435_v14 = vld [vmem:[#allocation5 + $0x7a0] sm:$0xff]  ;;  %635 = vmatpush.msra.mxu2 %v367_v13  ;;  %v240_v13 = vld [vmem:[#allocation5 + $0x188] sm:$0xff] }
  0x3b   :  { %v235_v15 = vld [vmem:[#allocation5 + $0x160] sm:$0xff]  ;;  %654 = vmatpush.msra.mxu3 %v435_v14  ;;  %v308_v14 = vld [vmem:[#allocation5 + $0x3a8] sm:$0xff] }
  0x3c   :  { %v299_v16 = vld [vmem:[#allocation5 + $0x360] sm:$0xff]  ;;  %596 = vmatpush.msra.mxu0 %v235_v15 }
  0x3d   :  { %v363_v17 = vld [vmem:[#allocation5 + $0x560] sm:$0xff]  ;;  %616 = vmatpush.msra.mxu1 %v299_v16 }
  0x3e   :  { %v431_v18 = vld [vmem:[#allocation5 + $0x780] sm:$0xff]  ;;  %636 = vmatpush.msra.mxu2 %v363_v17  ;;  %v236_v17 = vld [vmem:[#allocation5 + $0x168] sm:$0xff] }
  0x3f   :  { %v231_v19 = vld [vmem:[#allocation5 + $0x140] sm:$0xff]  ;;  %655 = vmatpush.msra.mxu3 %v431_v18  ;;  %v304_v18 = vld [vmem:[#allocation5 + $0x388] sm:$0xff] }
  0x40   :  { %v295_v20 = vld [vmem:[#allocation5 + $0x340] sm:$0xff]  ;;  %597 = vmatpush.msra.mxu0 %v231_v19  ;;  %v189_v19 = vld [vmem:[#allocation2] sm:$0xff] }
  0x41   :  { %v359_v21 = vld [vmem:[#allocation5 + $0x540] sm:$0xff]  ;;  %617 = vmatpush.msra.mxu1 %v295_v20  ;;  %577 = vst [vmem:[#allocation1] ss:$4 sm:$0xff] %v189_v19  ;;  %v368_v19 = vld [vmem:[#allocation5 + $0x588] sm:$0xff] }
  0x42   :  { %v427_v22 = vld [vmem:[#allocation5 + $0x760] sm:$0xff]  ;;  %637 = vmatpush.msra.mxu2 %v359_v21 }
  0x43   :  { %v227_v23 = vld [vmem:[#allocation5 + $0x120] sm:$0xff]  ;;  %656 = vmatpush.msra.mxu3 %v427_v22  ;;  %v232_v22 = vld [vmem:[#allocation5 + $0x148] sm:$0xff] }
  0x44   :  { %v291_v24 = vld [vmem:[#allocation5 + $0x320] sm:$0xff]  ;;  %598 = vmatpush.msra.mxu0 %v227_v23  ;;  %v300_v23 = vld [vmem:[#allocation5 + $0x368] sm:$0xff] }
  0x45   :  { %v355_v25 = vld [vmem:[#allocation5 + $0x520] sm:$0xff]  ;;  %618 = vmatpush.msra.mxu1 %v291_v24 }
  0x46   :  { %v423_v26 = vld [vmem:[#allocation5 + $0x740] sm:$0xff]  ;;  %638 = vmatpush.msra.mxu2 %v355_v25 }
  0x47   :  { %v223_v27 = vld [vmem:[#allocation5 + $0x100] sm:$0xff]  ;;  %657 = vmatpush.msra.mxu3 %v423_v26  ;;  %v228_v26 = vld [vmem:[#allocation5 + $0x128] sm:$0xff] }
  0x48   :  { %v287_v28 = vld [vmem:[#allocation5 + $0x300] sm:$0xff]  ;;  %599 = vmatpush.msra.mxu0 %v223_v27  ;;  %v296_v27 = vld [vmem:[#allocation5 + $0x348] sm:$0xff] }
  0x49   :  { %v351_v29 = vld [vmem:[#allocation5 + $0x500] sm:$0xff]  ;;  %619 = vmatpush.msra.mxu1 %v287_v28 }
  0x4a   :  { %v419_v30 = vld [vmem:[#allocation5 + $0x720] sm:$0xff]  ;;  %639 = vmatpush.msra.mxu2 %v351_v29 }
  0x4b   :  { %v219_v31 = vld [vmem:[#allocation5 + $0xe0] sm:$0xff]  ;;  %658 = vmatpush.msra.mxu3 %v419_v30  ;;  %v224_v30 = vld [vmem:[#allocation5 + $0x108] sm:$0xff] }
  0x4c   :  { %v283_v32 = vld [vmem:[#allocation5 + $0x2e0] sm:$0xff]  ;;  %600 = vmatpush.msra.mxu0 %v219_v31  ;;  %v292_v31 = vld [vmem:[#allocation5 + $0x328] sm:$0xff] }
  0x4d   :  { %v347_v33 = vld [vmem:[#allocation5 + $0x4e0] sm:$0xff]  ;;  %620 = vmatpush.msra.mxu1 %v283_v32 }
  0x4e   :  { %v415_v34 = vld [vmem:[#allocation5 + $0x700] sm:$0xff]  ;;  %640 = vmatpush.msra.mxu2 %v347_v33 }
  0x4f   :  { %v215_v35 = vld [vmem:[#allocation5 + $0xc0] sm:$0xff]  ;;  %659 = vmatpush.msra.mxu3 %v415_v34  ;;  %v190_v34 = vld [vmem:[#allocation2 + $0x8] sm:$0xf] }
  0x50   :  { %v279_v36 = vld [vmem:[#allocation5 + $0x2c0] sm:$0xff]  ;;  %601 = vmatpush.msra.mxu0 %v215_v35  ;;  %v220_v35 = vld [vmem:[#allocation5 + $0xe8] sm:$0xff]  ;;  %579 = vst [vmem:[#allocation1 + $0x20] ss:$4 sm:$0xff] %v190_v34 }
  0x51   :  { %v343_v37 = vld [vmem:[#allocation5 + $0x4c0] sm:$0xff]  ;;  %621 = vmatpush.msra.mxu1 %v279_v36  ;;  %v288_v36 = vld [vmem:[#allocation5 + $0x308] sm:$0xff] }
  0x52   :  { %v411_v38 = vld [vmem:[#allocation5 + $0x6e0] sm:$0xff]  ;;  %641 = vmatpush.msra.mxu2 %v343_v37  ;;  %v552_v34 = vld [vmem:[#allocation5 + $0xb48] sm:$0xff] }
  0x53   :  { %v211_v39 = vld [vmem:[#allocation5 + $0xa0] sm:$0xff]  ;;  %660 = vmatpush.msra.mxu3 %v411_v38 }
  0x54   :  { %v275_v40 = vld [vmem:[#allocation5 + $0x2a0] sm:$0xff]  ;;  %602 = vmatpush.msra.mxu0 %v211_v39  ;;  %v216_v39 = vld [vmem:[#allocation5 + $0xc8] sm:$0xff] }
  0x55   :  { %v339_v41 = vld [vmem:[#allocation5 + $0x4a0] sm:$0xff]  ;;  %622 = vmatpush.msra.mxu1 %v275_v40  ;;  %v284_v40 = vld [vmem:[#allocation5 + $0x2e8] sm:$0xff] }
  0x56   :  { %v407_v42 = vld [vmem:[#allocation5 + $0x6c0] sm:$0xff]  ;;  %642 = vmatpush.msra.mxu2 %v339_v41 }
  0x57   :  { %v207_v43 = vld [vmem:[#allocation5 + $0x80] sm:$0xff]  ;;  %661 = vmatpush.msra.mxu3 %v407_v42 }
  0x58   :  { %v271_v44 = vld [vmem:[#allocation5 + $0x280] sm:$0xff]  ;;  %603 = vmatpush.msra.mxu0 %v207_v43  ;;  %v212_v43 = vld [vmem:[#allocation5 + $0xa8] sm:$0xff] }
  0x59   :  { %v335_v45 = vld [vmem:[#allocation5 + $0x480] sm:$0xff]  ;;  %623 = vmatpush.msra.mxu1 %v271_v44  ;;  %v280_v44 = vld [vmem:[#allocation5 + $0x2c8] sm:$0xff] }
  0x5a   :  { %v403_v46 = vld [vmem:[#allocation5 + $0x6a0] sm:$0xff]  ;;  %643 = vmatpush.msra.mxu2 %v335_v45 }
  0x5b   :  { %v203_v47 = vld [vmem:[#allocation5 + $0x60] sm:$0xff]  ;;  %662 = vmatpush.msra.mxu3 %v403_v46 }
  0x5c   :  { %v267_v48 = vld [vmem:[#allocation5 + $0x260] sm:$0xff]  ;;  %604 = vmatpush.msra.mxu0 %v203_v47  ;;  %v208_v47 = vld [vmem:[#allocation5 + $0x88] sm:$0xff] }
  0x5d   :  { %v331_v49 = vld [vmem:[#allocation5 + $0x460] sm:$0xff]  ;;  %624 = vmatpush.msra.mxu1 %v267_v48  ;;  %v276_v48 = vld [vmem:[#allocation5 + $0x2a8] sm:$0xff] }
  0x5e   :  { %v399_v50 = vld [vmem:[#allocation5 + $0x680] sm:$0xff]  ;;  %644 = vmatpush.msra.mxu2 %v331_v49 }
  0x5f   :  { %v199_v51 = vld [vmem:[#allocation5 + $0x40] sm:$0xff]  ;;  %663 = vmatpush.msra.mxu3 %v399_v50 }
  0x60   :  { %v263_v52 = vld [vmem:[#allocation5 + $0x240] sm:$0xff]  ;;  %605 = vmatpush.msra.mxu0 %v199_v51  ;;  %v204_v51 = vld [vmem:[#allocation5 + $0x68] sm:$0xff] }
  0x61   :  { %v327_v53 = vld [vmem:[#allocation5 + $0x440] sm:$0xff]  ;;  %625 = vmatpush.msra.mxu1 %v263_v52  ;;  %v272_v52 = vld [vmem:[#allocation5 + $0x288] sm:$0xff] }
  0x62   :  { %v395_v54 = vld [vmem:[#allocation5 + $0x660] sm:$0xff]  ;;  %645 = vmatpush.msra.mxu2 %v327_v53 }
  0x63   :  { %v195_v55 = vld [vmem:[#allocation5 + $0x20] sm:$0xff]  ;;  %664 = vmatpush.msra.mxu3 %v395_v54 }
  0x64   :  { %v259_v56 = vld [vmem:[#allocation5 + $0x220] sm:$0xff]  ;;  %606 = vmatpush.msra.mxu0 %v195_v55  ;;  %v200_v55 = vld [vmem:[#allocation5 + $0x48] sm:$0xff] }
  0x65   :  { %v323_v57 = vld [vmem:[#allocation5 + $0x420] sm:$0xff]  ;;  %626 = vmatpush.msra.mxu1 %v259_v56  ;;  %v268_v56 = vld [vmem:[#allocation5 + $0x268] sm:$0xff] }
  0x66   :  { %v391_v58 = vld [vmem:[#allocation5 + $0x640] sm:$0xff]  ;;  %646 = vmatpush.msra.mxu2 %v323_v57 }
  0x67   :  { %v191_v59 = vld [vmem:[#allocation5] sm:$0xff]  ;;  %665 = vmatpush.msra.mxu3 %v391_v58 }
  0x68   :  { %v255_v60 = vld [vmem:[#allocation5 + $0x200] sm:$0xff]  ;;  %607 = vmatpush.msra.mxu0 %v191_v59 }
  0x69   :  { %v319_v61 = vld [vmem:[#allocation5 + $0x400] sm:$0xff]  ;;  %627 = vmatpush.msra.mxu1 %v255_v60  ;;  %v196_v60 = vld [vmem:[#allocation5 + $0x28] sm:$0xff] }
  0x6a   :  { %v387_v62 = vld [vmem:[#allocation5 + $0x620] sm:$0xff]  ;;  %647 = vmatpush.msra.mxu2 %v319_v61  ;;  %v264_v61 = vld [vmem:[#allocation5 + $0x248] sm:$0xff] }
  0x6b   :  { %v507_v63 = vld [vmem:[#allocation5 + $0x9e0] sm:$0xff]  ;;  %666 = vmatpush.msra.mxu3 %v387_v62  ;;  %v3218_v62 = vld.sshfl [vmem:[#allocation1] sm:$0xff pattern:$0x73625140] }
  0x6c   :  { %v571_v0 = vld [vmem:[#allocation5 + $0xbe0] sm:$0xff]  ;;  %672 = vmatpush.msrb.mxu0 %v507_v63  ;;  %712 = vmatpush.msrb.mxu2 %v252_v1 }
  0x6d   :  { %v383_v2 = vld [vmem:[#allocation5 + $0x600] sm:$0xff]  ;;  %692 = vmatpush.msrb.mxu1 %v571_v0  ;;  %608 = vmatmul.f32.vlgmr.msra.gmra.mxu0 %v3218_v62 }
  0x6e   :  { %v503_v3 = vld [vmem:[#allocation5 + $0x9c0] sm:$0xff]  ;;  %667 = vmatpush.msra.mxu3 %v383_v2  ;;  %713 = vmatpush.msrb.mxu2 %v248_v5  ;;  %v192_v2 = vld [vmem:[#allocation5 + $0x8] sm:$0xff] }
  0x6f   :  { %v567_v4 = vld [vmem:[#allocation5 + $0xbc0] sm:$0xff]  ;;  %673 = vmatpush.msrb.mxu0 %v503_v3  ;;  %v260_v3 = vld [vmem:[#allocation5 + $0x228] sm:$0xff] }
  0x70   :  { %v499_v7 = vld [vmem:[#allocation5 + $0x9a0] sm:$0xff]  ;;  %693 = vmatpush.msrb.mxu1 %v567_v4  ;;  %732 = vmatpush.msrb.mxu3 %v316_v6  ;;  %v3224_v4 = vld.sshfl [vmem:[#allocation1 + $0x8] sm:$0xff pattern:$0x73625140]  ;;  %v380_v5 = vld [vmem:[#allocation5 + $0x5e8] sm:$0xff] }
  0x71   :  { %v563_v8 = vld [vmem:[#allocation5 + $0xba0] sm:$0xff]  ;;  %674 = vmatpush.msrb.mxu0 %v499_v7  ;;  %714 = vmatpush.msrb.mxu2 %v244_v9  ;;  %v444_v6 = vld [vmem:[#allocation5 + $0x7e8] sm:$0xff] }
  0x72   :  { %v495_v11 = vld [vmem:[#allocation5 + $0x980] sm:$0xff]  ;;  %694 = vmatpush.msrb.mxu1 %v563_v8  ;;  %733 = vmatpush.msrb.mxu3 %v312_v10  ;;  %v508_v7 = vld [vmem:[#allocation5 + $0x9e8] sm:$0xff] }
  0x73   :  { %v559_v12 = vld [vmem:[#allocation5 + $0xb80] sm:$0xff]  ;;  %675 = vmatpush.msrb.mxu0 %v495_v11  ;;  %715 = vmatpush.msrb.mxu2 %v240_v13  ;;  %v256_v8 = vld [vmem:[#allocation5 + $0x208] sm:$0xff] }
  0x74   :  { %v491_v15 = vld [vmem:[#allocation5 + $0x960] sm:$0xff]  ;;  %695 = vmatpush.msrb.mxu1 %v559_v12  ;;  %734 = vmatpush.msrb.mxu3 %v308_v14  ;;  %v376_v9 = vld [vmem:[#allocation5 + $0x5c8] sm:$0xff] }
  0x75   :  { %v555_v16 = vld [vmem:[#allocation5 + $0xb60] sm:$0xff]  ;;  %676 = vmatpush.msrb.mxu0 %v491_v15  ;;  %716 = vmatpush.msrb.mxu2 %v236_v17  ;;  %v440_v10 = vld [vmem:[#allocation5 + $0x7c8] sm:$0xff] }
  0x76   :  { %v487_v20 = vld [vmem:[#allocation5 + $0x940] sm:$0xff]  ;;  %696 = vmatpush.msrb.mxu1 %v555_v16  ;;  %735 = vmatpush.msrb.mxu3 %v304_v18  ;;  %v504_v11 = vld [vmem:[#allocation5 + $0x9c8] sm:$0xff] }
  0x77   :  { %v551_v21 = vld [vmem:[#allocation5 + $0xb40] sm:$0xff]  ;;  %677 = vmatpush.msrb.mxu0 %v487_v20  ;;  %717 = vmatpush.msrb.mxu2 %v232_v22  ;;  %v572_v12 = vld [vmem:[#allocation5 + $0xbe8] sm:$0xff]  ;;  %v3230_v22 = vld.sshfl [vmem:[#allocation1 + $0x28] sm:$0xff pattern:$0x73625140] }
  0x78   :  { %v483_v24 = vld [vmem:[#allocation5 + $0x920] sm:$0xff]  ;;  %697 = vmatpush.msrb.mxu1 %v551_v21  ;;  %736 = vmatpush.msrb.mxu3 %v300_v23  ;;  %v372_v13 = vld [vmem:[#allocation5 + $0x5a8] sm:$0xff] }
  0x79   :  { %v547_v25 = vld [vmem:[#allocation5 + $0xb20] sm:$0xff]  ;;  %678 = vmatpush.msrb.mxu0 %v483_v24  ;;  %718 = vmatpush.msrb.mxu2 %v228_v26  ;;  %v436_v14 = vld [vmem:[#allocation5 + $0x7a8] sm:$0xff] }
  0x7a   :  { %v479_v28 = vld [vmem:[#allocation5 + $0x900] sm:$0xff]  ;;  %698 = vmatpush.msrb.mxu1 %v547_v25  ;;  %737 = vmatpush.msrb.mxu3 %v296_v27  ;;  %v500_v15 = vld [vmem:[#allocation5 + $0x9a8] sm:$0xff] }
  0x7b   :  { %v543_v29 = vld [vmem:[#allocation5 + $0xb00] sm:$0xff]  ;;  %679 = vmatpush.msrb.mxu0 %v479_v28  ;;  %719 = vmatpush.msrb.mxu2 %v224_v30  ;;  %v568_v16 = vld [vmem:[#allocation5 + $0xbc8] sm:$0xff] }
  0x7c   :  { %v475_v32 = vld [vmem:[#allocation5 + $0x8e0] sm:$0xff]  ;;  %699 = vmatpush.msrb.mxu1 %v543_v29  ;;  %738 = vmatpush.msrb.mxu3 %v292_v31  ;;  %v3228_v17 = vld.sshfl [vmem:[#allocation1 + $0x20] sm:$0xff pattern:$0x73625140] }
  0x7d   :  { %v539_v33 = vld [vmem:[#allocation5 + $0xae0] sm:$0xff]  ;;  %680 = vmatpush.msrb.mxu0 %v475_v32  ;;  %720 = vmatpush.msrb.mxu2 %v220_v35  ;;  %v432_v18 = vld [vmem:[#allocation5 + $0x788] sm:$0xff] }
  0x7e   :  { %v471_v37 = vld [vmem:[#allocation5 + $0x8c0] sm:$0xff]  ;;  %700 = vmatpush.msrb.mxu1 %v539_v33  ;;  %739 = vmatpush.msrb.mxu3 %v288_v36  ;;  %v496_v20 = vld [vmem:[#allocation5 + $0x988] sm:$0xff] }
  0x7f   :  { %v535_v38 = vld [vmem:[#allocation5 + $0xac0] sm:$0xff]  ;;  %681 = vmatpush.msrb.mxu0 %v471_v37  ;;  %721 = vmatpush.msrb.mxu2 %v216_v39  ;;  %v564_v21 = vld [vmem:[#allocation5 + $0xba8] sm:$0xff] }
  0x80   :  { %v467_v41 = vld [vmem:[#allocation5 + $0x8a0] sm:$0xff]  ;;  %701 = vmatpush.msrb.mxu1 %v535_v38  ;;  %740 = vmatpush.msrb.mxu3 %v284_v40  ;;  %v364_v23 = vld [vmem:[#allocation5 + $0x568] sm:$0xff] }
  0x81   :  { %v531_v42 = vld [vmem:[#allocation5 + $0xaa0] sm:$0xff]  ;;  %682 = vmatpush.msrb.mxu0 %v467_v41  ;;  %722 = vmatpush.msrb.mxu2 %v212_v43  ;;  %v428_v24 = vld [vmem:[#allocation5 + $0x768] sm:$0xff] }
  0x82   :  { %v463_v45 = vld [vmem:[#allocation5 + $0x880] sm:$0xff]  ;;  %702 = vmatpush.msrb.mxu1 %v531_v42  ;;  %741 = vmatpush.msrb.mxu3 %v280_v44  ;;  %v492_v25 = vld [vmem:[#allocation5 + $0x968] sm:$0xff] }
  0x83   :  { %v527_v46 = vld [vmem:[#allocation5 + $0xa80] sm:$0xff]  ;;  %683 = vmatpush.msrb.mxu0 %v463_v45  ;;  %723 = vmatpush.msrb.mxu2 %v208_v47  ;;  %v560_v26 = vld [vmem:[#allocation5 + $0xb88] sm:$0xff] }
  0x84   :  { %v459_v49 = vld [vmem:[#allocation5 + $0x860] sm:$0xff]  ;;  %703 = vmatpush.msrb.mxu1 %v527_v46  ;;  %742 = vmatpush.msrb.mxu3 %v276_v48  ;;  %v360_v27 = vld [vmem:[#allocation5 + $0x548] sm:$0xff] }
  0x85   :  { %v523_v50 = vld [vmem:[#allocation5 + $0xa60] sm:$0xff]  ;;  %684 = vmatpush.msrb.mxu0 %v459_v49  ;;  %724 = vmatpush.msrb.mxu2 %v204_v51  ;;  %v424_v28 = vld [vmem:[#allocation5 + $0x748] sm:$0xff] }
  0x86   :  { %v455_v53 = vld [vmem:[#allocation5 + $0x840] sm:$0xff]  ;;  %704 = vmatpush.msrb.mxu1 %v523_v50  ;;  %743 = vmatpush.msrb.mxu3 %v272_v52  ;;  %v488_v29 = vld [vmem:[#allocation5 + $0x948] sm:$0xff] }
  0x87   :  { %v519_v54 = vld [vmem:[#allocation5 + $0xa40] sm:$0xff]  ;;  %685 = vmatpush.msrb.mxu0 %v455_v53  ;;  %725 = vmatpush.msrb.mxu2 %v200_v55  ;;  %v556_v30 = vld [vmem:[#allocation5 + $0xb68] sm:$0xff] }
  0x88   :  { %v3216_v57 = vld.sshfl [vmem:[#allocation1 + $0x10] sm:$0xff pattern:$0x73625140]  ;;  %705 = vmatpush.msrb.mxu1 %v519_v54  ;;  %744 = vmatpush.msrb.mxu3 %v268_v56  ;;  %v3221_v63 = vld.sshfl [vmem:[#allocation1 + $0x18] sm:$0xff pattern:$0x73625140] }
  0x89   :  { %v451_v58 = vld [vmem:[#allocation5 + $0x820] sm:$0xff]  ;;  %648 = vmatmul.f32.vlgmr.msra.gmra.mxu2 %v3216_v57  ;;  %668 = vmatmul.f32.vlgmr.msra.gmra.mxu3 %v3221_v63  ;;  %v356_v31 = vld [vmem:[#allocation5 + $0x528] sm:$0xff] }
  0x8a   :  { %v515_v59 = vld [vmem:[#allocation5 + $0xa20] sm:$0xff]  ;;  %686 = vmatpush.msrb.mxu0 %v451_v58  ;;  %726 = vmatpush.msrb.mxu2 %v196_v60  ;;  %v420_v32 = vld [vmem:[#allocation5 + $0x728] sm:$0xff] }
  0x8b   :  { %v447_v0 = vld [vmem:[#allocation5 + $0x800] sm:$0xff]  ;;  %706 = vmatpush.msrb.mxu1 %v515_v59  ;;  %745 = vmatpush.msrb.mxu3 %v264_v61  ;;  %v484_v33 = vld [vmem:[#allocation5 + $0x928] sm:$0xff] }
  0x8c   :  { %v511_v1 = vld [vmem:[#allocation5 + $0xa00] sm:$0xff]  ;;  %687 = vmatpush.msrb.mxu0 %v447_v0  ;;  %727 = vmatpush.msrb.mxu2 %v192_v2  ;;  %v352_v35 = vld [vmem:[#allocation5 + $0x508] sm:$0xff] }
  0x8d   :  { %707 = vmatpush.msrb.mxu1 %v511_v1  ;;  %746 = vmatpush.msrb.mxu3 %v260_v3  ;;  %v416_v36 = vld [vmem:[#allocation5 + $0x708] sm:$0xff] }
  0x8e   :  { %628 = vmatmul.f32.vlgmr.msra.gmra.mxu1 %v3224_v4  ;;  %752 = vmatpush.msra.mxu0 %v380_v5  ;;  %v480_v37 = vld [vmem:[#allocation5 + $0x908] sm:$0xff] }
  0x8f   :  { %772 = vmatpush.msra.mxu1 %v444_v6  ;;  %792 = vmatpush.msra.mxu2 %v508_v7  ;;  %v548_v38 = vld [vmem:[#allocation5 + $0xb28] sm:$0xff] }
  0x90   :  { %747 = vmatpush.msrb.mxu3 %v256_v8  ;;  %753 = vmatpush.msra.mxu0 %v376_v9  ;;  %v348_v39 = vld [vmem:[#allocation5 + $0x4e8] sm:$0xff] }
  0x91   :  { %773 = vmatpush.msra.mxu1 %v440_v10  ;;  %793 = vmatpush.msra.mxu2 %v504_v11  ;;  %v412_v40 = vld [vmem:[#allocation5 + $0x6e8] sm:$0xff]  ;;  %v253_v11 = vld [vmem:[#allocation5 + $0x1f0] sm:$0xff] }
  0x92   :  { %812 = vmatpush.msra.mxu3 %v572_v12  ;;  %754 = vmatpush.msra.mxu0 %v372_v13  ;;  %v476_v41 = vld [vmem:[#allocation5 + $0x8e8] sm:$0xff]  ;;  %v317_v12 = vld [vmem:[#allocation5 + $0x3f0] sm:$0xff] }
  0x93   :  { %774 = vmatpush.msra.mxu1 %v436_v14  ;;  %794 = vmatpush.msra.mxu2 %v500_v15  ;;  %v544_v42 = vld [vmem:[#allocation5 + $0xb08] sm:$0xff]  ;;  %v381_v13 = vld [vmem:[#allocation5 + $0x5f0] sm:$0xff] }
  0x94   :  { %813 = vmatpush.msra.mxu3 %v568_v16  ;;  %688 = vmatmul.f32.vlgmr.msrb.gmra.mxu0 %v3228_v17  ;;  %v344_v43 = vld [vmem:[#allocation5 + $0x4c8] sm:$0xff]  ;;  %v249_v15 = vld [vmem:[#allocation5 + $0x1d0] sm:$0xff] }
  0x95   :  { %775 = vmatpush.msra.mxu1 %v432_v18  ;;  %755 = vmatpush.msra.mxu0 %v368_v19  ;;  %v408_v44 = vld [vmem:[#allocation5 + $0x6c8] sm:$0xff]  ;;  %v313_v16 = vld [vmem:[#allocation5 + $0x3d0] sm:$0xff] }
  0x96   :  { %795 = vmatpush.msra.mxu2 %v496_v20  ;;  %814 = vmatpush.msra.mxu3 %v564_v21  ;;  %v472_v45 = vld [vmem:[#allocation5 + $0x8c8] sm:$0xff]  ;;  %v377_v18 = vld [vmem:[#allocation5 + $0x5d0] sm:$0xff] }
  0x97   :  { %708 = vmatmul.f32.vlgmr.msrb.gmra.mxu1 %v3230_v22  ;;  %756 = vmatpush.msra.mxu0 %v364_v23  ;;  %v540_v46 = vld [vmem:[#allocation5 + $0xae8] sm:$0xff]  ;;  %v445_v19 = vld [vmem:[#allocation5 + $0x7f0] sm:$0xff] }
  0x98   :  { %776 = vmatpush.msra.mxu1 %v428_v24  ;;  %796 = vmatpush.msra.mxu2 %v492_v25  ;;  %v340_v47 = vld [vmem:[#allocation5 + $0x4a8] sm:$0xff]  ;;  %v245_v20 = vld [vmem:[#allocation5 + $0x1b0] sm:$0xff] }
  0x99   :  { %815 = vmatpush.msra.mxu3 %v560_v26  ;;  %757 = vmatpush.msra.mxu0 %v360_v27  ;;  %v404_v48 = vld [vmem:[#allocation5 + $0x6a8] sm:$0xff]  ;;  %v309_v21 = vld [vmem:[#allocation5 + $0x3b0] sm:$0xff] }
  0x9a   :  { %777 = vmatpush.msra.mxu1 %v424_v28  ;;  %797 = vmatpush.msra.mxu2 %v488_v29  ;;  %v468_v49 = vld [vmem:[#allocation5 + $0x8a8] sm:$0xff]  ;;  %v373_v23 = vld [vmem:[#allocation5 + $0x5b0] sm:$0xff] }
  0x9b   :  { %816 = vmatpush.msra.mxu3 %v556_v30  ;;  %758 = vmatpush.msra.mxu0 %v356_v31  ;;  %v536_v50 = vld [vmem:[#allocation5 + $0xac8] sm:$0xff]  ;;  %v441_v24 = vld [vmem:[#allocation5 + $0x7d0] sm:$0xff] }
  0x9c   :  { %778 = vmatpush.msra.mxu1 %v420_v32  ;;  %798 = vmatpush.msra.mxu2 %v484_v33  ;;  %v336_v51 = vld [vmem:[#allocation5 + $0x488] sm:$0xff]  ;;  %v241_v25 = vld [vmem:[#allocation5 + $0x190] sm:$0xff] }
  0x9d   :  { %817 = vmatpush.msra.mxu3 %v552_v34  ;;  %759 = vmatpush.msra.mxu0 %v352_v35  ;;  %v400_v52 = vld [vmem:[#allocation5 + $0x688] sm:$0xff]  ;;  %v305_v26 = vld [vmem:[#allocation5 + $0x390] sm:$0xff] }
  0x9e   :  { %779 = vmatpush.msra.mxu1 %v416_v36  ;;  %799 = vmatpush.msra.mxu2 %v480_v37  ;;  %v464_v53 = vld [vmem:[#allocation5 + $0x888] sm:$0xff]  ;;  %v369_v27 = vld [vmem:[#allocation5 + $0x590] sm:$0xff] }
  0x9f   :  { %818 = vmatpush.msra.mxu3 %v548_v38  ;;  %760 = vmatpush.msra.mxu0 %v348_v39  ;;  %v532_v54 = vld [vmem:[#allocation5 + $0xaa8] sm:$0xff]  ;;  %v437_v28 = vld [vmem:[#allocation5 + $0x7b0] sm:$0xff] }
  0xa0   :  { %780 = vmatpush.msra.mxu1 %v412_v40  ;;  %800 = vmatpush.msra.mxu2 %v476_v41  ;;  %v332_v55 = vld [vmem:[#allocation5 + $0x468] sm:$0xff]  ;;  %v237_v29 = vld [vmem:[#allocation5 + $0x170] sm:$0xff] }
  0xa1   :  { %819 = vmatpush.msra.mxu3 %v544_v42  ;;  %761 = vmatpush.msra.mxu0 %v344_v43  ;;  %v396_v56 = vld [vmem:[#allocation5 + $0x668] sm:$0xff]  ;;  %v301_v30 = vld [vmem:[#allocation5 + $0x370] sm:$0xff] }
  0xa2   :  { %781 = vmatpush.msra.mxu1 %v408_v44  ;;  %801 = vmatpush.msra.mxu2 %v472_v45  ;;  %v460_v58 = vld [vmem:[#allocation5 + $0x868] sm:$0xff]  ;;  %v365_v31 = vld [vmem:[#allocation5 + $0x570] sm:$0xff] }
  0xa3   :  { %820 = vmatpush.msra.mxu3 %v540_v46  ;;  %762 = vmatpush.msra.mxu0 %v340_v47  ;;  %v528_v59 = vld [vmem:[#allocation5 + $0xa88] sm:$0xff]  ;;  %v433_v32 = vld [vmem:[#allocation5 + $0x790] sm:$0xff] }
  0xa4   :  { %782 = vmatpush.msra.mxu1 %v404_v48  ;;  %802 = vmatpush.msra.mxu2 %v468_v49  ;;  %v328_v60 = vld [vmem:[#allocation5 + $0x448] sm:$0xff]  ;;  %v233_v33 = vld [vmem:[#allocation5 + $0x150] sm:$0xff] }
  0xa5   :  { %821 = vmatpush.msra.mxu3 %v536_v50  ;;  %763 = vmatpush.msra.mxu0 %v336_v51  ;;  %v392_v61 = vld [vmem:[#allocation5 + $0x648] sm:$0xff]  ;;  %v297_v34 = vld [vmem:[#allocation5 + $0x350] sm:$0xff] }
  0xa6   :  { %783 = vmatpush.msra.mxu1 %v400_v52  ;;  %803 = vmatpush.msra.mxu2 %v464_v53  ;;  %v456_v0 = vld [vmem:[#allocation5 + $0x848] sm:$0xff]  ;;  %v361_v35 = vld [vmem:[#allocation5 + $0x550] sm:$0xff] }
  0xa7   :  { %822 = vmatpush.msra.mxu3 %v532_v54  ;;  %728 = vmatmul.f32.vlgmr.msrb.gmra.mxu2 %v3218_v62  ;;  %v524_v1 = vld [vmem:[#allocation5 + $0xa68] sm:$0xff]  ;;  %v429_v36 = vld [vmem:[#allocation5 + $0x770] sm:$0xff] }
  0xa8   :  { %764 = vmatpush.msra.mxu0 %v332_v55  ;;  %784 = vmatpush.msra.mxu1 %v396_v56  ;;  %v324_v2 = vld [vmem:[#allocation5 + $0x428] sm:$0xff]  ;;  %v229_v37 = vld [vmem:[#allocation5 + $0x130] sm:$0xff] }
  0xa9   :  { %804 = vmatpush.msra.mxu2 %v460_v58  ;;  %823 = vmatpush.msra.mxu3 %v528_v59  ;;  %v388_v3 = vld [vmem:[#allocation5 + $0x628] sm:$0xff]  ;;  %v293_v38 = vld [vmem:[#allocation5 + $0x330] sm:$0xff] }
  0xaa   :  { %765 = vmatpush.msra.mxu0 %v328_v60  ;;  %748 = vmatmul.f32.vlgmr.msrb.gmra.mxu3 %v3224_v4  ;;  %v452_v5 = vld [vmem:[#allocation5 + $0x828] sm:$0xff]  ;;  %v357_v39 = vld [vmem:[#allocation5 + $0x530] sm:$0xff] }
  0xab   :  { %785 = vmatpush.msra.mxu1 %v392_v61  ;;  %v520_v6 = vld [vmem:[#allocation5 + $0xa48] sm:$0xff]  ;;  %805 = vmatpush.msra.mxu2 %v456_v0  ;;  %v425_v40 = vld [vmem:[#allocation5 + $0x750] sm:$0xff] }
  0xac   :  { %824 = vmatpush.msra.mxu3 %v524_v1  ;;  %v320_v7 = vld [vmem:[#allocation5 + $0x408] sm:$0xff]  ;;  %766 = vmatpush.msra.mxu0 %v324_v2  ;;  %v225_v41 = vld [vmem:[#allocation5 + $0x110] sm:$0xff] }
  0xad   :  { %v384_v8 = vld [vmem:[#allocation5 + $0x608] sm:$0xff]  ;;  %786 = vmatpush.msra.mxu1 %v388_v3  ;;  %806 = vmatpush.msra.mxu2 %v452_v5  ;;  %v289_v42 = vld [vmem:[#allocation5 + $0x310] sm:$0xff] }
  0xae   :  { %v448_v9 = vld [vmem:[#allocation5 + $0x808] sm:$0xff]  ;;  %825 = vmatpush.msra.mxu3 %v520_v6  ;;  %767 = vmatpush.msra.mxu0 %v320_v7  ;;  %v353_v43 = vld [vmem:[#allocation5 + $0x510] sm:$0xff] }
  0xaf   :  { %v516_v10 = vld [vmem:[#allocation5 + $0xa28] sm:$0xff]  ;;  %787 = vmatpush.msra.mxu1 %v384_v8  ;;  %807 = vmatpush.msra.mxu2 %v448_v9  ;;  %v421_v44 = vld [vmem:[#allocation5 + $0x730] sm:$0xff] }
  0xb0   :  { %826 = vmatpush.msra.mxu3 %v516_v10  ;;  %v512_v14 = vld [vmem:[#allocation5 + $0xa08] sm:$0xff]  ;;  %808 = vmatmul.f32.vlgmr.msra.gmra.mxu2 %v3228_v17  ;;  %v221_v45 = vld [vmem:[#allocation5 + $0xf0] sm:$0xff] }
  0xb1   :  { %832 = vmatpush.msrb.mxu0 %v253_v11  ;;  %852 = vmatpush.msrb.mxu1 %v317_v12  ;;  %v285_v46 = vld [vmem:[#allocation5 + $0x2f0] sm:$0xff] }
  0xb2   :  { %872 = vmatpush.msrb.mxu2 %v381_v13  ;;  %827 = vmatpush.msra.mxu3 %v512_v14  ;;  %v349_v47 = vld [vmem:[#allocation5 + $0x4f0] sm:$0xff] }
  0xb3   :  { %768 = vmatmul.f32.vlgmr.msra.gmra.mxu0 %v3216_v57  ;;  %828 = vmatmul.f32.vlgmr.msra.gmra.mxu3 %v3230_v22  ;;  %v417_v48 = vld [vmem:[#allocation5 + $0x710] sm:$0xff] }
  0xb4   :  { %833 = vmatpush.msrb.mxu0 %v249_v15  ;;  %853 = vmatpush.msrb.mxu1 %v313_v16  ;;  %v217_v49 = vld [vmem:[#allocation5 + $0xd0] sm:$0xff] }
  0xb5   :  { %873 = vmatpush.msrb.mxu2 %v377_v18  ;;  %892 = vmatpush.msrb.mxu3 %v445_v19  ;;  %v281_v50 = vld [vmem:[#allocation5 + $0x2d0] sm:$0xff] }
  0xb6   :  { %788 = vmatmul.f32.vlgmr.msra.gmra.mxu1 %v3221_v63  ;;  %834 = vmatpush.msrb.mxu0 %v245_v20  ;;  %v345_v51 = vld [vmem:[#allocation5 + $0x4d0] sm:$0xff]  ;;  %v254_v20 = vld [vmem:[#allocation5 + $0x1f8] sm:$0xff] }
  0xb7   :  { %854 = vmatpush.msrb.mxu1 %v309_v21  ;;  %874 = vmatpush.msrb.mxu2 %v373_v23  ;;  %v413_v52 = vld [vmem:[#allocation5 + $0x6f0] sm:$0xff] }
  0xb8   :  { %893 = vmatpush.msrb.mxu3 %v441_v24  ;;  %835 = vmatpush.msrb.mxu0 %v241_v25  ;;  %v213_v53 = vld [vmem:[#allocation5 + $0xb0] sm:$0xff]  ;;  %v250_v25 = vld [vmem:[#allocation5 + $0x1d8] sm:$0xff] }
  0xb9   :  { %855 = vmatpush.msrb.mxu1 %v305_v26  ;;  %875 = vmatpush.msrb.mxu2 %v369_v27  ;;  %v277_v54 = vld [vmem:[#allocation5 + $0x2b0] sm:$0xff]  ;;  %v318_v26 = vld [vmem:[#allocation5 + $0x3f8] sm:$0xff] }
  0xba   :  { %894 = vmatpush.msrb.mxu3 %v437_v28  ;;  %836 = vmatpush.msrb.mxu0 %v237_v29  ;;  %v341_v55 = vld [vmem:[#allocation5 + $0x4b0] sm:$0xff]  ;;  %v246_v29 = vld [vmem:[#allocation5 + $0x1b8] sm:$0xff] }
  0xbb   :  { %856 = vmatpush.msrb.mxu1 %v301_v30  ;;  %876 = vmatpush.msrb.mxu2 %v365_v31  ;;  %v409_v56 = vld [vmem:[#allocation5 + $0x6d0] sm:$0xff]  ;;  %v314_v30 = vld [vmem:[#allocation5 + $0x3d8] sm:$0xff] }
  0xbc   :  { %895 = vmatpush.msrb.mxu3 %v433_v32  ;;  %837 = vmatpush.msrb.mxu0 %v233_v33  ;;  %v209_v58 = vld [vmem:[#allocation5 + $0x90] sm:$0xff]  ;;  %v242_v33 = vld [vmem:[#allocation5 + $0x198] sm:$0xff] }
  0xbd   :  { %857 = vmatpush.msrb.mxu1 %v297_v34  ;;  %877 = vmatpush.msrb.mxu2 %v361_v35  ;;  %v273_v59 = vld [vmem:[#allocation5 + $0x290] sm:$0xff]  ;;  %v310_v34 = vld [vmem:[#allocation5 + $0x3b8] sm:$0xff] }
  0xbe   :  { %896 = vmatpush.msrb.mxu3 %v429_v36  ;;  %838 = vmatpush.msrb.mxu0 %v229_v37  ;;  %v337_v60 = vld [vmem:[#allocation5 + $0x490] sm:$0xff]  ;;  %v238_v37 = vld [vmem:[#allocation5 + $0x178] sm:$0xff] }
  0xbf   :  { %858 = vmatpush.msrb.mxu1 %v293_v38  ;;  %878 = vmatpush.msrb.mxu2 %v357_v39  ;;  %v405_v61 = vld [vmem:[#allocation5 + $0x6b0] sm:$0xff]  ;;  %v306_v38 = vld [vmem:[#allocation5 + $0x398] sm:$0xff] }
  0xc0   :  { %897 = vmatpush.msrb.mxu3 %v425_v40  ;;  %839 = vmatpush.msrb.mxu0 %v225_v41  ;;  %v205_v0 = vld [vmem:[#allocation5 + $0x70] sm:$0xff]  ;;  %v234_v41 = vld [vmem:[#allocation5 + $0x158] sm:$0xff] }
  0xc1   :  { %859 = vmatpush.msrb.mxu1 %v289_v42  ;;  %879 = vmatpush.msrb.mxu2 %v353_v43  ;;  %v269_v1 = vld [vmem:[#allocation5 + $0x270] sm:$0xff]  ;;  %v302_v42 = vld [vmem:[#allocation5 + $0x378] sm:$0xff] }
  0xc2   :  { %898 = vmatpush.msrb.mxu3 %v421_v44  ;;  %840 = vmatpush.msrb.mxu0 %v221_v45  ;;  %v333_v2 = vld [vmem:[#allocation5 + $0x470] sm:$0xff]  ;;  %v230_v45 = vld [vmem:[#allocation5 + $0x138] sm:$0xff] }
  0xc3   :  { %860 = vmatpush.msrb.mxu1 %v285_v46  ;;  %880 = vmatpush.msrb.mxu2 %v349_v47  ;;  %v401_v3 = vld [vmem:[#allocation5 + $0x690] sm:$0xff]  ;;  %v298_v46 = vld [vmem:[#allocation5 + $0x358] sm:$0xff] }
  0xc4   :  { %899 = vmatpush.msrb.mxu3 %v417_v48  ;;  %841 = vmatpush.msrb.mxu0 %v217_v49  ;;  %v201_v5 = vld [vmem:[#allocation5 + $0x50] sm:$0xff]  ;;  %v226_v49 = vld [vmem:[#allocation5 + $0x118] sm:$0xff] }
  0xc5   :  { %861 = vmatpush.msrb.mxu1 %v281_v50  ;;  %881 = vmatpush.msrb.mxu2 %v345_v51  ;;  %v265_v6 = vld [vmem:[#allocation5 + $0x250] sm:$0xff]  ;;  %v294_v50 = vld [vmem:[#allocation5 + $0x338] sm:$0xff] }
  0xc6   :  { %900 = vmatpush.msrb.mxu3 %v413_v52  ;;  %842 = vmatpush.msrb.mxu0 %v213_v53  ;;  %v329_v7 = vld [vmem:[#allocation5 + $0x450] sm:$0xff]  ;;  %v222_v53 = vld [vmem:[#allocation5 + $0xf8] sm:$0xff] }
  0xc7   :  { %862 = vmatpush.msrb.mxu1 %v277_v54  ;;  %882 = vmatpush.msrb.mxu2 %v341_v55  ;;  %v397_v8 = vld [vmem:[#allocation5 + $0x670] sm:$0xff]  ;;  %v290_v54 = vld [vmem:[#allocation5 + $0x318] sm:$0xff] }
  0xc8   :  { %901 = vmatpush.msrb.mxu3 %v409_v56  ;;  %843 = vmatpush.msrb.mxu0 %v209_v58  ;;  %v197_v9 = vld [vmem:[#allocation5 + $0x30] sm:$0xff]  ;;  %v218_v58 = vld [vmem:[#allocation5 + $0xd8] sm:$0xff] }
  0xc9   :  { %863 = vmatpush.msrb.mxu1 %v273_v59  ;;  %883 = vmatpush.msrb.mxu2 %v337_v60  ;;  %v261_v10 = vld [vmem:[#allocation5 + $0x230] sm:$0xff]  ;;  %v286_v59 = vld [vmem:[#allocation5 + $0x2f8] sm:$0xff] }
  0xca   :  { %902 = vmatpush.msrb.mxu3 %v405_v61  ;;  %844 = vmatpush.msrb.mxu0 %v205_v0  ;;  %v325_v11 = vld [vmem:[#allocation5 + $0x430] sm:$0xff]  ;;  %v214_v0 = vld [vmem:[#allocation5 + $0xb8] sm:$0xff] }
  0xcb   :  { %864 = vmatpush.msrb.mxu1 %v269_v1  ;;  %884 = vmatpush.msrb.mxu2 %v333_v2  ;;  %v393_v12 = vld [vmem:[#allocation5 + $0x650] sm:$0xff]  ;;  %v282_v1 = vld [vmem:[#allocation5 + $0x2d8] sm:$0xff] }
  0xcc   :  { %903 = vmatpush.msrb.mxu3 %v401_v3  ;;  %845 = vmatpush.msrb.mxu0 %v201_v5  ;;  %v193_v13 = vld [vmem:[#allocation5 + $0x10] sm:$0xff]  ;;  %v210_v5 = vld [vmem:[#allocation5 + $0x98] sm:$0xff] }
  0xcd   :  { %865 = vmatpush.msrb.mxu1 %v265_v6  ;;  %885 = vmatpush.msrb.mxu2 %v329_v7  ;;  %v257_v14 = vld [vmem:[#allocation5 + $0x210] sm:$0xff]  ;;  %v278_v6 = vld [vmem:[#allocation5 + $0x2b8] sm:$0xff] }
  0xce   :  { %904 = vmatpush.msrb.mxu3 %v397_v8  ;;  %846 = vmatpush.msrb.mxu0 %v197_v9  ;;  %v321_v15 = vld [vmem:[#allocation5 + $0x410] sm:$0xff]  ;;  %v206_v9 = vld [vmem:[#allocation5 + $0x78] sm:$0xff] }
  0xcf   :  { %866 = vmatpush.msrb.mxu1 %v261_v10  ;;  %v389_v16 = vld [vmem:[#allocation5 + $0x630] sm:$0xff]  ;;  %886 = vmatpush.msrb.mxu2 %v325_v11  ;;  %v274_v10 = vld [vmem:[#allocation5 + $0x298] sm:$0xff] }
  0xd0   :  { %905 = vmatpush.msrb.mxu3 %v393_v12  ;;  %v509_v18 = vld [vmem:[#allocation5 + $0x9f0] sm:$0xff]  ;;  %847 = vmatpush.msrb.mxu0 %v193_v13  ;;  %v202_v13 = vld [vmem:[#allocation5 + $0x58] sm:$0xff] }
  0xd1   :  { %v573_v19 = vld [vmem:[#allocation5 + $0xbf0] sm:$0xff]  ;;  %867 = vmatpush.msrb.mxu1 %v257_v14  ;;  %887 = vmatpush.msrb.mxu2 %v321_v15  ;;  %v270_v14 = vld [vmem:[#allocation5 + $0x278] sm:$0xff] }
  0xd2   :  { %v385_v21 = vld [vmem:[#allocation5 + $0x610] sm:$0xff]  ;;  %906 = vmatpush.msrb.mxu3 %v389_v16  ;;  %912 = vmatpush.msra.mxu0 %v509_v18  ;;  %v198_v16 = vld [vmem:[#allocation5 + $0x38] sm:$0xff] }
  0xd3   :  { %v505_v23 = vld [vmem:[#allocation5 + $0x9d0] sm:$0xff]  ;;  %932 = vmatpush.msra.mxu1 %v573_v19  ;;  %952 = vmatpush.msra.mxu2 %v254_v20  ;;  %v266_v18 = vld [vmem:[#allocation5 + $0x258] sm:$0xff] }
  0xd4   :  { %v569_v24 = vld [vmem:[#allocation5 + $0xbd0] sm:$0xff]  ;;  %907 = vmatpush.msrb.mxu3 %v385_v21  ;;  %913 = vmatpush.msra.mxu0 %v505_v23  ;;  %v194_v19 = vld [vmem:[#allocation5 + $0x18] sm:$0xff] }
  0xd5   :  { %v501_v27 = vld [vmem:[#allocation5 + $0x9b0] sm:$0xff]  ;;  %933 = vmatpush.msra.mxu1 %v569_v24  ;;  %953 = vmatpush.msra.mxu2 %v250_v25  ;;  %v262_v20 = vld [vmem:[#allocation5 + $0x238] sm:$0xff] }
  0xd6   :  { %v565_v28 = vld [vmem:[#allocation5 + $0xbb0] sm:$0xff]  ;;  %972 = vmatpush.msra.mxu3 %v318_v26  ;;  %914 = vmatpush.msra.mxu0 %v501_v27  ;;  %v446_v21 = vld [vmem:[#allocation5 + $0x7f8] sm:$0xff] }
  0xd7   :  { %v497_v31 = vld [vmem:[#allocation5 + $0x990] sm:$0xff]  ;;  %934 = vmatpush.msra.mxu1 %v565_v28  ;;  %954 = vmatpush.msra.mxu2 %v246_v29  ;;  %v382_v23 = vld [vmem:[#allocation5 + $0x5f8] sm:$0xff] }
  0xd8   :  { %v561_v32 = vld [vmem:[#allocation5 + $0xb90] sm:$0xff]  ;;  %973 = vmatpush.msra.mxu3 %v314_v30  ;;  %915 = vmatpush.msra.mxu0 %v497_v31  ;;  %v510_v24 = vld [vmem:[#allocation5 + $0x9f8] sm:$0xff] }
  0xd9   :  { %v493_v35 = vld [vmem:[#allocation5 + $0x970] sm:$0xff]  ;;  %935 = vmatpush.msra.mxu1 %v561_v32  ;;  %955 = vmatpush.msra.mxu2 %v242_v33  ;;  %v258_v25 = vld [vmem:[#allocation5 + $0x218] sm:$0xff] }
  0xda   :  { %v557_v36 = vld [vmem:[#allocation5 + $0xb70] sm:$0xff]  ;;  %974 = vmatpush.msra.mxu3 %v310_v34  ;;  %916 = vmatpush.msra.mxu0 %v493_v35  ;;  %v378_v26 = vld [vmem:[#allocation5 + $0x5d8] sm:$0xff] }
  0xdb   :  { %v489_v39 = vld [vmem:[#allocation5 + $0x950] sm:$0xff]  ;;  %936 = vmatpush.msra.mxu1 %v557_v36  ;;  %956 = vmatpush.msra.mxu2 %v238_v37  ;;  %v442_v27 = vld [vmem:[#allocation5 + $0x7d8] sm:$0xff] }
  0xdc   :  { %v553_v40 = vld [vmem:[#allocation5 + $0xb50] sm:$0xff]  ;;  %975 = vmatpush.msra.mxu3 %v306_v38  ;;  %917 = vmatpush.msra.mxu0 %v489_v39  ;;  %v506_v28 = vld [vmem:[#allocation5 + $0x9d8] sm:$0xff] }
  0xdd   :  { %v485_v43 = vld [vmem:[#allocation5 + $0x930] sm:$0xff]  ;;  %937 = vmatpush.msra.mxu1 %v553_v40  ;;  %957 = vmatpush.msra.mxu2 %v234_v41  ;;  %v574_v29 = vld [vmem:[#allocation5 + $0xbf8] sm:$0xff] }
  0xde   :  { %v549_v44 = vld [vmem:[#allocation5 + $0xb30] sm:$0xff]  ;;  %976 = vmatpush.msra.mxu3 %v302_v42  ;;  %918 = vmatpush.msra.mxu0 %v485_v43  ;;  %v374_v30 = vld [vmem:[#allocation5 + $0x5b8] sm:$0xff] }
  0xdf   :  { %v481_v47 = vld [vmem:[#allocation5 + $0x910] sm:$0xff]  ;;  %938 = vmatpush.msra.mxu1 %v549_v44  ;;  %958 = vmatpush.msra.mxu2 %v230_v45  ;;  %v438_v31 = vld [vmem:[#allocation5 + $0x7b8] sm:$0xff] }
  0xe0   :  { %v545_v48 = vld [vmem:[#allocation5 + $0xb10] sm:$0xff]  ;;  %977 = vmatpush.msra.mxu3 %v298_v46  ;;  %919 = vmatpush.msra.mxu0 %v481_v47  ;;  %v502_v32 = vld [vmem:[#allocation5 + $0x9b8] sm:$0xff] }
  0xe1   :  { %v477_v51 = vld [vmem:[#allocation5 + $0x8f0] sm:$0xff]  ;;  %939 = vmatpush.msra.mxu1 %v545_v48  ;;  %959 = vmatpush.msra.mxu2 %v226_v49  ;;  %v570_v33 = vld [vmem:[#allocation5 + $0xbd8] sm:$0xff] }
  0xe2   :  { %v541_v52 = vld [vmem:[#allocation5 + $0xaf0] sm:$0xff]  ;;  %978 = vmatpush.msra.mxu3 %v294_v50  ;;  %920 = vmatpush.msra.mxu0 %v477_v51  ;;  %v370_v34 = vld [vmem:[#allocation5 + $0x598] sm:$0xff] }
  0xe3   :  { %v473_v55 = vld [vmem:[#allocation5 + $0x8d0] sm:$0xff]  ;;  %940 = vmatpush.msra.mxu1 %v541_v52  ;;  %960 = vmatpush.msra.mxu2 %v222_v53  ;;  %v498_v35 = vld [vmem:[#allocation5 + $0x998] sm:$0xff] }
  0xe4   :  { %v537_v56 = vld [vmem:[#allocation5 + $0xad0] sm:$0xff]  ;;  %979 = vmatpush.msra.mxu3 %v290_v54  ;;  %921 = vmatpush.msra.mxu0 %v473_v55  ;;  %v566_v36 = vld [vmem:[#allocation5 + $0xbb8] sm:$0xff] }
  0xe5   :  { %v469_v60 = vld [vmem:[#allocation5 + $0x8b0] sm:$0xff]  ;;  %941 = vmatpush.msra.mxu1 %v537_v56  ;;  %961 = vmatpush.msra.mxu2 %v218_v58  ;;  %v366_v37 = vld [vmem:[#allocation5 + $0x578] sm:$0xff] }
  0xe6   :  { %v533_v61 = vld [vmem:[#allocation5 + $0xab0] sm:$0xff]  ;;  %980 = vmatpush.msra.mxu3 %v286_v59  ;;  %922 = vmatpush.msra.mxu0 %v469_v60  ;;  %v430_v38 = vld [vmem:[#allocation5 + $0x778] sm:$0xff] }
  0xe7   :  { %v465_v2 = vld [vmem:[#allocation5 + $0x890] sm:$0xff]  ;;  %942 = vmatpush.msra.mxu1 %v533_v61  ;;  %962 = vmatpush.msra.mxu2 %v214_v0  ;;  %v562_v39 = vld [vmem:[#allocation5 + $0xb98] sm:$0xff] }
  0xe8   :  { %v529_v3 = vld [vmem:[#allocation5 + $0xa90] sm:$0xff]  ;;  %981 = vmatpush.msra.mxu3 %v282_v1  ;;  %888 = vmatmul.f32.vlgmr.msrb.gmra.mxu2 %v3216_v57  ;;  %v362_v40 = vld [vmem:[#allocation5 + $0x558] sm:$0xff] }
  0xe9   :  { %923 = vmatpush.msra.mxu0 %v465_v2  ;;  %v461_v7 = vld [vmem:[#allocation5 + $0x870] sm:$0xff]  ;;  %943 = vmatpush.msra.mxu1 %v529_v3  ;;  %v426_v41 = vld [vmem:[#allocation5 + $0x758] sm:$0xff] }
  0xea   :  { %963 = vmatpush.msra.mxu2 %v210_v5  ;;  %v525_v8 = vld [vmem:[#allocation5 + $0xa70] sm:$0xff]  ;;  %982 = vmatpush.msra.mxu3 %v278_v6  ;;  %v490_v42 = vld [vmem:[#allocation5 + $0x958] sm:$0xff] }
  0xeb   :  { %848 = vmatmul.f32.vlgmr.msrb.gmra.mxu0 %v3218_v62  ;;  %908 = vmatmul.f32.vlgmr.msrb.gmra.mxu3 %v3221_v63  ;;  %v457_v11 = vld [vmem:[#allocation5 + $0x850] sm:$0xff]  ;;  %v558_v43 = vld [vmem:[#allocation5 + $0xb78] sm:$0xff] }
  0xec   :  { %924 = vmatpush.msra.mxu0 %v461_v7  ;;  %v521_v12 = vld [vmem:[#allocation5 + $0xa50] sm:$0xff]  ;;  %944 = vmatpush.msra.mxu1 %v525_v8  ;;  %v358_v44 = vld [vmem:[#allocation5 + $0x538] sm:$0xff] }
  0xed   :  { %964 = vmatpush.msra.mxu2 %v206_v9  ;;  %983 = vmatpush.msra.mxu3 %v274_v10  ;;  %v453_v57 = vld [vmem:[#allocation5 + $0x830] sm:$0xff]  ;;  %v422_v45 = vld [vmem:[#allocation5 + $0x738] sm:$0xff] }
  0xee   :  { %868 = vmatmul.f32.vlgmr.msrb.gmra.mxu1 %v3224_v4  ;;  %v517_v15 = vld [vmem:[#allocation5 + $0xa30] sm:$0xff]  ;;  %925 = vmatpush.msra.mxu0 %v457_v11  ;;  %v486_v46 = vld [vmem:[#allocation5 + $0x938] sm:$0xff] }
  0xef   :  { %945 = vmatpush.msra.mxu1 %v521_v12  ;;  %965 = vmatpush.msra.mxu2 %v202_v13  ;;  %v449_v62 = vld [vmem:[#allocation5 + $0x810] sm:$0xff]  ;;  %v554_v47 = vld [vmem:[#allocation5 + $0xb58] sm:$0xff] }
  0xf0   :  { %984 = vmatpush.msra.mxu3 %v270_v14  ;;  %v513_v63 = vld [vmem:[#allocation5 + $0xa10] sm:$0xff]  ;;  %926 = vmatpush.msra.mxu0 %v453_v57  ;;  %v354_v48 = vld [vmem:[#allocation5 + $0x518] sm:$0xff] }
  0xf1   :  { %946 = vmatpush.msra.mxu1 %v517_v15  ;;  %966 = vmatpush.msra.mxu2 %v198_v16  ;;  %v418_v49 = vld [vmem:[#allocation5 + $0x718] sm:$0xff]  ;;  %v2810_v12 = vld.sshfl [vmem:[#allocation1] sm:$0xff pattern:$0x73625140] }
  0xf2   :  { %985 = vmatpush.msra.mxu3 %v266_v18  ;;  %927 = vmatpush.msra.mxu0 %v449_v62  ;;  %v482_v50 = vld [vmem:[#allocation5 + $0x918] sm:$0xff] }
  0xf3   :  { %947 = vmatpush.msra.mxu1 %v513_v63  ;;  %967 = vmatpush.msra.mxu2 %v194_v19  ;;  %v550_v51 = vld [vmem:[#allocation5 + $0xb38] sm:$0xff] }
  0xf4   :  { %986 = vmatpush.msra.mxu3 %v262_v20  ;;  %928 = vmatmul.f32.vlgmr.msra.gmra.mxu0 %v3228_v17  ;;  %v434_v17 = vld [vmem:[#allocation5 + $0x798] sm:$0xff] }
  0xf5   :  { %1012 = vmatpush.msrb.mxu1 %v446_v21  ;;  %992 = vmatpush.msrb.mxu0 %v382_v23  ;;  %v350_v52 = vld [vmem:[#allocation5 + $0x4f8] sm:$0xff]  ;;  %v1144_v23 = vld [vmem:[#allocation7 + $0x1e0] sm:$0xff] }
  0xf6   :  { %1032 = vmatpush.msrb.mxu2 %v510_v24  ;;  %987 = vmatpush.msra.mxu3 %v258_v25  ;;  %v414_v53 = vld [vmem:[#allocation5 + $0x6f8] sm:$0xff]  ;;  %v1208_v24 = vld [vmem:[#allocation7 + $0x3e0] sm:$0xff] }
  0xf7   :  { %948 = vmatmul.f32.vlgmr.msra.gmra.mxu1 %v3230_v22  ;;  %993 = vmatpush.msrb.mxu0 %v378_v26  ;;  %v494_v22 = vld [vmem:[#allocation5 + $0x978] sm:$0xff] }
  0xf8   :  { %1013 = vmatpush.msrb.mxu1 %v442_v27  ;;  %1033 = vmatpush.msrb.mxu2 %v506_v28  ;;  %v478_v54 = vld [vmem:[#allocation5 + $0x8f8] sm:$0xff]  ;;  %v2812_v27 = vld.sshfl [vmem:[#allocation1 + $0x20] sm:$0xff pattern:$0x73625140]  ;;  %v1140_v28 = vld [vmem:[#allocation7 + $0x1c0] sm:$0xff] }
  0xf9   :  { %1052 = vmatpush.msrb.mxu3 %v574_v29  ;;  %994 = vmatpush.msrb.mxu0 %v374_v30  ;;  %v546_v55 = vld [vmem:[#allocation5 + $0xb18] sm:$0xff]  ;;  %v1204_v29 = vld [vmem:[#allocation7 + $0x3c0] sm:$0xff] }
  0xfa   :  { %1014 = vmatpush.msrb.mxu1 %v438_v31  ;;  %1034 = vmatpush.msrb.mxu2 %v502_v32  ;;  %v346_v56 = vld [vmem:[#allocation5 + $0x4d8] sm:$0xff]  ;;  %v2813_v30 = vld.sshfl [vmem:[#allocation1 + $0x18] sm:$0xff pattern:$0x73625140] }
  0xfb   :  { %1053 = vmatpush.msrb.mxu3 %v570_v33  ;;  %995 = vmatpush.msrb.mxu0 %v370_v34  ;;  %v410_v58 = vld [vmem:[#allocation5 + $0x6d8] sm:$0xff]  ;;  %v1136_v31 = vld [vmem:[#allocation7 + $0x1a0] sm:$0xff] }
  0xfc   :  { %1015 = vmatpush.msrb.mxu1 %v434_v17  ;;  %1035 = vmatpush.msrb.mxu2 %v498_v35  ;;  %v474_v59 = vld [vmem:[#allocation5 + $0x8d8] sm:$0xff]  ;;  %v1200_v33 = vld [vmem:[#allocation7 + $0x3a0] sm:$0xff] }
  0xfd   :  { %1054 = vmatpush.msrb.mxu3 %v566_v36  ;;  %996 = vmatpush.msrb.mxu0 %v366_v37  ;;  %v542_v60 = vld [vmem:[#allocation5 + $0xaf8] sm:$0xff]  ;;  %v1132_v17 = vld [vmem:[#allocation7 + $0x180] sm:$0xff]  ;;  %v609_v36 = vpop.f32.mrf.mxu0 }
  0xfe   :  { %1016 = vmatpush.msrb.mxu1 %v430_v38  ;;  %1036 = vmatpush.msrb.mxu2 %v494_v22  ;;  %v342_v61 = vld [vmem:[#allocation5 + $0x4b8] sm:$0xff]  ;;  %v1196_v35 = vld [vmem:[#allocation7 + $0x380] sm:$0xff] }
  0xff   :  { %1055 = vmatpush.msrb.mxu3 %v562_v39  ;;  %997 = vmatpush.msrb.mxu0 %v362_v40  ;;  %v406_v0 = vld [vmem:[#allocation5 + $0x6b8] sm:$0xff]  ;;  %v1128_v37 = vld [vmem:[#allocation7 + $0x160] sm:$0xff] }
 0x100   :  { %1017 = vmatpush.msrb.mxu1 %v426_v41  ;;  %1037 = vmatpush.msrb.mxu2 %v490_v42  ;;  %v470_v1 = vld [vmem:[#allocation5 + $0x8b8] sm:$0xff]  ;;  %v1192_v22 = vld [vmem:[#allocation7 + $0x360] sm:$0xff] }
 0x101   :  { %1056 = vmatpush.msrb.mxu3 %v558_v43  ;;  %998 = vmatpush.msrb.mxu0 %v358_v44  ;;  %v538_v2 = vld [vmem:[#allocation5 + $0xad8] sm:$0xff]  ;;  %v1124_v40 = vld [vmem:[#allocation7 + $0x140] sm:$0xff] }
 0x102   :  { %1018 = vmatpush.msrb.mxu1 %v422_v45  ;;  %1038 = vmatpush.msrb.mxu2 %v486_v46  ;;  %v338_v3 = vld [vmem:[#allocation5 + $0x498] sm:$0xff]  ;;  %v1188_v41 = vld [vmem:[#allocation7 + $0x340] sm:$0xff] }
 0x103   :  { %1057 = vmatpush.msrb.mxu3 %v554_v47  ;;  %999 = vmatpush.msrb.mxu0 %v354_v48  ;;  %v402_v5 = vld [vmem:[#allocation5 + $0x698] sm:$0xff]  ;;  %v1272_v42 = vld [vmem:[#allocation7 + $0x5e0] sm:$0xff] }
 0x104   :  { %1019 = vmatpush.msrb.mxu1 %v418_v49  ;;  %1039 = vmatpush.msrb.mxu2 %v482_v50  ;;  %v466_v6 = vld [vmem:[#allocation5 + $0x898] sm:$0xff]  ;;  %v1120_v43 = vld [vmem:[#allocation7 + $0x120] sm:$0xff] }
 0x105   :  { %1058 = vmatpush.msrb.mxu3 %v550_v51  ;;  %1000 = vmatpush.msrb.mxu0 %v350_v52  ;;  %v534_v7 = vld [vmem:[#allocation5 + $0xab8] sm:$0xff]  ;;  %v1184_v45 = vld [vmem:[#allocation7 + $0x320] sm:$0xff] }
 0x106   :  { %1020 = vmatpush.msrb.mxu1 %v414_v53  ;;  %1040 = vmatpush.msrb.mxu2 %v478_v54  ;;  %v334_v8 = vld [vmem:[#allocation5 + $0x478] sm:$0xff]  ;;  %v1268_v46 = vld [vmem:[#allocation7 + $0x5c0] sm:$0xff] }
 0x107   :  { %1059 = vmatpush.msrb.mxu3 %v546_v55  ;;  %1001 = vmatpush.msrb.mxu0 %v346_v56  ;;  %v398_v9 = vld [vmem:[#allocation5 + $0x678] sm:$0xff]  ;;  %v1116_v48 = vld [vmem:[#allocation7 + $0x100] sm:$0xff] }
 0x108   :  { %1021 = vmatpush.msrb.mxu1 %v410_v58  ;;  %1041 = vmatpush.msrb.mxu2 %v474_v59  ;;  %v462_v10 = vld [vmem:[#allocation5 + $0x878] sm:$0xff]  ;;  %v1180_v49 = vld [vmem:[#allocation7 + $0x300] sm:$0xff] }
 0x109   :  { %1060 = vmatpush.msrb.mxu3 %v542_v60  ;;  %1002 = vmatpush.msrb.mxu0 %v342_v61  ;;  %v530_v11 = vld [vmem:[#allocation5 + $0xa98] sm:$0xff]  ;;  %v1264_v50 = vld [vmem:[#allocation7 + $0x5a0] sm:$0xff] }
 0x10a   :  { %1022 = vmatpush.msrb.mxu1 %v406_v0  ;;  %1042 = vmatpush.msrb.mxu2 %v470_v1  ;;  %v330_v13 = vld [vmem:[#allocation5 + $0x458] sm:$0xff]  ;;  %v1112_v51 = vld [vmem:[#allocation7 + $0xe0] sm:$0xff] }
 0x10b   :  { %1061 = vmatpush.msrb.mxu3 %v538_v2  ;;  %1003 = vmatpush.msrb.mxu0 %v338_v3  ;;  %v394_v14 = vld [vmem:[#allocation5 + $0x658] sm:$0xff]  ;;  %v629_v34 = vpop.f32.mrf.mxu1  ;;  %v1176_v53 = vld [vmem:[#allocation7 + $0x2e0] sm:$0xff] }
 0x10c   :  { %1023 = vmatpush.msrb.mxu1 %v402_v5  ;;  %1043 = vmatpush.msrb.mxu2 %v466_v6  ;;  %v458_v57 = vld [vmem:[#allocation5 + $0x858] sm:$0xff]  ;;  %v630_v38 = vadd.f32 %v629_v34, %v609_v36  ;;  %v649_v39 = vpop.f32.mrf.mxu2  ;;  %v669_v47 = vpop.f32.mrf.mxu3  ;;  %v1260_v54 = vld [vmem:[#allocation7 + $0x580] sm:$0xff]  ;;  %v1137_v36 = vld [vmem:[#allocation7 + $0x1a8] sm:$0xff] }
 0x10d   :  { %1062 = vmatpush.msrb.mxu3 %v534_v7  ;;  %968 = vmatmul.f32.vlgmr.msra.gmra.mxu2 %v2810_v12  ;;  %v526_v15 = vld [vmem:[#allocation5 + $0xa78] sm:$0xff]  ;;  %v1108_v56 = vld [vmem:[#allocation7 + $0xc0] sm:$0xff] }
 0x10e   :  { %988 = vmatmul.f32.vlgmr.msra.gmra.mxu3 %v3224_v4  ;;  %1004 = vmatpush.msrb.mxu0 %v334_v8  ;;  %v326_v16 = vld [vmem:[#allocation5 + $0x438] sm:$0xff]  ;;  %v650_v44 = vadd.f32 %v649_v39, %v630_v38  ;;  %v1172_v58 = vld [vmem:[#allocation7 + $0x2c0] sm:$0xff]  ;;  %v1133_v39 = vld [vmem:[#allocation7 + $0x188] sm:$0xff] }
 0x10f   :  { %1024 = vmatpush.msrb.mxu1 %v398_v9  ;;  %1044 = vmatpush.msrb.mxu2 %v462_v10  ;;  %v390_v18 = vld [vmem:[#allocation5 + $0x638] sm:$0xff]  ;;  %v1256_v59 = vld [vmem:[#allocation7 + $0x560] sm:$0xff] }
 0x110   :  { %1063 = vmatpush.msrb.mxu3 %v530_v11  ;;  %1005 = vmatpush.msrb.mxu0 %v330_v13  ;;  %v454_v62 = vld [vmem:[#allocation5 + $0x838] sm:$0xff]  ;;  %v670_v52 = vadd.f32 %v669_v47, %v650_v44  ;;  %v1104_v60 = vld [vmem:[#allocation7 + $0xa0] sm:$0xff]  ;;  %v1193_v44 = vld [vmem:[#allocation7 + $0x368] sm:$0xff] }
 0x111   :  { %1025 = vmatpush.msrb.mxu1 %v394_v14  ;;  %v522_v63 = vld [vmem:[#allocation5 + $0xa58] sm:$0xff]  ;;  %1045 = vmatpush.msrb.mxu2 %v458_v57  ;;  %v689_v55 = vpop.f32.mrf.mxu0  ;;  %v1168_v0 = vld [vmem:[#allocation7 + $0x2a0] sm:$0xff]  ;;  %v1189_v47 = vld [vmem:[#allocation7 + $0x348] sm:$0xff] }
 0x112   :  { %1064 = vmatpush.msrb.mxu3 %v526_v15  ;;  %v322_v19 = vld [vmem:[#allocation5 + $0x418] sm:$0xff]  ;;  %1006 = vmatpush.msrb.mxu0 %v326_v16  ;;  %v690_v61 = vadd.f32 %v689_v55, %v670_v52  ;;  %v1252_v1 = vld [vmem:[#allocation7 + $0x540] sm:$0xff]  ;;  %v1117_v52 = vld [vmem:[#allocation7 + $0x108] sm:$0xff] }
 0x113   :  { %v386_v20 = vld [vmem:[#allocation5 + $0x618] sm:$0xff]  ;;  %1026 = vmatpush.msrb.mxu1 %v390_v18  ;;  %1046 = vmatpush.msrb.mxu2 %v454_v62  ;;  %v1100_v3 = vld [vmem:[#allocation7 + $0x80] sm:$0xff]  ;;  %v1113_v55 = vld [vmem:[#allocation7 + $0xe8] sm:$0xff] }
 0x114   :  { %v450_v4 = vld [vmem:[#allocation5 + $0x818] sm:$0xff]  ;;  %1065 = vmatpush.msrb.mxu3 %v522_v63  ;;  %1007 = vmatpush.msrb.mxu0 %v322_v19  ;;  %v709_v2 = vpop.f32.mrf.mxu1  ;;  %v1164_v6 = vld [vmem:[#allocation7 + $0x280] sm:$0xff] }
 0x115   :  { %v518_v21 = vld [vmem:[#allocation5 + $0xa38] sm:$0xff]  ;;  %1027 = vmatpush.msrb.mxu1 %v386_v20  ;;  %1047 = vmatpush.msrb.mxu2 %v450_v4  ;;  %v1248_v7 = vld [vmem:[#allocation7 + $0x520] sm:$0xff]  ;;  %v710_v9 = vadd.f32 %v709_v2, %v690_v61  ;;  %v1173_v61 = vld [vmem:[#allocation7 + $0x2c8] sm:$0xff] }
 0x116   :  { %1066 = vmatpush.msrb.mxu3 %v518_v21  ;;  %v514_v25 = vld [vmem:[#allocation5 + $0xa18] sm:$0xff]  ;;  %1048 = vmatmul.f32.vlgmr.msrb.gmra.mxu2 %v2812_v27  ;;  %v1096_v8 = vld [vmem:[#allocation7 + $0x60] sm:$0xff]  ;;  %v1145_v27 = vld [vmem:[#allocation7 + $0x1e8] sm:$0xff] }
 0x117   :  { %v2811_v26 = vld.sshfl [vmem:[#allocation1 + $0x10] sm:$0xff pattern:$0x73625140]  ;;  %1340 = vmatpush.msra.mxu0 %v1144_v23  ;;  %1360 = vmatpush.msra.mxu1 %v1208_v24  ;;  %v2814_v32 = vld.sshfl [vmem:[#allocation1 + $0x28] sm:$0xff pattern:$0x73625140] }
 0x118   :  { %1008 = vmatmul.f32.vlgmr.msrb.gmra.mxu0 %v2811_v26  ;;  %1067 = vmatpush.msrb.mxu3 %v514_v25  ;;  %v1160_v10 = vld [vmem:[#allocation7 + $0x260] sm:$0xff]  ;;  %v1076_v63 = vmul.f32 0.2, %v710_v9  ;;  %vm1072_vm0 = vcmp.ge.f32.partialorder %v710_v9, 0.0  ;;  %v1105_v2 = vld [vmem:[#allocation7 + $0xa8] sm:$0xff] }
 0x119   :  { %1028 = vmatmul.f32.vlgmr.msrb.gmra.mxu1 %v2813_v30  ;;  %1068 = vmatmul.f32.vlgmr.msrb.gmra.mxu3 %v2814_v32  ;;  %v1244_v12 = vld [vmem:[#allocation7 + $0x500] sm:$0xff]  ;;  %v1141_v32 = vld [vmem:[#allocation7 + $0x1c8] sm:$0xff] }
 0x11a   :  { %1341 = vmatpush.msra.mxu0 %v1140_v28  ;;  %1361 = vmatpush.msra.mxu1 %v1204_v29  ;;  %v1092_v13 = vld [vmem:[#allocation7 + $0x40] sm:$0xff]  ;;  %v1209_v28 = vld [vmem:[#allocation7 + $0x3e8] sm:$0xff]  ;;  %v3247_v29 = vsel %vm1072_vm0, %v710_v9, %v1076_v63 }
 0x11b   :  { %1380 = vmatpush.msra.mxu2 %v1272_v42  ;;  %v1156_v57 = vld [vmem:[#allocation7 + $0x240] sm:$0xff]  ;;  %v1153_v63 = vld [vmem:[#allocation7 + $0x228] sm:$0xff] }
 0x11c   :  { %1342 = vmatpush.msra.mxu0 %v1136_v31  ;;  %1362 = vmatpush.msra.mxu1 %v1200_v33  ;;  %v1240_v16 = vld [vmem:[#allocation7 + $0x4e0] sm:$0xff]  ;;  %v1205_v33 = vld [vmem:[#allocation7 + $0x3c8] sm:$0xff] }
 0x11d   :  { %1381 = vmatpush.msra.mxu2 %v1268_v46  ;;  %v1088_v18 = vld [vmem:[#allocation7 + $0x20] sm:$0xff]  ;;  %v1125_v46 = vld [vmem:[#allocation7 + $0x148] sm:$0xff] }
 0x11e   :  { %1343 = vmatpush.msra.mxu0 %v1132_v17  ;;  %1363 = vmatpush.msra.mxu1 %v1196_v35  ;;  %v1152_v19 = vld [vmem:[#allocation7 + $0x220] sm:$0xff] }
 0x11f   :  { %1382 = vmatpush.msra.mxu2 %v1264_v50  ;;  %v1236_v20 = vld [vmem:[#allocation7 + $0x4c0] sm:$0xff]  ;;  %v1185_v50 = vld [vmem:[#allocation7 + $0x328] sm:$0xff] }
 0x120   :  { %1344 = vmatpush.msra.mxu0 %v1128_v37  ;;  %1364 = vmatpush.msra.mxu1 %v1192_v22  ;;  %v1084_v4 = vld [vmem:[#allocation7] sm:$0xff]  ;;  %v1201_v37 = vld [vmem:[#allocation7 + $0x3a8] sm:$0xff] }
 0x121   :  { %1383 = vmatpush.msra.mxu2 %v1260_v54  ;;  %v1148_v23 = vld [vmem:[#allocation7 + $0x200] sm:$0xff]  ;;  %v1265_v54 = vld [vmem:[#allocation7 + $0x5a8] sm:$0xff] }
 0x122   :  { %1345 = vmatpush.msra.mxu0 %v1124_v40  ;;  %1365 = vmatpush.msra.mxu1 %v1188_v41  ;;  %v1232_v26 = vld [vmem:[#allocation7 + $0x4a0] sm:$0xff]  ;;  %v1197_v40 = vld [vmem:[#allocation7 + $0x388] sm:$0xff] }
 0x123   :  { %1384 = vmatpush.msra.mxu2 %v1256_v59  ;;  %v1228_v31 = vld [vmem:[#allocation7 + $0x480] sm:$0xff]  ;;  %v1261_v59 = vld [vmem:[#allocation7 + $0x588] sm:$0xff] }
 0x124   :  { %1346 = vmatpush.msra.mxu0 %v1120_v43  ;;  %1366 = vmatpush.msra.mxu1 %v1184_v45  ;;  %v1224_v35 = vld [vmem:[#allocation7 + $0x460] sm:$0xff]  ;;  %v1129_v43 = vld [vmem:[#allocation7 + $0x168] sm:$0xff] }
 0x125   :  { %1385 = vmatpush.msra.mxu2 %v1252_v1  ;;  %v1220_v22 = vld [vmem:[#allocation7 + $0x440] sm:$0xff]  ;;  %v1257_v1 = vld [vmem:[#allocation7 + $0x568] sm:$0xff] }
 0x126   :  { %1347 = vmatpush.msra.mxu0 %v1116_v48  ;;  %1367 = vmatpush.msra.mxu1 %v1180_v49  ;;  %v1216_v42 = vld [vmem:[#allocation7 + $0x420] sm:$0xff]  ;;  %v1273_v48 = vld [vmem:[#allocation7 + $0x5e8] sm:$0xff] }
 0x127   :  { %1386 = vmatpush.msra.mxu2 %v1248_v7  ;;  %v1212_v45 = vld [vmem:[#allocation7 + $0x400] sm:$0xff]  ;;  %v1121_v49 = vld [vmem:[#allocation7 + $0x128] sm:$0xff] }
 0x128   :  { %1348 = vmatpush.msra.mxu0 %v1112_v51  ;;  %1368 = vmatpush.msra.mxu1 %v1176_v53  ;;  %v1269_v51 = vld [vmem:[#allocation7 + $0x5c8] sm:$0xff]  ;;  %v1324_v9 = vld [vmem:[#allocation7 + $0x780] sm:$0xff] }
 0x129   :  { %1387 = vmatpush.msra.mxu2 %v1244_v12  ;;  %v1181_v53 = vld [vmem:[#allocation7 + $0x308] sm:$0xff] }
 0x12a   :  { %1349 = vmatpush.msra.mxu0 %v1108_v56  ;;  %1369 = vmatpush.msra.mxu1 %v1172_v58  ;;  %v729_v5 = vpop.f32.mrf.mxu2  ;;  %v1177_v56 = vld [vmem:[#allocation7 + $0x2e8] sm:$0xff]  ;;  %v1336_v58 = vld [vmem:[#allocation7 + $0x7e0] sm:$0xff] }
 0x12b   :  { %1388 = vmatpush.msra.mxu2 %v1240_v16  ;;  %1400 = vmatpush.msra.mxu3 %v1336_v58  ;;  %v1101_v7 = vld [vmem:[#allocation7 + $0x88] sm:$0xff]  ;;  %v1316_v16 = vld [vmem:[#allocation7 + $0x740] sm:$0xff]  ;;  %v1110_v58 = vld [vmem:[#allocation7 + $0xd0] sm:$0xff] }
 0x12c   :  { %1350 = vmatpush.msra.mxu0 %v1104_v60  ;;  %1370 = vmatpush.msra.mxu1 %v1168_v0  ;;  %v1109_v60 = vld [vmem:[#allocation7 + $0xc8] sm:$0xff]  ;;  %v1332_v0 = vld [vmem:[#allocation7 + $0x7c0] sm:$0xff] }
 0x12d   :  { %v749_v11 = vpop.f32.mrf.mxu3  ;;  %1389 = vmatpush.msra.mxu2 %v1236_v20  ;;  %1401 = vmatpush.msra.mxu3 %v1332_v0  ;;  %v1161_v12 = vld [vmem:[#allocation7 + $0x268] sm:$0xff]  ;;  %v1106_v0 = vld [vmem:[#allocation7 + $0xb0] sm:$0xff] }
 0x12e   :  { %1351 = vmatpush.msra.mxu0 %v1100_v3  ;;  %1371 = vmatpush.msra.mxu1 %v1164_v6  ;;  %v750_v14 = vadd.f32 %v749_v11, %v729_v5  ;;  %v1169_v3 = vld [vmem:[#allocation7 + $0x2a8] sm:$0xff]  ;;  %v1328_v5 = vld [vmem:[#allocation7 + $0x7a0] sm:$0xff] }
 0x12f   :  { %1390 = vmatpush.msra.mxu2 %v1232_v26  ;;  %v1253_v6 = vld [vmem:[#allocation7 + $0x548] sm:$0xff]  ;;  %1402 = vmatpush.msra.mxu3 %v1328_v5  ;;  %v1166_v5 = vld [vmem:[#allocation7 + $0x290] sm:$0xff] }
 0x130   :  { %1352 = vmatpush.msra.mxu0 %v1096_v8  ;;  %v769_v15 = vpop.f32.mrf.mxu0  ;;  %1372 = vmatpush.msra.mxu1 %v1160_v10  ;;  %v1165_v8 = vld [vmem:[#allocation7 + $0x288] sm:$0xff] }
 0x131   :  { %v770_v62 = vadd.f32 %v769_v15, %v750_v14  ;;  %1391 = vmatpush.msra.mxu2 %v1228_v31  ;;  %v1249_v10 = vld [vmem:[#allocation7 + $0x528] sm:$0xff]  ;;  %1403 = vmatpush.msra.mxu3 %v1324_v9 }
 0x132   :  { %1353 = vmatpush.msra.mxu0 %v1092_v13  ;;  %1373 = vmatpush.msra.mxu1 %v1156_v57  ;;  %v1097_v11 = vld [vmem:[#allocation7 + $0x68] sm:$0xff]  ;;  %v1320_v13 = vld [vmem:[#allocation7 + $0x760] sm:$0xff] }
 0x133   :  { %v789_v21 = vpop.f32.mrf.mxu1  ;;  %v809_v25 = vpop.f32.mrf.mxu2  ;;  %1392 = vmatpush.msra.mxu2 %v1224_v35  ;;  %v1245_v14 = vld [vmem:[#allocation7 + $0x508] sm:$0xff]  ;;  %1404 = vmatpush.msra.mxu3 %v1320_v13  ;;  %v1296_v35 = vld [vmem:[#allocation7 + $0x6a0] sm:$0xff] }
 0x134   :  { %1354 = vmatpush.msra.mxu0 %v1088_v18  ;;  %v790_v24 = vadd.f32 %v789_v21, %v770_v62  ;;  %1374 = vmatpush.msra.mxu1 %v1152_v19  ;;  %v1093_v57 = vld [vmem:[#allocation7 + $0x48] sm:$0xff]  ;;  %v1312_v19 = vld [vmem:[#allocation7 + $0x720] sm:$0xff] }
 0x135   :  { %1393 = vmatpush.msra.mxu2 %v1220_v22  ;;  %v1157_v15 = vld [vmem:[#allocation7 + $0x248] sm:$0xff]  ;;  %1405 = vmatpush.msra.mxu3 %v1316_v16  ;;  %v1292_v22 = vld [vmem:[#allocation7 + $0x680] sm:$0xff] }
 0x136   :  { %1355 = vmatpush.msra.mxu0 %v1084_v4  ;;  %v810_v30 = vadd.f32 %v809_v25, %v790_v24  ;;  %1375 = vmatpush.msra.mxu1 %v1148_v23  ;;  %v829_v34 = vpop.f32.mrf.mxu3  ;;  %v1241_v18 = vld [vmem:[#allocation7 + $0x4e8] sm:$0xff]  ;;  %v1308_v23 = vld [vmem:[#allocation7 + $0x700] sm:$0xff]  ;;  %v1146_v24 = vld [vmem:[#allocation7 + $0x1f0] sm:$0xff] }
 0x137   :  { %1356 = vmatmul.f32.vlgmr.msra.gmra.mxu0 %v3247_v29  ;;  %1394 = vmatpush.msra.mxu2 %v1216_v42  ;;  %v1089_v62 = vld [vmem:[#allocation7 + $0x28] sm:$0xff]  ;;  %v1210_v25 = vld [vmem:[#allocation7 + $0x3f0] sm:$0xff] }
 0x138   :  { %1420 = vmatpush.msrb.mxu0 %v1145_v27  ;;  %1440 = vmatpush.msrb.mxu1 %v1209_v28  ;;  %v830_v17 = vadd.f32 %v829_v34, %v810_v30  ;;  %v1237_v20 = vld [vmem:[#allocation7 + $0x4c8] sm:$0xff]  ;;  %v1304_v27 = vld [vmem:[#allocation7 + $0x6e0] sm:$0xff]  ;;  %v1142_v28 = vld [vmem:[#allocation7 + $0x1d0] sm:$0xff] }
 0x139   :  { %1395 = vmatpush.msra.mxu2 %v1212_v45  ;;  %v1085_v4 = vld [vmem:[#allocation7 + $0x8] sm:$0xff]  ;;  %1406 = vmatpush.msra.mxu3 %v1312_v19  ;;  %v1206_v30 = vld [vmem:[#allocation7 + $0x3d0] sm:$0xff] }
 0x13a   :  { %1421 = vmatpush.msrb.mxu0 %v1141_v32  ;;  %1441 = vmatpush.msrb.mxu1 %v1205_v33  ;;  %vm1073_vm1 = vcmp.ge.f32.partialorder %v830_v17, 0.0  ;;  %v1077_v38 = vmul.f32 0.2, %v830_v17  ;;  %v1149_v21 = vld [vmem:[#allocation7 + $0x208] sm:$0xff]  ;;  %v1300_v32 = vld [vmem:[#allocation7 + $0x6c0] sm:$0xff]  ;;  %v1138_v33 = vld [vmem:[#allocation7 + $0x1b0] sm:$0xff] }
 0x13b   :  { %1460 = vmatpush.msrb.mxu2 %v1273_v48  ;;  %1407 = vmatpush.msra.mxu3 %v1308_v23  ;;  %v1233_v26 = vld [vmem:[#allocation7 + $0x4a8] sm:$0xff]  ;;  %v1202_v34 = vld [vmem:[#allocation7 + $0x3b0] sm:$0xff] }
 0x13c   :  { %1422 = vmatpush.msrb.mxu0 %v1137_v36  ;;  %1442 = vmatpush.msrb.mxu1 %v1201_v37  ;;  %v3250_v41 = vsel %vm1073_vm1, %v830_v17, %v1077_v38  ;;  %v1229_v31 = vld [vmem:[#allocation7 + $0x488] sm:$0xff]  ;;  %v1134_v36 = vld [vmem:[#allocation7 + $0x190] sm:$0xff] }
 0x13d   :  { %1376 = vmatmul.f32.vlgmr.msra.gmra.mxu1 %v3250_v41  ;;  %1461 = vmatpush.msrb.mxu2 %v1269_v51  ;;  %v1225_v17 = vld [vmem:[#allocation7 + $0x468] sm:$0xff]  ;;  %v1198_v37 = vld [vmem:[#allocation7 + $0x390] sm:$0xff] }
 0x13e   :  { %1423 = vmatpush.msrb.mxu0 %v1133_v39  ;;  %1443 = vmatpush.msrb.mxu1 %v1197_v40  ;;  %v1221_v38 = vld [vmem:[#allocation7 + $0x448] sm:$0xff]  ;;  %v1130_v39 = vld [vmem:[#allocation7 + $0x170] sm:$0xff] }
 0x13f   :  { %1462 = vmatpush.msrb.mxu2 %v1265_v54  ;;  %1408 = vmatpush.msra.mxu3 %v1304_v27  ;;  %v1194_v40 = vld [vmem:[#allocation7 + $0x370] sm:$0xff]  ;;  %v1217_v42 = vld [vmem:[#allocation7 + $0x428] sm:$0xff] }
 0x140   :  { %1424 = vmatpush.msrb.mxu0 %v1129_v43  ;;  %1444 = vmatpush.msrb.mxu1 %v1193_v44  ;;  %v1288_v43 = vld [vmem:[#allocation7 + $0x660] sm:$0xff]  ;;  %v1126_v44 = vld [vmem:[#allocation7 + $0x150] sm:$0xff]  ;;  %v1325_v9 = vld [vmem:[#allocation7 + $0x788] sm:$0xff] }
 0x141   :  { %1463 = vmatpush.msrb.mxu2 %v1261_v59  ;;  %1409 = vmatpush.msra.mxu3 %v1300_v32  ;;  %v1190_v45 = vld [vmem:[#allocation7 + $0x350] sm:$0xff]  ;;  %v1321_v13 = vld [vmem:[#allocation7 + $0x768] sm:$0xff] }
 0x142   :  { %1425 = vmatpush.msrb.mxu0 %v1125_v46  ;;  %1445 = vmatpush.msrb.mxu1 %v1189_v47  ;;  %v1213_v46 = vld [vmem:[#allocation7 + $0x408] sm:$0xff]  ;;  %v1284_v47 = vld [vmem:[#allocation7 + $0x640] sm:$0xff]  ;;  %v1122_v48 = vld [vmem:[#allocation7 + $0x130] sm:$0xff] }
 0x143   :  { %1464 = vmatpush.msrb.mxu2 %v1257_v1  ;;  %1410 = vmatpush.msra.mxu3 %v1296_v35  ;;  %v1118_v51 = vld [vmem:[#allocation7 + $0x110] sm:$0xff] }
 0x144   :  { %1426 = vmatpush.msrb.mxu0 %v1121_v49  ;;  %1446 = vmatpush.msrb.mxu1 %v1185_v50  ;;  %v1186_v49 = vld [vmem:[#allocation7 + $0x330] sm:$0xff]  ;;  %v1280_v50 = vld [vmem:[#allocation7 + $0x620] sm:$0xff] }
 0x145   :  { %1465 = vmatpush.msrb.mxu2 %v1253_v6  ;;  %1411 = vmatpush.msra.mxu3 %v1292_v22  ;;  %v1114_v54 = vld [vmem:[#allocation7 + $0xf0] sm:$0xff]  ;;  %v1199_v22 = vld [vmem:[#allocation7 + $0x398] sm:$0xff] }
 0x146   :  { %1427 = vmatpush.msrb.mxu0 %v1117_v52  ;;  %1447 = vmatpush.msrb.mxu1 %v1181_v53  ;;  %v1182_v52 = vld [vmem:[#allocation7 + $0x310] sm:$0xff]  ;;  %v1276_v53 = vld [vmem:[#allocation7 + $0x600] sm:$0xff] }
 0x147   :  { %1466 = vmatpush.msrb.mxu2 %v1249_v10  ;;  %1412 = vmatpush.msra.mxu3 %v1288_v43  ;;  %v1174_v59 = vld [vmem:[#allocation7 + $0x2d0] sm:$0xff]  ;;  %v1195_v43 = vld [vmem:[#allocation7 + $0x378] sm:$0xff] }
 0x148   :  { %1428 = vmatpush.msrb.mxu0 %v1113_v55  ;;  %1448 = vmatpush.msrb.mxu1 %v1177_v56  ;;  %v1178_v55 = vld [vmem:[#allocation7 + $0x2f0] sm:$0xff]  ;;  %v1337_v56 = vld [vmem:[#allocation7 + $0x7e8] sm:$0xff] }
 0x149   :  { %1467 = vmatpush.msrb.mxu2 %v1245_v14  ;;  %1413 = vmatpush.msra.mxu3 %v1284_v47  ;;  %v1170_v1 = vld [vmem:[#allocation7 + $0x2b0] sm:$0xff]  ;;  %v1191_v47 = vld [vmem:[#allocation7 + $0x358] sm:$0xff] }
 0x14a   :  { %1429 = vmatpush.msrb.mxu0 %v1109_v60  ;;  %1449 = vmatpush.msrb.mxu1 %v1173_v61  ;;  %v1333_v61 = vld [vmem:[#allocation7 + $0x7c8] sm:$0xff]  ;;  %v1098_v10 = vld [vmem:[#allocation7 + $0x70] sm:$0xff] }
 0x14b   :  { %1468 = vmatpush.msrb.mxu2 %v1241_v18  ;;  %1414 = vmatpush.msra.mxu3 %v1280_v50  ;;  %v1094_v14 = vld [vmem:[#allocation7 + $0x50] sm:$0xff]  ;;  %v1317_v18 = vld [vmem:[#allocation7 + $0x748] sm:$0xff]  ;;  %v1123_v50 = vld [vmem:[#allocation7 + $0x138] sm:$0xff] }
 0x14c   :  { %1430 = vmatpush.msrb.mxu0 %v1105_v2  ;;  %1450 = vmatpush.msrb.mxu1 %v1169_v3  ;;  %v1329_v2 = vld [vmem:[#allocation7 + $0x7a8] sm:$0xff]  ;;  %v1102_v3 = vld [vmem:[#allocation7 + $0x90] sm:$0xff] }
 0x14d   :  { %1469 = vmatpush.msrb.mxu2 %v1237_v20  ;;  %1415 = vmatpush.msra.mxu3 %v1276_v53  ;;  %v1313_v20 = vld [vmem:[#allocation7 + $0x728] sm:$0xff]  ;;  %v1119_v53 = vld [vmem:[#allocation7 + $0x118] sm:$0xff] }
 0x14e   :  { %1431 = vmatpush.msrb.mxu0 %v1101_v7  ;;  %1451 = vmatpush.msrb.mxu1 %v1165_v8 }
 0x14f   :  { %1470 = vmatpush.msrb.mxu2 %v1233_v26  ;;  %1480 = vmatpush.msrb.mxu3 %v1337_v56  ;;  %v1211_v26 = vld [vmem:[#allocation7 + $0x3f8] sm:$0xff]  ;;  %v1281_v56 = vld [vmem:[#allocation7 + $0x628] sm:$0xff] }
 0x150   :  { %1432 = vmatpush.msrb.mxu0 %v1097_v11  ;;  %1452 = vmatpush.msrb.mxu1 %v1161_v12  ;;  %v1162_v11 = vld [vmem:[#allocation7 + $0x270] sm:$0xff] }
 0x151   :  { %1471 = vmatpush.msrb.mxu2 %v1229_v31  ;;  %1481 = vmatpush.msrb.mxu3 %v1333_v61  ;;  %v1207_v31 = vld [vmem:[#allocation7 + $0x3d8] sm:$0xff]  ;;  %v1277_v61 = vld [vmem:[#allocation7 + $0x608] sm:$0xff] }
 0x152   :  { %1433 = vmatpush.msrb.mxu0 %v1093_v57  ;;  %1453 = vmatpush.msrb.mxu1 %v1157_v15  ;;  %v1158_v57 = vld [vmem:[#allocation7 + $0x250] sm:$0xff] }
 0x153   :  { %1472 = vmatpush.msrb.mxu2 %v1225_v17  ;;  %1482 = vmatpush.msrb.mxu3 %v1329_v2  ;;  %v1203_v17 = vld [vmem:[#allocation7 + $0x3b8] sm:$0xff]  ;;  %v1250_v2 = vld [vmem:[#allocation7 + $0x530] sm:$0xff] }
 0x154   :  { %1434 = vmatpush.msrb.mxu0 %v1089_v62  ;;  %1454 = vmatpush.msrb.mxu1 %v1153_v63  ;;  %v1090_v62 = vld [vmem:[#allocation7 + $0x30] sm:$0xff] }
 0x155   :  { %1473 = vmatpush.msrb.mxu2 %v1221_v38  ;;  %1483 = vmatpush.msrb.mxu3 %v1325_v9  ;;  %v1154_v63 = vld [vmem:[#allocation7 + $0x230] sm:$0xff]  ;;  %v1135_v38 = vld [vmem:[#allocation7 + $0x198] sm:$0xff] }
 0x156   :  { %1435 = vmatpush.msrb.mxu0 %v1085_v4  ;;  %1455 = vmatpush.msrb.mxu1 %v1149_v21  ;;  %v1086_v4 = vld [vmem:[#allocation7 + $0x10] sm:$0xff] }
 0x157   :  { %1436 = vmatmul.f32.vlgmr.msrb.gmra.mxu0 %v3247_v29  ;;  %1456 = vmatmul.f32.vlgmr.msrb.gmra.mxu1 %v3250_v41  ;;  %v1150_v21 = vld [vmem:[#allocation7 + $0x210] sm:$0xff] }
 0x158   :  { %1500 = vmatpush.msra.mxu0 %v1146_v24  ;;  %1520 = vmatpush.msra.mxu1 %v1210_v25  ;;  %v1147_v25 = vld [vmem:[#allocation7 + $0x1f8] sm:$0xff]  ;;  %v1242_v9 = vld [vmem:[#allocation7 + $0x4f0] sm:$0xff] }
 0x159   :  { %1474 = vmatpush.msrb.mxu2 %v1217_v42  ;;  %1484 = vmatpush.msrb.mxu3 %v1321_v13  ;;  %v1131_v42 = vld [vmem:[#allocation7 + $0x178] sm:$0xff] }
 0x15a   :  { %1501 = vmatpush.msra.mxu0 %v1142_v28  ;;  %1521 = vmatpush.msra.mxu1 %v1206_v30  ;;  %v1309_v28 = vld [vmem:[#allocation7 + $0x708] sm:$0xff]  ;;  %v1143_v30 = vld [vmem:[#allocation7 + $0x1d8] sm:$0xff] }
 0x15b   :  { %1475 = vmatpush.msrb.mxu2 %v1213_v46  ;;  %1485 = vmatpush.msrb.mxu3 %v1317_v18  ;;  %v1127_v46 = vld [vmem:[#allocation7 + $0x158] sm:$0xff] }
 0x15c   :  { %1502 = vmatpush.msra.mxu0 %v1138_v33  ;;  %1522 = vmatpush.msra.mxu1 %v1202_v34  ;;  %v1305_v33 = vld [vmem:[#allocation7 + $0x6e8] sm:$0xff]  ;;  %v1139_v34 = vld [vmem:[#allocation7 + $0x1b8] sm:$0xff] }
 0x15d   :  { %1486 = vmatpush.msrb.mxu3 %v1313_v20  ;;  %v1095_v13 = vld [vmem:[#allocation7 + $0x58] sm:$0xff] }
 0x15e   :  { %1503 = vmatpush.msra.mxu0 %v1134_v36  ;;  %1523 = vmatpush.msra.mxu1 %v1198_v37  ;;  %v1274_v36 = vld [vmem:[#allocation7 + $0x5f0] sm:$0xff]  ;;  %v1301_v37 = vld [vmem:[#allocation7 + $0x6c8] sm:$0xff]  ;;  %v1087_v20 = vld [vmem:[#allocation7 + $0x18] sm:$0xff] }
 0x15f   :  { %1487 = vmatpush.msrb.mxu3 %v1309_v28  ;;  %v1218_v28 = vld [vmem:[#allocation7 + $0x430] sm:$0xff] }
 0x160   :  { %1504 = vmatpush.msra.mxu0 %v1130_v39  ;;  %1524 = vmatpush.msra.mxu1 %v1194_v40  ;;  %v1270_v39 = vld [vmem:[#allocation7 + $0x5d0] sm:$0xff]  ;;  %v1297_v40 = vld [vmem:[#allocation7 + $0x6a8] sm:$0xff] }
 0x161   :  { %1488 = vmatpush.msrb.mxu3 %v1305_v33 }
 0x162   :  { %1505 = vmatpush.msra.mxu0 %v1126_v44  ;;  %1525 = vmatpush.msra.mxu1 %v1190_v45  ;;  %v1266_v44 = vld [vmem:[#allocation7 + $0x5b0] sm:$0xff]  ;;  %v1293_v45 = vld [vmem:[#allocation7 + $0x688] sm:$0xff] }
 0x163   :  { %1489 = vmatpush.msrb.mxu3 %v1301_v37  ;;  %v1338_v37 = vld [vmem:[#allocation7 + $0x7f0] sm:$0xff] }
 0x164   :  { %1506 = vmatpush.msra.mxu0 %v1122_v48  ;;  %1526 = vmatpush.msra.mxu1 %v1186_v49  ;;  %v1262_v48 = vld [vmem:[#allocation7 + $0x590] sm:$0xff]  ;;  %v1289_v49 = vld [vmem:[#allocation7 + $0x668] sm:$0xff] }
 0x165   :  { %1490 = vmatpush.msrb.mxu3 %v1297_v40  ;;  %v1259_v40 = vld [vmem:[#allocation7 + $0x578] sm:$0xff] }
 0x166   :  { %1507 = vmatpush.msra.mxu0 %v1118_v51  ;;  %1527 = vmatpush.msra.mxu1 %v1182_v52  ;;  %v1187_v51 = vld [vmem:[#allocation7 + $0x338] sm:$0xff]  ;;  %v1285_v52 = vld [vmem:[#allocation7 + $0x648] sm:$0xff] }
 0x167   :  { %1491 = vmatpush.msrb.mxu3 %v1293_v45  ;;  %v1251_v45 = vld [vmem:[#allocation7 + $0x538] sm:$0xff] }
 0x168   :  { %1508 = vmatpush.msra.mxu0 %v1114_v54  ;;  %1528 = vmatpush.msra.mxu1 %v1178_v55  ;;  %v849_v60 = vpop.f32.mrf.mxu0  ;;  %v1183_v54 = vld [vmem:[#allocation7 + $0x318] sm:$0xff]  ;;  %v1258_v55 = vld [vmem:[#allocation7 + $0x570] sm:$0xff] }
 0x169   :  { %1492 = vmatpush.msrb.mxu3 %v1289_v49  ;;  %v1243_v49 = vld [vmem:[#allocation7 + $0x4f8] sm:$0xff] }
 0x16a   :  { %1509 = vmatpush.msra.mxu0 %v1110_v58  ;;  %1529 = vmatpush.msra.mxu1 %v1174_v59  ;;  %v1115_v58 = vld [vmem:[#allocation7 + $0xf8] sm:$0xff] }
 0x16b   :  { %v869_v6 = vpop.f32.mrf.mxu1  ;;  %v889_v8 = vpop.f32.mrf.mxu2  ;;  %v1179_v59 = vld [vmem:[#allocation7 + $0x2f8] sm:$0xff]  ;;  %1493 = vmatpush.msrb.mxu3 %v1285_v52  ;;  %v1310_v52 = vld [vmem:[#allocation7 + $0x710] sm:$0xff] }
 0x16c   :  { %1510 = vmatpush.msra.mxu0 %v1106_v0  ;;  %1530 = vmatpush.msra.mxu1 %v1170_v1  ;;  %v870_v7 = vadd.f32 %v869_v6, %v849_v60  ;;  %v1254_v60 = vld [vmem:[#allocation7 + $0x550] sm:$0xff]  ;;  %v1111_v0 = vld [vmem:[#allocation7 + $0xd8] sm:$0xff] }
 0x16d   :  { %v1175_v1 = vld [vmem:[#allocation7 + $0x2d8] sm:$0xff]  ;;  %1494 = vmatpush.msrb.mxu3 %v1281_v56  ;;  %v1246_v6 = vld [vmem:[#allocation7 + $0x510] sm:$0xff] }
 0x16e   :  { %1511 = vmatpush.msra.mxu0 %v1102_v3  ;;  %1531 = vmatpush.msra.mxu1 %v1166_v5  ;;  %v890_v12 = vadd.f32 %v889_v8, %v870_v7  ;;  %v909_v15 = vpop.f32.mrf.mxu3  ;;  %v1107_v3 = vld [vmem:[#allocation7 + $0xb8] sm:$0xff]  ;;  %v1302_v56 = vld [vmem:[#allocation7 + $0x6d0] sm:$0xff] }
 0x16f   :  { %v1171_v5 = vld [vmem:[#allocation7 + $0x2b8] sm:$0xff]  ;;  %1495 = vmatpush.msrb.mxu3 %v1277_v61  ;;  %v1294_v61 = vld [vmem:[#allocation7 + $0x690] sm:$0xff] }
 0x170   :  { %1512 = vmatpush.msra.mxu0 %v1098_v10  ;;  %1532 = vmatpush.msra.mxu1 %v1162_v11  ;;  %v910_v16 = vadd.f32 %v909_v15, %v890_v12  ;;  %v1103_v7 = vld [vmem:[#allocation7 + $0x98] sm:$0xff]  ;;  %v1238_v12 = vld [vmem:[#allocation7 + $0x4d0] sm:$0xff] }
 0x171   :  { %v929_v19 = vpop.f32.mrf.mxu0  ;;  %v1167_v8 = vld [vmem:[#allocation7 + $0x298] sm:$0xff] }
 0x172   :  { %1513 = vmatpush.msra.mxu0 %v1094_v14  ;;  %1533 = vmatpush.msra.mxu1 %v1158_v57  ;;  %v930_v23 = vadd.f32 %v929_v19, %v910_v16  ;;  %v1099_v10 = vld [vmem:[#allocation7 + $0x78] sm:$0xff]  ;;  %v1234_v57 = vld [vmem:[#allocation7 + $0x4b0] sm:$0xff] }
 0x173   :  { %v1163_v11 = vld [vmem:[#allocation7 + $0x278] sm:$0xff]  ;;  %v1230_v19 = vld [vmem:[#allocation7 + $0x490] sm:$0xff] }
 0x174   :  { %1514 = vmatpush.msra.mxu0 %v1090_v62  ;;  %1534 = vmatpush.msra.mxu1 %v1154_v63  ;;  %v949_v24 = vpop.f32.mrf.mxu1  ;;  %v1159_v14 = vld [vmem:[#allocation7 + $0x258] sm:$0xff] }
 0x175   :  { %v950_v27 = vadd.f32 %v949_v24, %v930_v23  ;;  %v1091_v15 = vld [vmem:[#allocation7 + $0x38] sm:$0xff]  ;;  %v1226_v24 = vld [vmem:[#allocation7 + $0x470] sm:$0xff] }
 0x176   :  { %1515 = vmatpush.msra.mxu0 %v1086_v4  ;;  %1535 = vmatpush.msra.mxu1 %v1150_v21  ;;  %v1155_v16 = vld [vmem:[#allocation7 + $0x238] sm:$0xff] }
 0x177   :  { %1516 = vmatmul.f32.vlgmr.msra.gmra.mxu0 %v3247_v29  ;;  %1536 = vmatmul.f32.vlgmr.msra.gmra.mxu1 %v3250_v41  ;;  %vm1074_vm2 = vcmp.ge.f32.partialorder %v950_v27, 0.0  ;;  %v1078_v32 = vmul.f32 0.2, %v950_v27  ;;  %v1151_v4 = vld [vmem:[#allocation7 + $0x218] sm:$0xff] }
 0x178   :  { %1580 = vmatpush.msrb.mxu0 %v1147_v25  ;;  %1600 = vmatpush.msrb.mxu1 %v1211_v26  ;;  %v1222_v26 = vld [vmem:[#allocation7 + $0x450] sm:$0xff] }
 0x179   :  { %v3257_v35 = vsel %vm1074_vm2, %v950_v27, %v1078_v32  ;;  %v1214_v32 = vld [vmem:[#allocation7 + $0x410] sm:$0xff] }
 0x17a   :  { %1581 = vmatpush.msrb.mxu0 %v1143_v30  ;;  %1601 = vmatpush.msrb.mxu1 %v1207_v31 }
 0x17b   :  { %1396 = vmatmul.f32.vlgmr.msra.gmra.mxu2 %v3257_v35 }
 0x17c   :  { %1582 = vmatpush.msrb.mxu0 %v1139_v34  ;;  %1602 = vmatpush.msrb.mxu1 %v1203_v17  ;;  %v1275_v34 = vld [vmem:[#allocation7 + $0x5f8] sm:$0xff] }
 0x17d   :  { %1540 = vmatpush.msra.mxu2 %v1274_v36  ;;  %v1271_v36 = vld [vmem:[#allocation7 + $0x5d8] sm:$0xff] }
 0x17e   :  { %1583 = vmatpush.msrb.mxu0 %v1135_v38  ;;  %1603 = vmatpush.msrb.mxu1 %v1199_v22  ;;  %v1263_v22 = vld [vmem:[#allocation7 + $0x598] sm:$0xff] }
 0x17f   :  { %1541 = vmatpush.msra.mxu2 %v1270_v39  ;;  %v1334_v39 = vld [vmem:[#allocation7 + $0x7d0] sm:$0xff] }
 0x180   :  { %1584 = vmatpush.msrb.mxu0 %v1131_v42  ;;  %1604 = vmatpush.msrb.mxu1 %v1195_v43  ;;  %v1330_v42 = vld [vmem:[#allocation7 + $0x7b0] sm:$0xff]  ;;  %v1255_v43 = vld [vmem:[#allocation7 + $0x558] sm:$0xff] }
 0x181   :  { %1542 = vmatpush.msra.mxu2 %v1266_v44  ;;  %v1326_v44 = vld [vmem:[#allocation7 + $0x790] sm:$0xff] }
 0x182   :  { %1585 = vmatpush.msrb.mxu0 %v1127_v46  ;;  %1605 = vmatpush.msrb.mxu1 %v1191_v47  ;;  %v1322_v46 = vld [vmem:[#allocation7 + $0x770] sm:$0xff]  ;;  %v1247_v47 = vld [vmem:[#allocation7 + $0x518] sm:$0xff] }
 0x183   :  { %1543 = vmatpush.msra.mxu2 %v1262_v48  ;;  %v1318_v48 = vld [vmem:[#allocation7 + $0x750] sm:$0xff] }
 0x184   :  { %1586 = vmatpush.msrb.mxu0 %v1123_v50  ;;  %1606 = vmatpush.msrb.mxu1 %v1187_v51  ;;  %v1314_v50 = vld [vmem:[#allocation7 + $0x730] sm:$0xff]  ;;  %v1239_v51 = vld [vmem:[#allocation7 + $0x4d8] sm:$0xff] }
 0x185   :  { %1476 = vmatmul.f32.vlgmr.msrb.gmra.mxu2 %v3257_v35 }
 0x186   :  { %1587 = vmatpush.msrb.mxu0 %v1119_v53  ;;  %1607 = vmatpush.msrb.mxu1 %v1183_v54  ;;  %v1235_v53 = vld [vmem:[#allocation7 + $0x4b8] sm:$0xff]  ;;  %v1306_v54 = vld [vmem:[#allocation7 + $0x6f0] sm:$0xff] }
 0x187   :  { %1544 = vmatpush.msra.mxu2 %v1258_v55  ;;  %v1231_v55 = vld [vmem:[#allocation7 + $0x498] sm:$0xff] }
 0x188   :  { %1588 = vmatpush.msrb.mxu0 %v1115_v58  ;;  %1608 = vmatpush.msrb.mxu1 %v1179_v59  ;;  %v1227_v58 = vld [vmem:[#allocation7 + $0x478] sm:$0xff]  ;;  %v1298_v59 = vld [vmem:[#allocation7 + $0x6b0] sm:$0xff] }
 0x189   :  { %1545 = vmatpush.msra.mxu2 %v1254_v60  ;;  %v1223_v60 = vld [vmem:[#allocation7 + $0x458] sm:$0xff] }
 0x18a   :  { %1589 = vmatpush.msrb.mxu0 %v1111_v0  ;;  %1609 = vmatpush.msrb.mxu1 %v1175_v1  ;;  %v1219_v0 = vld [vmem:[#allocation7 + $0x438] sm:$0xff]  ;;  %v1290_v1 = vld [vmem:[#allocation7 + $0x670] sm:$0xff] }
 0x18b   :  { %1546 = vmatpush.msra.mxu2 %v1250_v2  ;;  %v1215_v2 = vld [vmem:[#allocation7 + $0x418] sm:$0xff] }
 0x18c   :  { %1590 = vmatpush.msrb.mxu0 %v1107_v3  ;;  %1610 = vmatpush.msrb.mxu1 %v1171_v5  ;;  %v1286_v3 = vld [vmem:[#allocation7 + $0x650] sm:$0xff] }
 0x18d   :  { %1547 = vmatpush.msra.mxu2 %v1246_v6  ;;  %v1282_v5 = vld [vmem:[#allocation7 + $0x630] sm:$0xff] }
 0x18e   :  { %1591 = vmatpush.msrb.mxu0 %v1103_v7  ;;  %1611 = vmatpush.msrb.mxu1 %v1167_v8  ;;  %v1278_v6 = vld [vmem:[#allocation7 + $0x610] sm:$0xff]  ;;  %v1339_v7 = vld [vmem:[#allocation7 + $0x7f8] sm:$0xff] }
 0x18f   :  { %1548 = vmatpush.msra.mxu2 %v1242_v9  ;;  %v1335_v8 = vld [vmem:[#allocation7 + $0x7d8] sm:$0xff] }
 0x190   :  { %1592 = vmatpush.msrb.mxu0 %v1099_v10  ;;  %1612 = vmatpush.msrb.mxu1 %v1163_v11  ;;  %v969_v18 = vpop.f32.mrf.mxu2  ;;  %v1331_v9 = vld [vmem:[#allocation7 + $0x7b8] sm:$0xff] }
 0x191   :  { %1549 = vmatpush.msra.mxu2 %v1238_v12  ;;  %v989_v62 = vpop.f32.mrf.mxu3  ;;  %v1327_v10 = vld [vmem:[#allocation7 + $0x798] sm:$0xff] }
 0x192   :  { %1593 = vmatpush.msrb.mxu0 %v1095_v13  ;;  %1613 = vmatpush.msrb.mxu1 %v1159_v14  ;;  %v990_v63 = vadd.f32 %v989_v62, %v969_v18  ;;  %v1323_v11 = vld [vmem:[#allocation7 + $0x778] sm:$0xff]  ;;  %v3284_v62 = vld [vmem:[%s3922_s3 + $0xf8] sm:$0xff] }
 0x193   :  { %1550 = vmatpush.msra.mxu2 %v1234_v57  ;;  %v1319_v12 = vld [vmem:[#allocation7 + $0x758] sm:$0xff] }
 0x194   :  { %1594 = vmatpush.msrb.mxu0 %v1091_v15  ;;  %1614 = vmatpush.msrb.mxu1 %v1155_v16  ;;  %v1315_v13 = vld [vmem:[#allocation7 + $0x738] sm:$0xff]  ;;  %v3273_v16 = vld [vmem:[%s3922_s3 + $0x78] sm:$0xff] }
 0x195   :  { %v1009_v21 = vpop.f32.mrf.mxu0  ;;  %1551 = vmatpush.msra.mxu2 %v1230_v19  ;;  %v1311_v14 = vld [vmem:[#allocation7 + $0x718] sm:$0xff] }
 0x196   :  { %v1010_v23 = vadd.f32 %v1009_v21, %v990_v63  ;;  %1595 = vmatpush.msrb.mxu0 %v1087_v20  ;;  %1615 = vmatpush.msrb.mxu1 %v1151_v4  ;;  %v1029_v25 = vpop.f32.mrf.mxu1  ;;  %v1303_v57 = vld [vmem:[#allocation7 + $0x6d8] sm:$0xff] }
 0x197   :  { %1596 = vmatmul.f32.vlgmr.msrb.gmra.mxu0 %v3247_v29  ;;  %1616 = vmatmul.f32.vlgmr.msrb.gmra.mxu1 %v3250_v41  ;;  %v1267_v41 = vld [vmem:[#allocation7 + $0x5b8] sm:$0xff] }
 0x198   :  { %1552 = vmatpush.msra.mxu2 %v1226_v24  ;;  %v1030_v27 = vadd.f32 %v1029_v25, %v1010_v23  ;;  %v1299_v15 = vld [vmem:[#allocation7 + $0x6b8] sm:$0xff]  ;;  %1730 = vmatpush.msra.mxu0 %v3273_v16  ;;  %v3306_v23 = vld [vmem:[%s3922_s3 + $0x60] sm:$0xff]  ;;  %v3313_v25 = vld [vmem:[%s3922_s3 + $0x58] sm:$0xff] }
 0x199   :  { %v1049_v30 = vpop.f32.mrf.mxu2  ;;  %v3278_v18 = vld [vmem:[%s3922_s3 + $0x70] sm:$0xff]  ;;  %v3289_v19 = vld [vmem:[%s3922_s3 + $0x68] sm:$0xff]  ;;  %1750 = vmatpush.msra.mxu1 %v3284_v62 }
 0x19a   :  { %1553 = vmatpush.msra.mxu2 %v1222_v26  ;;  %v1050_v31 = vadd.f32 %v1049_v30, %v1030_v27  ;;  %v1295_v63 = vld [vmem:[#allocation7 + $0x698] sm:$0xff]  ;;  %1731 = vmatpush.msra.mxu0 %v3278_v18 }
 0x19b   :  { %v3295_v20 = vld [vmem:[%s3922_s3 + $0xf0] sm:$0xff]  ;;  %v3301_v4 = vld [vmem:[%s3922_s3 + $0xe8] sm:$0xff] }
 0x19c   :  { %1554 = vmatpush.msra.mxu2 %v1218_v28  ;;  %v1069_v33 = vpop.f32.mrf.mxu3  ;;  %v1291_v21 = vld [vmem:[#allocation7 + $0x678] sm:$0xff]  ;;  %1751 = vmatpush.msra.mxu1 %v3295_v20 }
 0x19d   :  { %v1070_v17 = vadd.f32 %v1069_v33, %v1050_v31  ;;  %1732 = vmatpush.msra.mxu0 %v3289_v19  ;;  %v1287_v24 = vld [vmem:[#allocation7 + $0x658] sm:$0xff]  ;;  %v3331_v31 = vld [vmem:[%s3922_s3 + $0xe0] sm:$0xff] }
 0x19e   :  { %1555 = vmatpush.msra.mxu2 %v1214_v32  ;;  %1752 = vmatpush.msra.mxu1 %v3301_v4  ;;  %v1283_v26 = vld [vmem:[#allocation7 + $0x638] sm:$0xff]  ;;  %v3337_v32 = vld [vmem:[%s3922_s3 + $0xd8] sm:$0xff]  ;;  %v3342_v33 = vld [vmem:[%s3922_s3 + $0x40] sm:$0xff] }
 0x19f   :  { %1556 = vmatmul.f32.vlgmr.msra.gmra.mxu2 %v3257_v35  ;;  %vm1075_vm3 = vcmp.ge.f32.partialorder %v1070_v17, 0.0  ;;  %v1079_v29 = vmul.f32 0.2, %v1070_v17  ;;  %1733 = vmatpush.msra.mxu0 %v3306_v23  ;;  %v3320_v27 = vld [vmem:[%s3922_s3 + $0x50] sm:$0xff]  ;;  %v3326_v30 = vld [vmem:[%s3922_s3 + $0x48] sm:$0xff] }
 0x1a0   :  { %1620 = vmatpush.msrb.mxu2 %v1275_v34  ;;  %v1279_v28 = vld [vmem:[#allocation7 + $0x618] sm:$0xff]  ;;  %1753 = vmatpush.msra.mxu1 %v3331_v31 }
 0x1a1   :  { %v3264_v38 = vsel %vm1075_vm3, %v1070_v17, %v1079_v29  ;;  %1734 = vmatpush.msra.mxu0 %v3313_v25  ;;  %v3349_v34 = vld [vmem:[%s3922_s3 + $0xd0] sm:$0xff]  ;;  %v3355_v17 = vld [vmem:[%s3922_s3 + $0x38] sm:$0xff]  ;;  %vm2577_vm3 = vcmask 130048  }
 0x1a2   :  { %1621 = vmatpush.msrb.mxu2 %v1271_v36  ;;  %1416 = vmatmul.f32.vlgmr.msra.gmra.mxu3 %v3264_v38  ;;  %v3362_v36 = vld [vmem:[%s3922_s3 + $0xc8] sm:$0xff]  ;;  %v3367_v29 = vld [vmem:[%s3922_s3 + $0x30] sm:$0xff] }
 0x1a3   :  { %1560 = vmatpush.msra.mxu3 %v1338_v37  ;;  %1735 = vmatpush.msra.mxu0 %v3320_v27  ;;  %v3381_v37 = vld [vmem:[%s3922_s3 + $0x20] sm:$0xff] }
 0x1a4   :  { %1622 = vmatpush.msrb.mxu2 %v1267_v41  ;;  %1754 = vmatpush.msra.mxu1 %v3337_v32  ;;  %v3374_v41 = vld [vmem:[%s3922_s3 + $0x28] sm:$0xff] }
 0x1a5   :  { %1561 = vmatpush.msra.mxu3 %v1334_v39  ;;  %1736 = vmatpush.msra.mxu0 %v3326_v30  ;;  %v3398_v39 = vld [vmem:[%s3922_s3 + $0x18] sm:$0xff] }
 0x1a6   :  { %1623 = vmatpush.msrb.mxu2 %v1263_v22  ;;  %1755 = vmatpush.msra.mxu1 %v3349_v34  ;;  %v3393_v22 = vld [vmem:[%s3922_s3 + $0xb8] sm:$0xff] }
 0x1a7   :  { %1562 = vmatpush.msra.mxu3 %v1330_v42  ;;  %1737 = vmatpush.msra.mxu0 %v3342_v33  ;;  %v3410_v42 = vld [vmem:[%s3922_s3 + $0x10] sm:$0xff] }
 0x1a8   :  { %1624 = vmatpush.msrb.mxu2 %v1259_v40  ;;  %1756 = vmatpush.msra.mxu1 %v3362_v36  ;;  %v3403_v40 = vld [vmem:[%s3922_s3 + $0xb0] sm:$0xff] }
 0x1a9   :  { %1563 = vmatpush.msra.mxu3 %v1326_v44  ;;  %1738 = vmatpush.msra.mxu0 %v3355_v17  ;;  %v3422_v44 = vld [vmem:[%s3922_s3 + $0x8] sm:$0xff] }
 0x1aa   :  { %1625 = vmatpush.msrb.mxu2 %v1255_v43  ;;  %1496 = vmatmul.f32.vlgmr.msrb.gmra.mxu3 %v3264_v38  ;;  %v3415_v43 = vld [vmem:[%s3922_s3 + $0xa8] sm:$0xff] }
 0x1ab   :  { %1564 = vmatpush.msra.mxu3 %v1322_v46  ;;  %1739 = vmatpush.msra.mxu0 %v3367_v29  ;;  %v3435_v46 = vld [vmem:[%s3922_s3 + $0xa0] sm:$0xff] }
 0x1ac   :  { %1626 = vmatpush.msrb.mxu2 %v1251_v45  ;;  %v3430_v45 = vld [vmem:[%s3922_s3] sm:$0xff] }
 0x1ad   :  { %1565 = vmatpush.msra.mxu3 %v1318_v48  ;;  %1740 = vmatpush.msra.mxu0 %v3374_v41  ;;  %v3449_v48 = vld [vmem:[%s3922_s3 + $0x98] sm:$0xff] }
 0x1ae   :  { %1627 = vmatpush.msrb.mxu2 %v1247_v47  ;;  %v3442_v47 = vld [vmem:[%s3922_s3 + $0x178] sm:$0xff] }
 0x1af   :  { %1566 = vmatpush.msra.mxu3 %v1314_v50  ;;  %1741 = vmatpush.msra.mxu0 %v3381_v37  ;;  %v3459_v50 = vld [vmem:[%s3922_s3 + $0x90] sm:$0xff] }
 0x1b0   :  { %1628 = vmatpush.msrb.mxu2 %v1243_v49  ;;  %v3454_v49 = vld [vmem:[%s3922_s3 + $0x170] sm:$0xff] }
 0x1b1   :  { %1567 = vmatpush.msra.mxu3 %v1310_v52  ;;  %1742 = vmatpush.msra.mxu0 %v3398_v39  ;;  %v3472_v52 = vld [vmem:[%s3922_s3 + $0x88] sm:$0xff] }
 0x1b2   :  { %1629 = vmatpush.msrb.mxu2 %v1239_v51  ;;  %v3465_v51 = vld [vmem:[%s3922_s3 + $0x168] sm:$0xff] }
 0x1b3   :  { %1568 = vmatpush.msra.mxu3 %v1306_v54  ;;  %1743 = vmatpush.msra.mxu0 %v3410_v42  ;;  %v3485_v54 = vld [vmem:[%s3922_s3 + $0x80] sm:$0xff] }
 0x1b4   :  { %1630 = vmatpush.msrb.mxu2 %v1235_v53  ;;  %v3478_v53 = vld [vmem:[%s3922_s3 + $0x160] sm:$0xff] }
 0x1b5   :  { %1569 = vmatpush.msra.mxu3 %v1302_v56  ;;  %1744 = vmatpush.msra.mxu0 %v3422_v44  ;;  %v3499_v56 = vld [vmem:[%s3922_s3 + $0x150] sm:$0xff] }
 0x1b6   :  { %1631 = vmatpush.msrb.mxu2 %v1231_v55  ;;  %v3491_v55 = vld [vmem:[%s3922_s3 + $0x158] sm:$0xff] }
 0x1b7   :  { %1570 = vmatpush.msra.mxu3 %v1298_v59  ;;  %1745 = vmatpush.msra.mxu0 %v3430_v45  ;;  %v3518_v59 = vld [vmem:[%s3922_s3 + $0x140] sm:$0xff] }
 0x1b8   :  { %1632 = vmatpush.msrb.mxu2 %v1227_v58  ;;  %v3507_v58 = vld [vmem:[%s3922_s3 + $0x148] sm:$0xff] }
 0x1b9   :  { %1571 = vmatpush.msra.mxu3 %v1294_v61  ;;  %1814 = vmatpush.msrb.mxu0 %v3273_v16  ;;  %v3531_v61 = vld [vmem:[%s3922_s3 + $0x130] sm:$0xff] }
 0x1ba   :  { %1633 = vmatpush.msrb.mxu2 %v1223_v60  ;;  %v3525_v60 = vld [vmem:[%s3922_s3 + $0x138] sm:$0xff] }
 0x1bb   :  { %1572 = vmatpush.msra.mxu3 %v1290_v1  ;;  %1815 = vmatpush.msrb.mxu0 %v3278_v18  ;;  %v3549_v1 = vld [vmem:[%s3922_s3 + $0x120] sm:$0xff]  ;;  %v1715_v18 = vld [vmem:[%s3922_s3 + $0x1b8] sm:$0xff] }
 0x1bc   :  { %1634 = vmatpush.msrb.mxu2 %v1219_v0  ;;  %v3542_v0 = vld [vmem:[%s3922_s3 + $0x128] sm:$0xff] }
 0x1bd   :  { %1573 = vmatpush.msra.mxu3 %v1286_v3  ;;  %1816 = vmatpush.msrb.mxu0 %v3289_v19  ;;  %v3563_v3 = vld [vmem:[%s3922_s3 + $0x110] sm:$0xff] }
 0x1be   :  { %1635 = vmatpush.msrb.mxu2 %v1215_v2  ;;  %v3555_v2 = vld [vmem:[%s3922_s3 + $0x118] sm:$0xff] }
 0x1bf   :  { %1636 = vmatmul.f32.vlgmr.msrb.gmra.mxu2 %v3257_v35  ;;  %1574 = vmatpush.msra.mxu3 %v1282_v5  ;;  %v1307_v35 = vld [vmem:[#allocation7 + $0x6f8] sm:$0xff] }
 0x1c0   :  { %1770 = vmatpush.msra.mxu2 %v3442_v47  ;;  %1817 = vmatpush.msrb.mxu0 %v3306_v23  ;;  %v3574_v5 = vld [vmem:[%s3922_s3 + $0x108] sm:$0xff] }
 0x1c1   :  { %1575 = vmatpush.msra.mxu3 %v1278_v6  ;;  %v3581_v6 = vld [vmem:[%s3922_s3 + $0x100] sm:$0xff] }
 0x1c2   :  { %1576 = vmatmul.f32.vlgmr.msra.gmra.mxu3 %v3264_v38  ;;  %1771 = vmatpush.msra.mxu2 %v3454_v49 }
 0x1c3   :  { %1640 = vmatpush.msrb.mxu3 %v1339_v7  ;;  %1818 = vmatpush.msrb.mxu0 %v3313_v25  ;;  %v3586_v7 = vld [vmem:[%s3922_s3 + $0x1f8] sm:$0xff] }
 0x1c4   :  { %1772 = vmatpush.msra.mxu2 %v3465_v51  ;;  %v1711_v25 = vld [vmem:[%s3922_s3 + $0x198] sm:$0xff] }
 0x1c5   :  { %1641 = vmatpush.msrb.mxu3 %v1335_v8  ;;  %1819 = vmatpush.msrb.mxu0 %v3320_v27  ;;  %v3593_v8 = vld [vmem:[%s3922_s3 + $0x1f0] sm:$0xff] }
 0x1c6   :  { %1773 = vmatpush.msra.mxu2 %v3478_v53 }
 0x1c7   :  { %1642 = vmatpush.msrb.mxu3 %v1331_v9  ;;  %1820 = vmatpush.msrb.mxu0 %v3326_v30  ;;  %v3602_v9 = vld [vmem:[%s3922_s3 + $0x1e8] sm:$0xff] }
 0x1c8   :  { %1774 = vmatpush.msra.mxu2 %v3491_v55 }
 0x1c9   :  { %1643 = vmatpush.msrb.mxu3 %v1327_v10  ;;  %1821 = vmatpush.msrb.mxu0 %v3342_v33  ;;  %v3610_v10 = vld [vmem:[%s3922_s3 + $0x1e0] sm:$0xff] }
 0x1ca   :  { %1775 = vmatpush.msra.mxu2 %v3499_v56 }
 0x1cb   :  { %1644 = vmatpush.msrb.mxu3 %v1323_v11  ;;  %1822 = vmatpush.msrb.mxu0 %v3355_v17  ;;  %v3618_v11 = vld [vmem:[%s3922_s3 + $0x1d8] sm:$0xff]  ;;  %v1708_v17 = vld [vmem:[%s3922_s3 + $0x180] sm:$0xff] }
 0x1cc   :  { %1776 = vmatpush.msra.mxu2 %v3507_v58 }
 0x1cd   :  { %1645 = vmatpush.msrb.mxu3 %v1319_v12  ;;  %1823 = vmatpush.msrb.mxu0 %v3367_v29  ;;  %v1718_v12 = vld [vmem:[%s3922_s3 + $0x1d0] sm:$0xff] }
 0x1ce   :  { %1777 = vmatpush.msra.mxu2 %v3518_v59 }
 0x1cf   :  { %1646 = vmatpush.msrb.mxu3 %v1315_v13  ;;  %1824 = vmatpush.msrb.mxu0 %v3374_v41  ;;  %v1717_v13 = vld [vmem:[%s3922_s3 + $0x1c8] sm:$0xff] }
 0x1d0   :  { %1778 = vmatpush.msra.mxu2 %v3525_v60 }
 0x1d1   :  { %1647 = vmatpush.msrb.mxu3 %v1311_v14  ;;  %1825 = vmatpush.msrb.mxu0 %v3381_v37  ;;  %v1357_v14 = vpop.f32.mrf.mxu0 }
 0x1d2   :  { %1779 = vmatpush.msra.mxu2 %v3531_v61 }
 0x1d3   :  { %1648 = vmatpush.msrb.mxu3 %v1307_v35  ;;  %1826 = vmatpush.msrb.mxu0 %v3398_v39  ;;  %v1377_v35 = vpop.f32.mrf.mxu1 }
 0x1d4   :  { %1780 = vmatpush.msra.mxu2 %v3542_v0  ;;  %v1378_v16 = vadd.f32 %v1377_v35, %v1357_v14  ;;  %v1724_v14 = vld [vmem:[#allocation8] sm:$0xff]  ;;  %v1725_v35 = vld [vmem:[#allocation8 + $0x8] sm:$0xff] }
 0x1d5   :  { %1649 = vmatpush.msrb.mxu3 %v1303_v57  ;;  %1827 = vmatpush.msrb.mxu0 %v3410_v42 }
 0x1d6   :  { %1781 = vmatpush.msra.mxu2 %v3549_v1 }
 0x1d7   :  { %1650 = vmatpush.msrb.mxu3 %v1299_v15  ;;  %1828 = vmatpush.msrb.mxu0 %v3422_v44  ;;  %v1716_v15 = vld [vmem:[%s3922_s3 + $0x1c0] sm:$0xff] }
 0x1d8   :  { %1782 = vmatpush.msra.mxu2 %v3555_v2 }
 0x1d9   :  { %1651 = vmatpush.msrb.mxu3 %v1295_v63  ;;  %1829 = vmatpush.msrb.mxu0 %v3430_v45 }
 0x1da   :  { %1783 = vmatpush.msra.mxu2 %v3563_v3 }
 0x1db   :  { %1652 = vmatpush.msrb.mxu3 %v1291_v21  ;;  %v1437_v21 = vpop.f32.mrf.mxu0  ;;  %v1457_v23 = vpop.f32.mrf.mxu1 }
 0x1dc   :  { %1784 = vmatpush.msra.mxu2 %v3574_v5  ;;  %v1458_v27 = vadd.f32 %v1457_v23, %v1437_v21 }
 0x1dd   :  { %1653 = vmatpush.msrb.mxu3 %v1287_v24  ;;  %v1712_v24 = vld [vmem:[%s3922_s3 + $0x1a0] sm:$0xff] }
 0x1de   :  { %1785 = vmatpush.msra.mxu2 %v3581_v6 }
 0x1df   :  { %1654 = vmatpush.msrb.mxu3 %v1283_v26 }
 0x1e0   :  { %1854 = vmatpush.msrb.mxu2 %v3442_v47 }
 0x1e1   :  { %1655 = vmatpush.msrb.mxu3 %v1279_v28  ;;  %v1710_v28 = vld [vmem:[%s3922_s3 + $0x190] sm:$0xff] }
 0x1e2   :  { %1656 = vmatmul.f32.vlgmr.msrb.gmra.mxu3 %v3264_v38  ;;  %v3386_v38 = vld [vmem:[%s3922_s3 + $0xc0] sm:$0xff]  ;;  %1855 = vmatpush.msrb.mxu2 %v3454_v49 }
 0x1e3   :  { %1757 = vmatpush.msra.mxu1 %v3386_v38  ;;  %1790 = vmatpush.msra.mxu3 %v3586_v7 }
 0x1e4   :  { %1856 = vmatpush.msrb.mxu2 %v3465_v51 }
 0x1e5   :  { %1758 = vmatpush.msra.mxu1 %v3393_v22  ;;  %1791 = vmatpush.msra.mxu3 %v3593_v8 }
 0x1e6   :  { %1857 = vmatpush.msrb.mxu2 %v3478_v53 }
 0x1e7   :  { %1759 = vmatpush.msra.mxu1 %v3403_v40  ;;  %1792 = vmatpush.msra.mxu3 %v3602_v9 }
 0x1e8   :  { %1858 = vmatpush.msrb.mxu2 %v3491_v55 }
 0x1e9   :  { %1760 = vmatpush.msra.mxu1 %v3415_v43  ;;  %1793 = vmatpush.msra.mxu3 %v3610_v10 }
 0x1ea   :  { %1859 = vmatpush.msrb.mxu2 %v3499_v56 }
 0x1eb   :  { %1761 = vmatpush.msra.mxu1 %v3435_v46  ;;  %1794 = vmatpush.msra.mxu3 %v3618_v11 }
 0x1ec   :  { %1860 = vmatpush.msrb.mxu2 %v3507_v58 }
 0x1ed   :  { %1762 = vmatpush.msra.mxu1 %v3449_v48  ;;  %1795 = vmatpush.msra.mxu3 %v1718_v12 }
 0x1ee   :  { %1861 = vmatpush.msrb.mxu2 %v3518_v59 }
 0x1ef   :  { %1763 = vmatpush.msra.mxu1 %v3459_v50  ;;  %1796 = vmatpush.msra.mxu3 %v1717_v13 }
 0x1f0   :  { %1862 = vmatpush.msrb.mxu2 %v3525_v60 }
 0x1f1   :  { %1764 = vmatpush.msra.mxu1 %v3472_v52  ;;  %1797 = vmatpush.msra.mxu3 %v1716_v15 }
 0x1f2   :  { %1863 = vmatpush.msrb.mxu2 %v3531_v61 }
 0x1f3   :  { %1765 = vmatpush.msra.mxu1 %v3485_v54  ;;  %1798 = vmatpush.msra.mxu3 %v1715_v18 }
 0x1f4   :  { %1864 = vmatpush.msrb.mxu2 %v3542_v0  ;;  %v1517_v29 = vpop.f32.mrf.mxu0  ;;  %v1537_v41 = vpop.f32.mrf.mxu1 }
 0x1f5   :  { %1834 = vmatpush.msrb.mxu1 %v3284_v62  ;;  %v1714_v62 = vld [vmem:[%s3922_s3 + $0x1b0] sm:$0xff] }
 0x1f6   :  { %1799 = vmatpush.msra.mxu3 %v1714_v62  ;;  %1865 = vmatpush.msrb.mxu2 %v3549_v1 }
 0x1f7   :  { %1835 = vmatpush.msrb.mxu1 %v3295_v20 }
 0x1f8   :  { %1866 = vmatpush.msrb.mxu2 %v3555_v2 }
 0x1f9   :  { %1836 = vmatpush.msrb.mxu1 %v3301_v4  ;;  %v1713_v4 = vld [vmem:[%s3922_s3 + $0x1a8] sm:$0xff] }
 0x1fa   :  { %1800 = vmatpush.msra.mxu3 %v1713_v4  ;;  %1867 = vmatpush.msrb.mxu2 %v3563_v3 }
 0x1fb   :  { %1837 = vmatpush.msrb.mxu1 %v3331_v31  ;;  %v1709_v31 = vld [vmem:[%s3922_s3 + $0x188] sm:$0xff] }
 0x1fc   :  { %1801 = vmatpush.msra.mxu3 %v1712_v24  ;;  %1868 = vmatpush.msrb.mxu2 %v3574_v5 }
 0x1fd   :  { %1838 = vmatpush.msrb.mxu1 %v3337_v32 }
 0x1fe   :  { %v1397_v57 = vpop.f32.mrf.mxu2  ;;  %1802 = vmatpush.msra.mxu3 %v1711_v25  ;;  %1869 = vmatpush.msrb.mxu2 %v3581_v6 }
 0x1ff   :  { %1839 = vmatpush.msrb.mxu1 %v3349_v34  ;;  %v1398_v63 = vadd.f32 %v1397_v57, %v1378_v16 }
 0x200   :  { %1803 = vmatpush.msra.mxu3 %v1710_v28 }
 0x201   :  { %1840 = vmatpush.msrb.mxu1 %v3362_v36 }
 0x202   :  { %1804 = vmatpush.msra.mxu3 %v1709_v31 }
 0x203   :  { %1841 = vmatpush.msrb.mxu1 %v3386_v38  ;;  %v1538_v38 = vadd.f32 %v1537_v41, %v1517_v29 }
 0x204   :  { %1805 = vmatpush.msra.mxu3 %v1708_v17 }
 0x205   :  { %1842 = vmatpush.msrb.mxu1 %v3393_v22 }
 0x206   :  { %1874 = vmatpush.msrb.mxu3 %v3586_v7 }
 0x207   :  { %1843 = vmatpush.msrb.mxu1 %v3403_v40 }
 0x208   :  { %v1477_v26 = vpop.f32.mrf.mxu2  ;;  %1875 = vmatpush.msrb.mxu3 %v3593_v8 }
 0x209   :  { %1844 = vmatpush.msrb.mxu1 %v3415_v43  ;;  %v1478_v30 = vadd.f32 %v1477_v26, %v1458_v27 }
 0x20a   :  { %1876 = vmatpush.msrb.mxu3 %v3602_v9 }
 0x20b   :  { %1845 = vmatpush.msrb.mxu1 %v3435_v46 }
 0x20c   :  { %1877 = vmatpush.msrb.mxu3 %v3610_v10 }
 0x20d   :  { %1846 = vmatpush.msrb.mxu1 %v3449_v48 }
 0x20e   :  { %1878 = vmatpush.msrb.mxu3 %v3618_v11 }
 0x20f   :  { %1847 = vmatpush.msrb.mxu1 %v3459_v50 }
 0x210   :  { %1879 = vmatpush.msrb.mxu3 %v1718_v12 }
 0x211   :  { %1848 = vmatpush.msrb.mxu1 %v3472_v52  ;;  %v3107_v52 = vmov 128.0  }
 0x212   :  { %1880 = vmatpush.msrb.mxu3 %v1717_v13  ;;  %2802 = vrcp.f32 %v3107_v52  ;;  %v2151_v52 = vld [vmem:[#allocation13 + $0xb0] sm:$0xff] }
 0x213   :  { %1849 = vmatpush.msrb.mxu1 %v3485_v54 }
 0x214   :  { %1881 = vmatpush.msrb.mxu3 %v1716_v15  ;;  %v1597_v43 = vpop.f32.mrf.mxu0  ;;  %v1617_v44 = vpop.f32.mrf.mxu1 }
 0x215   :  { %v1618_v46 = vadd.f32 %v1617_v44, %v1597_v43  ;;  %v2155_v43 = vld [vmem:[#allocation13 + $0xd0] sm:$0xff] }
 0x216   :  { %1882 = vmatpush.msrb.mxu3 %v1715_v18  ;;  %v2187_v44 = vld [vmem:[#allocation13 + $0x1d0] sm:$0xff] }
 0x218   :  { %1883 = vmatpush.msrb.mxu3 %v1714_v62  ;;  %v2803_v56 = vpop.eup %2802 }
 0x219   :  { %v1903_v61 = vmul.f32 128.0, %v2803_v56  ;;  %vm1907_vm5 = vweird.f32 %v2803_v56 }
 0x21a   :  { %1884 = vmatpush.msrb.mxu3 %v1713_v4 }
 0x21b   :  { %v1904_v7 = vsub.f32 1.0, %v1903_v61  ;;  %v2143_v61 = vld [vmem:[#allocation13 + $0x70] sm:$0xff] }
 0x21c   :  { %1885 = vmatpush.msrb.mxu3 %v1712_v24  ;;  %v1726_v24 = vld [vmem:[#allocation8 + $0x10] sm:$0xff] }
 0x21d   :  { %v1905_v12 = vmul.f32 %v2803_v56, %v1904_v7  ;;  %v2223_v7 = vld [vmem:[#allocation13 + $0x2f0] sm:$0xff] }
 0x21e   :  { %1886 = vmatpush.msrb.mxu3 %v1711_v25  ;;  %v1727_v25 = vld [vmem:[#allocation8 + $0x18] sm:$0xff] }
 0x21f   :  { %v1906_v62 = vadd.f32 %v2803_v56, %v1905_v12  ;;  %v2253_v12 = vld [vmem:[#allocation13 + $0x3e0] sm:$0xff] }
 0x220   :  { %1887 = vmatpush.msrb.mxu3 %v1710_v28 }
 0x221   :  { %v1908_v21 = vsel %vm1907_vm5, %v2803_v56, %v1906_v62  ;;  %v2147_v56 = vld [vmem:[#allocation13 + $0x90] sm:$0xff]  ;;  %v2249_v62 = vld [vmem:[#allocation13 + $0x3c0] sm:$0xff] }
 0x222   :  { %v1557_v37 = vpop.f32.mrf.mxu2  ;;  %1888 = vmatpush.msrb.mxu3 %v1709_v31 }
 0x223   :  { %v1558_v22 = vadd.f32 %v1557_v37, %v1538_v38  ;;  %v2159_v37 = vld [vmem:[#allocation13 + $0xf0] sm:$0xff] }
 0x224   :  { %1889 = vmatpush.msrb.mxu3 %v1708_v17  ;;  %v2191_v38 = vld [vmem:[#allocation13 + $0x1f0] sm:$0xff] }
 0x225   :  { %v1417_v19 = vpop.f32.mrf.mxu3 }
 0x226   :  { %v3646_v20 = vadd.f32 %v1417_v19, %v1398_v63 }
 0x228   :  { %1746 = vmatmul.f32.vlgmr.msra.gmra.mxu0 %v3646_v20  ;;  %v1810_v33 = vmul.f32 %v3646_v20, %v3646_v20 }
 0x229   :  { %2257 = vmatpush.msra.mxu0 %v2159_v37  ;;  %v2129_v37 = vld [vmem:[#allocation13] sm:$0xff] }
 0x22d   :  { %v1497_v32 = vpop.f32.mrf.mxu3 }
 0x22e   :  { %v3670_v34 = vadd.f32 %v1497_v32, %v1478_v30 }
 0x230   :  { %1766 = vmatmul.f32.vlgmr.msra.gmra.mxu1 %v3670_v34  ;;  %1830 = vmatmul.f32.vlgmr.msrb.gmra.mxu0 %v1810_v33  ;;  %v1811_v36 = vmul.f32 %v3670_v34, %v3670_v34 }
 0x231   :  { %2277 = vmatpush.msra.mxu1 %v2191_v38  ;;  %v2161_v38 = vld [vmem:[#allocation13 + $0x100] sm:$0xff] }
 0x238   :  { %1850 = vmatmul.f32.vlgmr.msrb.gmra.mxu1 %v1811_v36 }
 0x242   :  { %v1637_v45 = vpop.f32.mrf.mxu2 }
 0x243   :  { %v1638_v47 = vadd.f32 %v1637_v45, %v1618_v46  ;;  %v1728_v45 = vld [vmem:[#allocation10] sm:$0x1] }
 0x245   :  { %v1577_v39 = vpop.f32.mrf.mxu3 }
 0x246   :  { %v3685_v40 = vadd.f32 %v1577_v39, %v1558_v22  ;;  %v2157_v22 = vld [vmem:[#allocation13 + $0xe0] sm:$0xff] }
 0x247   :  { %2258 = vmatpush.msra.mxu0 %v2157_v22  ;;  %v2201_v22 = vld [vmem:[#allocation13 + $0x240] sm:$0xff] }
 0x248   :  { %1786 = vmatmul.f32.vlgmr.msra.gmra.mxu2 %v3685_v40  ;;  %v1812_v42 = vmul.f32 %v3685_v40, %v3685_v40 }
 0x249   :  { %1953 = vmatpush.msra.mxu2 %v1724_v14  ;;  %2259 = vmatpush.msra.mxu0 %v2155_v43  ;;  %v2192_v43 = vld [vmem:[#allocation13 + $0x1f8] sm:$0xff] }
 0x250   :  { %1870 = vmatmul.f32.vlgmr.msrb.gmra.mxu2 %v1812_v42  ;;  %v2189_v42 = vld [vmem:[#allocation13 + $0x1e0] sm:$0xff] }
 0x251   :  { %1993 = vmatpush.msrb.mxu2 %v1726_v24  ;;  %2278 = vmatpush.msra.mxu1 %v2189_v42  ;;  %v2160_v42 = vld [vmem:[#allocation13 + $0xf8] sm:$0xff] }
 0x253   :  { %2279 = vmatpush.msra.mxu1 %v2187_v44  ;;  %v2199_v44 = vld [vmem:[#allocation13 + $0x230] sm:$0xff] }
 0x265   :  { %v1657_v48 = vpop.f32.mrf.mxu3 }
 0x266   :  { %v3690_v49 = vadd.f32 %v1657_v48, %v1638_v47  ;;  %v2153_v47 = vld [vmem:[#allocation13 + $0xc0] sm:$0xff] }
 0x267   :  { %v2185_v48 = vld [vmem:[#allocation13 + $0x1c0] sm:$0xff]  ;;  %2260 = vmatpush.msra.mxu0 %v2153_v47  ;;  %v2190_v47 = vld [vmem:[#allocation13 + $0x1e8] sm:$0xff] }
 0x268   :  { %1806 = vmatmul.f32.vlgmr.msra.gmra.mxu3 %v3690_v49  ;;  %v1813_v50 = vmul.f32 %v3690_v49, %v3690_v49  ;;  %2280 = vmatpush.msra.mxu1 %v2185_v48  ;;  %v2197_v48 = vld [vmem:[#allocation13 + $0x220] sm:$0xff] }
 0x269   :  { %1973 = vmatpush.msra.mxu3 %v1725_v35  ;;  %2261 = vmatpush.msra.mxu0 %v2151_v52  ;;  %v2188_v52 = vld [vmem:[#allocation13 + $0x1d8] sm:$0xff] }
 0x270   :  { %1890 = vmatmul.f32.vlgmr.msrb.gmra.mxu3 %v1813_v50 }
 0x271   :  { %2013 = vmatpush.msrb.mxu3 %v1727_v25 }
 0x2a5   :  { %v1747_v53 = vpop.f32.mrf.mxu0 }
 0x2ad   :  { %v1767_v51 = vpop.f32.mrf.mxu1  ;;  %v1831_v2 = vpop.f32.mrf.mxu0 }
 0x2ae   :  { %v1768_v55 = vadd.f32 %v1767_v51, %v1747_v53  ;;  %v2183_v53 = vld [vmem:[#allocation13 + $0x1b0] sm:$0xff] }
 0x2af   :  { %2281 = vmatpush.msra.mxu1 %v2183_v53  ;;  %v2195_v53 = vld [vmem:[#allocation13 + $0x210] sm:$0xff] }
 0x2b5   :  { %v1851_v0 = vpop.f32.mrf.mxu1 }
 0x2b6   :  { %v1852_v6 = vadd.f32 %v1851_v0, %v1831_v2  ;;  %v2175_v0 = vld [vmem:[#allocation13 + $0x170] sm:$0xff]  ;;  %v1729_v2 = vld [vmem:[#allocation11] sm:$0x1] }
 0x2cb   :  { %v1787_v54 = vpop.f32.mrf.mxu2 }
 0x2cc   :  { %v1788_v58 = vadd.f32 %v1787_v54, %v1768_v55  ;;  %v2149_v54 = vld [vmem:[#allocation13 + $0xa0] sm:$0xff] }
 0x2cd   :  { %v2181_v55 = vld [vmem:[#allocation13 + $0x1a0] sm:$0xff]  ;;  %2262 = vmatpush.msra.mxu0 %v2149_v54  ;;  %v2227_v54 = vld [vmem:[#allocation13 + $0x310] sm:$0xff] }
 0x2ce   :  { %2282 = vmatpush.msra.mxu1 %v2181_v55  ;;  %v2154_v55 = vld [vmem:[#allocation13 + $0xc8] sm:$0xff] }
 0x2cf   :  { %2263 = vmatpush.msra.mxu0 %v2147_v56  ;;  %v2186_v56 = vld [vmem:[#allocation13 + $0x1c8] sm:$0xff] }
 0x2d3   :  { %v1871_v3 = vpop.f32.mrf.mxu2 }
 0x2d4   :  { %v1872_v9 = vadd.f32 %v1871_v3, %v1852_v6  ;;  %v2141_v3 = vld [vmem:[#allocation13 + $0x60] sm:$0xff] }
 0x2eb   :  { %v1807_v59 = vpop.f32.mrf.mxu3 }
 0x2ec   :  { %v1808_v60 = vadd.f32 %v1807_v59, %v1788_v58  ;;  %v2179_v58 = vld [vmem:[#allocation13 + $0x190] sm:$0xff]  ;;  %v2145_v59 = vld [vmem:[#allocation13 + $0x80] sm:$0xff] }
 0x2ed   :  { %2283 = vmatpush.msra.mxu1 %v2179_v58  ;;  %2264 = vmatpush.msra.mxu0 %v2145_v59  ;;  %v2193_v58 = vld [vmem:[#allocation13 + $0x200] sm:$0xff] }
 0x2ee   :  { %v1895_v1 = vsel %vm1894_vm4, %v1808_v60, 0.0  ;;  %v2177_v60 = vld [vmem:[#allocation13 + $0x180] sm:$0xff] }
 0x2ef   :  { %v1896_v5 = vrot.slane %v1895_v1, 4  ;;  %2284 = vmatpush.msra.mxu1 %v2177_v60  ;;  %2265 = vmatpush.msra.mxu0 %v2143_v61  ;;  %v2225_v59 = vld [vmem:[#allocation13 + $0x300] sm:$0xff]  ;;  %v2152_v60 = vld [vmem:[#allocation13 + $0xb8] sm:$0xff] }
 0x2f0   :  { %v2184_v61 = vld [vmem:[#allocation13 + $0x1b8] sm:$0xff] }
 0x2f1   :  { %v1897_v8 = vadd.f32 %v1896_v5, %v1895_v1  ;;  %v2173_v5 = vld [vmem:[#allocation13 + $0x160] sm:$0xff]  ;;  %2285 = vmatpush.msra.mxu1 %v2175_v0  ;;  %2266 = vmatpush.msra.mxu0 %v2141_v3  ;;  %v2224_v0 = vld [vmem:[#allocation13 + $0x2f8] sm:$0xff]  ;;  %v2182_v3 = vld [vmem:[#allocation13 + $0x1a8] sm:$0xff] }
 0x2f3   :  { %v1898_v10 = vrot.slane %v1897_v8, 2  ;;  %v1891_v11 = vpop.f32.mrf.mxu3  ;;  %2286 = vmatpush.msra.mxu1 %v2173_v5  ;;  %v2222_v5 = vld [vmem:[#allocation13 + $0x2e8] sm:$0xff] }
 0x2f4   :  { %v1892_v13 = vadd.f32 %v1891_v11, %v1872_v9  ;;  %v2139_v9 = vld [vmem:[#allocation13 + $0x50] sm:$0xff]  ;;  %v2221_v11 = vld [vmem:[#allocation13 + $0x2e0] sm:$0xff] }
 0x2f5   :  { %v1899_v57 = vadd.f32 %v1898_v10, %v1897_v8  ;;  %v2255_v8 = vld [vmem:[#allocation13 + $0x3f0] sm:$0xff]  ;;  %2267 = vmatpush.msra.mxu0 %v2139_v9  ;;  %v2220_v9 = vld [vmem:[#allocation13 + $0x2d8] sm:$0xff] }
 0x2f6   :  { %v1910_v15 = vsel %vm1894_vm4, %v1892_v13, 0.0  ;;  %v2171_v10 = vld [vmem:[#allocation13 + $0x150] sm:$0xff]  ;;  %v2137_v13 = vld [vmem:[#allocation13 + $0x40] sm:$0xff] }
 0x2f7   :  { %v1900_v16 = vrot.slane %v1899_v57, 1  ;;  %v1911_v18 = vrot.slane %v1910_v15, 4  ;;  %2287 = vmatpush.msra.mxu1 %v2171_v10  ;;  %2268 = vmatpush.msra.mxu0 %v2137_v13  ;;  %v2252_v10 = vld [vmem:[#allocation13 + $0x3d8] sm:$0xff]  ;;  %v2218_v13 = vld [vmem:[#allocation13 + $0x2c8] sm:$0xff] }
 0x2f9   :  { %v1912_v63 = vadd.f32 %v1911_v18, %v1910_v15  ;;  %v1901_v19 = vadd.f32 %v1900_v16, %v1899_v57  ;;  %v2251_v57 = vld [vmem:[#allocation13 + $0x3d0] sm:$0xff]  ;;  %v2217_v18 = vld [vmem:[#allocation13 + $0x2c0] sm:$0xff] }
 0x2fa   :  { %v2135_v15 = vld [vmem:[#allocation13 + $0x30] sm:$0xff] }
 0x2fb   :  { %v1913_v4 = vrot.slane %v1912_v63, 2  ;;  %v1909_v26 = vmul.f32 %v1908_v21, %v1901_v19  ;;  %v2167_v16 = vld [vmem:[#allocation13 + $0x130] sm:$0xff]  ;;  %2269 = vmatpush.msra.mxu0 %v2135_v15  ;;  %v2216_v15 = vld [vmem:[#allocation13 + $0x2b8] sm:$0xff] }
 0x2fc   :  { %v2247_v19 = vld [vmem:[#allocation13 + $0x3b0] sm:$0xff] }
 0x2fd   :  { %v1914_v23 = vadd.f32 %v1913_v4, %v1912_v63  ;;  %v1918_v30 = vmul.f32 %v1909_v26, %v1909_v26  ;;  %v2215_v63 = vld [vmem:[#allocation13 + $0x2b0] sm:$0xff]  ;;  %v2133_v4 = vld [vmem:[#allocation13 + $0x20] sm:$0xff] }
 0x2fe   :  { %2270 = vmatpush.msra.mxu0 %v2133_v4  ;;  %v2140_v4 = vld [vmem:[#allocation13 + $0x58] sm:$0xff] }
 0x2ff   :  { %v1915_v27 = vrot.slane %v1914_v23, 1 }
 0x301   :  { %v1916_v28 = vadd.f32 %v1915_v27, %v1914_v23  ;;  %v2213_v23 = vld [vmem:[#allocation13 + $0x2a0] sm:$0xff]  ;;  %v2211_v27 = vld [vmem:[#allocation13 + $0x290] sm:$0xff] }
 0x303   :  { %v1917_v31 = vmul.f32 %v1916_v28, %v1908_v21  ;;  %v2165_v21 = vld [vmem:[#allocation13 + $0x120] sm:$0xff]  ;;  %v2243_v28 = vld [vmem:[#allocation13 + $0x390] sm:$0xff] }
 0x305   :  { %v1919_v32 = vsub.f32 %v1917_v31, %v1918_v30  ;;  %v2209_v30 = vld [vmem:[#allocation13 + $0x280] sm:$0xff] }
 0x306   :  { %v2241_v31 = vld [vmem:[#allocation13 + $0x380] sm:$0xff] }
 0x307   :  { %v1920_v33 = vadd.f32 1e-05, %v1919_v32  ;;  %v2207_v32 = vld [vmem:[#allocation13 + $0x270] sm:$0xff] }
 0x309   :  { %2804 = vrsqrt.f32 %v1920_v33  ;;  %vm1927_vm7 = vweird.f32 %v1920_v33 }
 0x30f   :  { %v2805_v17 = vpop.eup %2804 }
 0x310   :  { %v1922_v36 = vmul.f32 %v2805_v17, %v1920_v33  ;;  %vm1928_vm6 = vweird.f32 %v2805_v17  ;;  %v2239_v33 = vld [vmem:[#allocation13 + $0x370] sm:$0xff] }
 0x311   :  { %vm1929_vm8 = vmor %vm1927_vm7, %vm1928_vm6 }
 0x312   :  { %v1923_v29 = vmul.f32 %v2805_v17, %v1922_v36  ;;  %v2237_v36 = vld [vmem:[#allocation13 + $0x360] sm:$0xff] }
 0x314   :  { %v1924_v41 = vmul.f32 0.5, %v1923_v29  ;;  %v2203_v29 = vld [vmem:[#allocation13 + $0x250] sm:$0xff] }
 0x316   :  { %v1925_v39 = vsub.f32 1.5, %v1924_v41  ;;  %v2235_v41 = vld [vmem:[#allocation13 + $0x350] sm:$0xff] }
 0x318   :  { %v1926_v46 = vmul.f32 %v2805_v17, %v1925_v39  ;;  %v2233_v39 = vld [vmem:[#allocation13 + $0x340] sm:$0xff] }
 0x31a   :  { %v1930_v50 = vsel %vm1929_vm8, %v2805_v17, %v1926_v46  ;;  %v2205_v17 = vld [vmem:[#allocation13 + $0x260] sm:$0xff]  ;;  %v2158_v46 = vld [vmem:[#allocation13 + $0xe8] sm:$0xff] }
 0x31b   :  { %v1931_v51 = vmul.f32 %v1930_v50, %v1728_v45  ;;  %v2231_v45 = vld [vmem:[#allocation13 + $0x330] sm:$0xff]  ;;  %v2229_v50 = vld [vmem:[#allocation13 + $0x320] sm:$0xff] }
 0x31d   :  { %2773 = vmatmul.msk.f32.vlgmr.msra.gmra.mxu2 %vm1934_vm9, %v1931_v51  ;;  %2774 = vmatmul.msk.f32.vlgmr.msra.gmra.mxu3 %vm1934_vm9, %v1931_v51  ;;  %v1932_v1 = vmul.f32 %v1931_v51, %v1909_v26  ;;  %v2163_v26 = vld [vmem:[#allocation13 + $0x110] sm:$0xff] }
 0x31e   :  { %2044 = vmatpush.msra.mxu2 %v1724_v14  ;;  %2064 = vmatpush.msra.mxu3 %v1725_v35  ;;  %v2169_v14 = vld [vmem:[#allocation13 + $0x140] sm:$0xff]  ;;  %v2219_v35 = vld [vmem:[#allocation13 + $0x2d0] sm:$0xff] }
 0x31f   :  { %v1933_v6 = vsub.f32 %v1729_v2, %v1932_v1  ;;  %2288 = vmatpush.msra.mxu1 %v2169_v14  ;;  %v2256_v1 = vld [vmem:[#allocation13 + $0x3f8] sm:$0xff]  ;;  %v2150_v2 = vld [vmem:[#allocation13 + $0xa8] sm:$0xff] }
 0x320   :  { %v2250_v14 = vld [vmem:[#allocation13 + $0x3c8] sm:$0xff] }
 0x321   :  { %2289 = vmatpush.msra.mxu1 %v2167_v16  ;;  %v2248_v16 = vld [vmem:[#allocation13 + $0x3b8] sm:$0xff] }
 0x323   :  { %2290 = vmatpush.msra.mxu1 %v2165_v21  ;;  %v2172_v21 = vld [vmem:[#allocation13 + $0x158] sm:$0xff] }
 0x325   :  { %2775 = vmatmul.msk.f32.vlgmr.msrb.gmra.mxu2 %vm1934_vm9, %v1931_v51  ;;  %2776 = vmatmul.msk.f32.vlgmr.msrb.gmra.mxu3 %vm1934_vm9, %v1931_v51  ;;  %v2156_v51 = vld [vmem:[#allocation13 + $0xd8] sm:$0xff] }
 0x326   :  { %2084 = vmatpush.msrb.mxu2 %v1726_v24  ;;  %2104 = vmatpush.msrb.mxu3 %v1727_v25  ;;  %v2245_v24 = vld [vmem:[#allocation13 + $0x3a0] sm:$0xff]  ;;  %v2131_v25 = vld [vmem:[#allocation13 + $0x10] sm:$0xff] }
 0x327   :  { %2271 = vmatpush.msra.mxu0 %v2131_v25  ;;  %2291 = vmatpush.msra.mxu1 %v2163_v26  ;;  %v2138_v25 = vld [vmem:[#allocation13 + $0x48] sm:$0xff] }
 0x328   :  { %v2170_v26 = vld [vmem:[#allocation13 + $0x148] sm:$0xff] }
 0x329   :  { %2272 = vmatpush.msra.mxu0 %v2129_v37  ;;  %2292 = vmatpush.msra.mxu1 %v2161_v38  ;;  %v2132_v37 = vld [vmem:[#allocation13 + $0x18] sm:$0xff] }
 0x32a   :  { %v2164_v38 = vld [vmem:[#allocation13 + $0x118] sm:$0xff] }
 0x32b   :  { %2337 = vmatpush.msrb.mxu0 %v2160_v42  ;;  %2357 = vmatpush.msrb.mxu1 %v2192_v43  ;;  %v2130_v42 = vld [vmem:[#allocation13 + $0x8] sm:$0xff] }
 0x32c   :  { %v2162_v43 = vld [vmem:[#allocation13 + $0x108] sm:$0xff] }
 0x32d   :  { %2777 = vmatmul.msk.f32.vlgmr.msra.gmra.mxu2 %vm1934_vm9, %v1933_v6  ;;  %2778 = vmatmul.msk.f32.vlgmr.msra.gmra.mxu3 %vm1934_vm9, %v1933_v6 }
 0x32e   :  { %2297 = vmatpush.msra.mxu2 %v2223_v7  ;;  %2317 = vmatpush.msra.mxu3 %v2255_v8  ;;  %v2148_v7 = vld [vmem:[#allocation13 + $0x98] sm:$0xff] }
 0x32f   :  { %2338 = vmatpush.msrb.mxu0 %v2158_v46  ;;  %2358 = vmatpush.msrb.mxu1 %v2190_v47  ;;  %v2180_v8 = vld [vmem:[#allocation13 + $0x198] sm:$0xff] }
 0x330   :  { %2298 = vmatpush.msra.mxu2 %v2221_v11  ;;  %2318 = vmatpush.msra.mxu3 %v2253_v12  ;;  %v2146_v11 = vld [vmem:[#allocation13 + $0x88] sm:$0xff] }
 0x331   :  { %2339 = vmatpush.msrb.mxu0 %v2156_v51  ;;  %2359 = vmatpush.msrb.mxu1 %v2188_v52  ;;  %v2178_v12 = vld [vmem:[#allocation13 + $0x188] sm:$0xff] }
 0x332   :  { %2299 = vmatpush.msra.mxu2 %v2219_v35  ;;  %2319 = vmatpush.msra.mxu3 %v2251_v57  ;;  %v2144_v35 = vld [vmem:[#allocation13 + $0x78] sm:$0xff]  ;;  %v2198_v51 = vld [vmem:[#allocation13 + $0x228] sm:$0xff] }
 0x333   :  { %2340 = vmatpush.msrb.mxu0 %v2154_v55  ;;  %2360 = vmatpush.msrb.mxu1 %v2186_v56  ;;  %v2176_v57 = vld [vmem:[#allocation13 + $0x178] sm:$0xff]  ;;  %v2230_v52 = vld [vmem:[#allocation13 + $0x328] sm:$0xff] }
 0x334   :  { %2300 = vmatpush.msra.mxu2 %v2217_v18  ;;  %2320 = vmatpush.msra.mxu3 %v2249_v62  ;;  %v2142_v18 = vld [vmem:[#allocation13 + $0x68] sm:$0xff] }
 0x335   :  { %2779 = vmatmul.msk.f32.vlgmr.msrb.gmra.mxu2 %vm1934_vm9, %v1933_v6  ;;  %2780 = vmatmul.msk.f32.vlgmr.msrb.gmra.mxu3 %vm1934_vm9, %v1933_v6  ;;  %v2254_v6 = vld [vmem:[#allocation13 + $0x3e8] sm:$0xff] }
 0x336   :  { %2301 = vmatpush.msra.mxu2 %v2215_v63  ;;  %2321 = vmatpush.msra.mxu3 %v2247_v19  ;;  %v2174_v62 = vld [vmem:[#allocation13 + $0x168] sm:$0xff] }
 0x337   :  { %2341 = vmatpush.msrb.mxu0 %v2152_v60  ;;  %2361 = vmatpush.msrb.mxu1 %v2184_v61  ;;  %v2214_v63 = vld [vmem:[#allocation13 + $0x2a8] sm:$0xff] }
 0x338   :  { %2302 = vmatpush.msra.mxu2 %v2213_v23  ;;  %2322 = vmatpush.msra.mxu3 %v2245_v24  ;;  %v2246_v19 = vld [vmem:[#allocation13 + $0x3a8] sm:$0xff]  ;;  %v2212_v23 = vld [vmem:[#allocation13 + $0x298] sm:$0xff] }
 0x339   :  { %2342 = vmatpush.msrb.mxu0 %v2150_v2  ;;  %2362 = vmatpush.msrb.mxu1 %v2182_v3  ;;  %v2244_v24 = vld [vmem:[#allocation13 + $0x398] sm:$0xff]  ;;  %v2194_v55 = vld [vmem:[#allocation13 + $0x208] sm:$0xff] }
 0x33a   :  { %2303 = vmatpush.msra.mxu2 %v2211_v27  ;;  %2323 = vmatpush.msra.mxu3 %v2243_v28  ;;  %v2210_v27 = vld [vmem:[#allocation13 + $0x288] sm:$0xff] }
 0x33b   :  { %2343 = vmatpush.msrb.mxu0 %v2148_v7  ;;  %2363 = vmatpush.msrb.mxu1 %v2180_v8  ;;  %v2242_v28 = vld [vmem:[#allocation13 + $0x388] sm:$0xff] }
 0x33c   :  { %2304 = vmatpush.msra.mxu2 %v2209_v30  ;;  %2324 = vmatpush.msra.mxu3 %v2241_v31  ;;  %v2136_v30 = vld [vmem:[#allocation13 + $0x38] sm:$0xff]  ;;  %v2226_v56 = vld [vmem:[#allocation13 + $0x308] sm:$0xff] }
 0x33d   :  { %2344 = vmatpush.msrb.mxu0 %v2146_v11  ;;  %2364 = vmatpush.msrb.mxu1 %v2178_v12  ;;  %v2168_v31 = vld [vmem:[#allocation13 + $0x138] sm:$0xff] }
 0x33e   :  { %2305 = vmatpush.msra.mxu2 %v2207_v32  ;;  %2325 = vmatpush.msra.mxu3 %v2239_v33  ;;  %v2208_v32 = vld [vmem:[#allocation13 + $0x278] sm:$0xff] }
 0x33f   :  { %2345 = vmatpush.msrb.mxu0 %v2144_v35  ;;  %2365 = vmatpush.msrb.mxu1 %v2176_v57  ;;  %v2240_v33 = vld [vmem:[#allocation13 + $0x378] sm:$0xff] }
 0x340   :  { %2306 = vmatpush.msra.mxu2 %v2205_v17  ;;  %2326 = vmatpush.msra.mxu3 %v2237_v36  ;;  %v2134_v17 = vld [vmem:[#allocation13 + $0x28] sm:$0xff] }
 0x341   :  { %2346 = vmatpush.msrb.mxu0 %v2142_v18  ;;  %2366 = vmatpush.msrb.mxu1 %v2174_v62  ;;  %v2166_v36 = vld [vmem:[#allocation13 + $0x128] sm:$0xff] }
 0x342   :  { %2307 = vmatpush.msra.mxu2 %v2203_v29  ;;  %2327 = vmatpush.msra.mxu3 %v2235_v41  ;;  %v2206_v29 = vld [vmem:[#allocation13 + $0x268] sm:$0xff] }
 0x343   :  { %2347 = vmatpush.msrb.mxu0 %v2140_v4  ;;  %2367 = vmatpush.msrb.mxu1 %v2172_v21  ;;  %v2238_v41 = vld [vmem:[#allocation13 + $0x368] sm:$0xff]  ;;  %v2430_v4 = vld [vmem:[%s3927_s8 + $0x68] sm:$0xff] }
 0x344   :  { %2308 = vmatpush.msra.mxu2 %v2201_v22  ;;  %2328 = vmatpush.msra.mxu3 %v2233_v39  ;;  %v2204_v22 = vld [vmem:[#allocation13 + $0x258] sm:$0xff] }
 0x345   :  { %2348 = vmatpush.msrb.mxu0 %v2138_v25  ;;  %2368 = vmatpush.msrb.mxu1 %v2170_v26  ;;  %v2236_v39 = vld [vmem:[#allocation13 + $0x358] sm:$0xff] }
 0x346   :  { %2309 = vmatpush.msra.mxu2 %v2199_v44  ;;  %2329 = vmatpush.msra.mxu3 %v2231_v45  ;;  %v2202_v44 = vld [vmem:[#allocation13 + $0x248] sm:$0xff] }
 0x347   :  { %2349 = vmatpush.msrb.mxu0 %v2136_v30  ;;  %2369 = vmatpush.msrb.mxu1 %v2168_v31  ;;  %v2234_v45 = vld [vmem:[#allocation13 + $0x348] sm:$0xff]  ;;  %v2426_v30 = vld [vmem:[%s3927_s8 + $0x48] sm:$0xff] }
 0x348   :  { %2310 = vmatpush.msra.mxu2 %v2197_v48  ;;  %2330 = vmatpush.msra.mxu3 %v2229_v50  ;;  %v2200_v48 = vld [vmem:[#allocation13 + $0x238] sm:$0xff]  ;;  %v2446_v31 = vld [vmem:[%s3927_s8 + $0xe8] sm:$0xff] }
 0x349   :  { %2350 = vmatpush.msrb.mxu0 %v2134_v17  ;;  %2370 = vmatpush.msrb.mxu1 %v2166_v36  ;;  %v2232_v50 = vld [vmem:[#allocation13 + $0x338] sm:$0xff]  ;;  %v2424_v17 = vld [vmem:[%s3927_s8 + $0x38] sm:$0xff] }
 0x34a   :  { %2311 = vmatpush.msra.mxu2 %v2195_v53  ;;  %2331 = vmatpush.msra.mxu3 %v2227_v54  ;;  %v2196_v53 = vld [vmem:[#allocation13 + $0x218] sm:$0xff]  ;;  %v2444_v36 = vld [vmem:[%s3927_s8 + $0xd8] sm:$0xff] }
 0x34b   :  { %2351 = vmatpush.msrb.mxu0 %v2132_v37  ;;  %2371 = vmatpush.msrb.mxu1 %v2164_v38  ;;  %v2228_v54 = vld [vmem:[#allocation13 + $0x318] sm:$0xff]  ;;  %v2422_v37 = vld [vmem:[%s3927_s8 + $0x28] sm:$0xff] }
 0x34c   :  { %2312 = vmatpush.msra.mxu2 %v2193_v58  ;;  %2332 = vmatpush.msra.mxu3 %v2225_v59  ;;  %v2442_v38 = vld [vmem:[%s3927_s8 + $0xc8] sm:$0xff] }
 0x34d   :  { %2352 = vmatpush.msrb.mxu0 %v2130_v42  ;;  %2372 = vmatpush.msrb.mxu1 %v2162_v43  ;;  %v2420_v42 = vld [vmem:[%s3927_s8 + $0x18] sm:$0xff] }
 0x34e   :  { %2377 = vmatpush.msrb.mxu2 %v2224_v0  ;;  %2397 = vmatpush.msrb.mxu3 %v2256_v1  ;;  %v2440_v43 = vld [vmem:[%s3927_s8 + $0xb8] sm:$0xff] }
 0x350   :  { %2378 = vmatpush.msrb.mxu2 %v2222_v5  ;;  %2398 = vmatpush.msrb.mxu3 %v2254_v6 }
 0x352   :  { %2379 = vmatpush.msrb.mxu2 %v2220_v9  ;;  %2399 = vmatpush.msrb.mxu3 %v2252_v10 }
 0x354   :  { %2380 = vmatpush.msrb.mxu2 %v2218_v13  ;;  %2400 = vmatpush.msrb.mxu3 %v2250_v14  ;;  %v2432_v13 = vld [vmem:[%s3927_s8 + $0x78] sm:$0xff] }
 0x356   :  { %2381 = vmatpush.msrb.mxu2 %v2216_v15  ;;  %2401 = vmatpush.msrb.mxu3 %v2248_v16  ;;  %v2431_v15 = vld [vmem:[%s3927_s8 + $0x70] sm:$0xff] }
 0x357   :  { %v2447_v16 = vld [vmem:[%s3927_s8 + $0xf0] sm:$0xff] }
 0x358   :  { %2382 = vmatpush.msrb.mxu2 %v2214_v63  ;;  %2402 = vmatpush.msrb.mxu3 %v2246_v19 }
 0x35a   :  { %2383 = vmatpush.msrb.mxu2 %v2212_v23  ;;  %2403 = vmatpush.msrb.mxu3 %v2244_v24  ;;  %v2429_v24 = vld [vmem:[%s3927_s8 + $0x60] sm:$0xff] }
 0x35c   :  { %2384 = vmatpush.msrb.mxu2 %v2210_v27  ;;  %2404 = vmatpush.msrb.mxu3 %v2242_v28  ;;  %v2428_v27 = vld [vmem:[%s3927_s8 + $0x58] sm:$0xff]  ;;  %v2427_v28 = vld [vmem:[%s3927_s8 + $0x50] sm:$0xff] }
 0x35e   :  { %2385 = vmatpush.msrb.mxu2 %v2208_v32  ;;  %2405 = vmatpush.msrb.mxu3 %v2240_v33  ;;  %v2425_v32 = vld [vmem:[%s3927_s8 + $0x40] sm:$0xff] }
 0x35f   :  { %v2445_v33 = vld [vmem:[%s3927_s8 + $0xe0] sm:$0xff] }
 0x360   :  { %2386 = vmatpush.msrb.mxu2 %v2206_v29  ;;  %2406 = vmatpush.msrb.mxu3 %v2238_v41  ;;  %v2423_v29 = vld [vmem:[%s3927_s8 + $0x30] sm:$0xff] }
 0x361   :  { %v2443_v41 = vld [vmem:[%s3927_s8 + $0xd0] sm:$0xff] }
 0x362   :  { %2387 = vmatpush.msrb.mxu2 %v2204_v22  ;;  %2407 = vmatpush.msrb.mxu3 %v2236_v39  ;;  %v2421_v22 = vld [vmem:[%s3927_s8 + $0x20] sm:$0xff] }
 0x363   :  { %v2441_v39 = vld [vmem:[%s3927_s8 + $0xc0] sm:$0xff] }
 0x364   :  { %2388 = vmatpush.msrb.mxu2 %v2202_v44  ;;  %2408 = vmatpush.msrb.mxu3 %v2234_v45  ;;  %v2419_v44 = vld [vmem:[%s3927_s8 + $0x10] sm:$0xff] }
 0x365   :  { %v2439_v45 = vld [vmem:[%s3927_s8 + $0xb0] sm:$0xff] }
 0x366   :  { %2389 = vmatpush.msrb.mxu2 %v2200_v48  ;;  %2409 = vmatpush.msrb.mxu3 %v2232_v50  ;;  %v2417_v48 = vld [vmem:[%s3927_s8] sm:$0xff] }
 0x367   :  { %v2437_v50 = vld [vmem:[%s3927_s8 + $0xa0] sm:$0xff] }
 0x368   :  { %2390 = vmatpush.msrb.mxu2 %v2198_v51  ;;  %2410 = vmatpush.msrb.mxu3 %v2230_v52  ;;  %v2436_v51 = vld [vmem:[%s3927_s8 + $0x98] sm:$0xff]  ;;  %v2435_v52 = vld [vmem:[%s3927_s8 + $0x90] sm:$0xff] }
 0x36a   :  { %2391 = vmatpush.msrb.mxu2 %v2196_v53  ;;  %2411 = vmatpush.msrb.mxu3 %v2228_v54  ;;  %v2434_v53 = vld [vmem:[%s3927_s8 + $0x88] sm:$0xff]  ;;  %v2433_v54 = vld [vmem:[%s3927_s8 + $0x80] sm:$0xff] }
 0x36c   :  { %2392 = vmatpush.msrb.mxu2 %v2194_v55  ;;  %2412 = vmatpush.msrb.mxu3 %v2226_v56 }
 0x3a0   :  { %v1955_v46 = vpop.f32.mrf.mxu2  ;;  %v1975_v47 = vpop.f32.mrf.mxu3 }
 0x3a1   :  { %v2018_v60 = vperm.slane %v1955_v46, 0  ;;  %v2019_v61 = vperm.slane %v1975_v47, 0  ;;  %v2418_v46 = vld [vmem:[%s3927_s8 + $0x8] sm:$0xff] }
 0x3a2   :  { %v2438_v47 = vld [vmem:[%s3927_s8 + $0xa8] sm:$0xff] }
 0x3a3   :  { %v2022_v2 = vmul.f32 %v2018_v60, %v3646_v20  ;;  %v2023_v3 = vmul.f32 %v2019_v61, %v3670_v34  ;;  %v2448_v20 = vld [vmem:[%s3927_s8 + $0xf8] sm:$0xff] }
 0x3a8   :  { %v1995_v58 = vpop.f32.mrf.mxu2  ;;  %v2015_v59 = vpop.f32.mrf.mxu3 }
 0x3a9   :  { %v2020_v9 = vperm.slane %v1995_v58, 0  ;;  %v2021_v10 = vperm.slane %v2015_v59, 0 }
 0x3ab   :  { %v2024_v18 = vmul.f32 %v2020_v9, %v3685_v40  ;;  %v2025_v62 = vmul.f32 %v2021_v10, %v3690_v49 }
 0x3b0   :  { %v2046_v0 = vpop.f32.mrf.mxu2  ;;  %v2066_v1 = vpop.f32.mrf.mxu3 }
 0x3b1   :  { %v2109_v5 = vperm.slane %v2046_v0, 0  ;;  %v2110_v6 = vperm.slane %v2066_v1, 0 }
 0x3b3   :  { %v2113_v7 = vadd.f32 %v2109_v5, %v2022_v2  ;;  %v2114_v8 = vadd.f32 %v2110_v6, %v2023_v3 }
 0x3b5   :  { %v2121_v11 = vmul.f32 0.2, %v2113_v7  ;;  %v2122_v12 = vmul.f32 0.2, %v2114_v8  ;;  %vm2117_vm10 = vcmp.ge.f32.partialorder %v2113_v7, 0.0  ;;  %vm2118_vm11 = vcmp.ge.f32.partialorder %v2114_v8, 0.0 }
 0x3b7   :  { %v2125_v14 = vsel %vm2117_vm10, %v2113_v7, %v2121_v11  ;;  %v2126_v34 = vsel %vm2118_vm11, %v2114_v8, %v2122_v12  ;;  %v3108_v11 = vmov 32.0  }
 0x3b8   :  { %v2086_v35 = vpop.f32.mrf.mxu2  ;;  %v2106_v57 = vpop.f32.mrf.mxu3  ;;  %2273 = vmatmul.f32.vlgmr.msra.gmra.mxu0 %v2125_v14  ;;  %2293 = vmatmul.f32.vlgmr.msra.gmra.mxu1 %v2126_v34  ;;  %2806 = vrcp.f32 %v3108_v11  ;;  %v2686_v11 = vld [vmem:[%s3931_s12 + $0x40] sm:$0xff] }
 0x3b9   :  { %v2111_v63 = vperm.slane %v2086_v35, 0  ;;  %v2112_v19 = vperm.slane %v2106_v57, 0  ;;  %2455 = vmatpush.msra.mxu0 %v2432_v13  ;;  %2475 = vmatpush.msra.mxu1 %v2448_v20 }
 0x3bb   :  { %v2115_v21 = vadd.f32 %v2111_v63, %v2024_v18  ;;  %v2116_v23 = vadd.f32 %v2112_v19, %v2025_v62  ;;  %2456 = vmatpush.msra.mxu0 %v2431_v15  ;;  %2476 = vmatpush.msra.mxu1 %v2447_v16 }
 0x3bd   :  { %v2123_v25 = vmul.f32 0.2, %v2115_v21  ;;  %v2124_v40 = vmul.f32 0.2, %v2116_v23  ;;  %vm2119_vm12 = vcmp.ge.f32.partialorder %v2115_v21, 0.0  ;;  %vm2120_vm13 = vcmp.ge.f32.partialorder %v2116_v23, 0.0  ;;  %2457 = vmatpush.msra.mxu0 %v2430_v4  ;;  %2477 = vmatpush.msra.mxu1 %v2446_v31 }
 0x3be   :  { %v2807_v12 = vpop.eup %2806 }
 0x3bf   :  { %v2127_v49 = vsel %vm2119_vm12, %v2115_v21, %v2123_v25  ;;  %v2128_v26 = vsel %vm2120_vm13, %v2116_v23, %v2124_v40  ;;  %2458 = vmatpush.msra.mxu0 %v2429_v24  ;;  %2478 = vmatpush.msra.mxu1 %v2445_v33  ;;  %v2451_v21 = vld [vmem:[#allocation14 + $0x10] sm:$0xff]  ;;  %v2452_v23 = vld [vmem:[#allocation14 + $0x18] sm:$0xff]  ;;  %v2449_v25 = vld [vmem:[#allocation14] sm:$0xff]  ;;  %vm2550_vm15 = vweird.f32 %v2807_v12 }
 0x3c0   :  { %2313 = vmatmul.f32.vlgmr.msra.gmra.mxu2 %v2127_v49  ;;  %2333 = vmatmul.f32.vlgmr.msra.gmra.mxu3 %v2128_v26  ;;  %v2450_v40 = vld [vmem:[#allocation14 + $0x8] sm:$0xff] }
 0x3c1   :  { %2353 = vmatmul.f32.vlgmr.msrb.gmra.mxu0 %v2125_v14  ;;  %2373 = vmatmul.f32.vlgmr.msrb.gmra.mxu1 %v2126_v34  ;;  %v2546_v34 = vmul.f32 32.0, %v2807_v12 }
 0x3c2   :  { %2497 = vmatpush.msra.mxu2 %v2432_v13  ;;  %2459 = vmatpush.msra.mxu0 %v2428_v27 }
 0x3c3   :  { %2517 = vmatpush.msra.mxu3 %v2448_v20  ;;  %2479 = vmatpush.msra.mxu1 %v2444_v36 }
 0x3c4   :  { %2498 = vmatpush.msra.mxu2 %v2431_v15  ;;  %2460 = vmatpush.msra.mxu0 %v2427_v28  ;;  %v2547_v15 = vsub.f32 1.0, %v2546_v34  ;;  %v2700_v34 = vld [vmem:[%s3931_s12 + $0xb0] sm:$0xff] }
 0x3c5   :  { %2518 = vmatpush.msra.mxu3 %v2447_v16  ;;  %2480 = vmatpush.msra.mxu1 %v2443_v41 }
 0x3c6   :  { %2499 = vmatpush.msra.mxu2 %v2430_v4  ;;  %2461 = vmatpush.msra.mxu0 %v2426_v30  ;;  %v2548_v19 = vmul.f32 %v2807_v12, %v2547_v15  ;;  %v2682_v15 = vld [vmem:[%s3931_s12 + $0x20] sm:$0xff] }
 0x3c7   :  { %2519 = vmatpush.msra.mxu3 %v2446_v31  ;;  %2481 = vmatpush.msra.mxu1 %v2442_v38 }
 0x3c8   :  { %2393 = vmatmul.f32.vlgmr.msrb.gmra.mxu2 %v2127_v49  ;;  %2413 = vmatmul.f32.vlgmr.msrb.gmra.mxu3 %v2128_v26 }
 0x3c9   :  { %2500 = vmatpush.msra.mxu2 %v2429_v24  ;;  %2462 = vmatpush.msra.mxu0 %v2425_v32 }
 0x3ca   :  { %2520 = vmatpush.msra.mxu3 %v2445_v33  ;;  %2482 = vmatpush.msra.mxu1 %v2441_v39 }
 0x3cb   :  { %2501 = vmatpush.msra.mxu2 %v2428_v27  ;;  %2463 = vmatpush.msra.mxu0 %v2424_v17 }
 0x3cc   :  { %2521 = vmatpush.msra.mxu3 %v2444_v36  ;;  %2483 = vmatpush.msra.mxu1 %v2440_v43 }
 0x3cd   :  { %2502 = vmatpush.msra.mxu2 %v2427_v28  ;;  %2464 = vmatpush.msra.mxu0 %v2423_v29  ;;  %v2549_v28 = vadd.f32 %v2807_v12, %v2548_v19  ;;  %v2696_v19 = vld [vmem:[%s3931_s12 + $0x90] sm:$0xff] }
 0x3ce   :  { %2522 = vmatpush.msra.mxu3 %v2443_v41  ;;  %2484 = vmatpush.msra.mxu1 %v2439_v45 }
 0x3cf   :  { %2503 = vmatpush.msra.mxu2 %v2426_v30  ;;  %2465 = vmatpush.msra.mxu0 %v2422_v37  ;;  %v2551_v33 = vsel %vm2550_vm15, %v2807_v12, %v2549_v28  ;;  %v2702_v12 = vld [vmem:[%s3931_s12 + $0xc0] sm:$0xff] }
 0x3d0   :  { %2523 = vmatpush.msra.mxu3 %v2442_v38  ;;  %2485 = vmatpush.msra.mxu1 %v2438_v47  ;;  %v2709_v38 = vld [vmem:[%s3931_s12 + $0xf8] sm:$0xff] }
 0x3d1   :  { %2504 = vmatpush.msra.mxu2 %v2425_v32  ;;  %2466 = vmatpush.msra.mxu0 %v2421_v22 }
 0x3d2   :  { %2524 = vmatpush.msra.mxu3 %v2441_v39  ;;  %2486 = vmatpush.msra.mxu1 %v2437_v50  ;;  %v2708_v39 = vld [vmem:[%s3931_s12 + $0xf0] sm:$0xff] }
 0x3d3   :  { %2505 = vmatpush.msra.mxu2 %v2424_v17  ;;  %2467 = vmatpush.msra.mxu0 %v2420_v42 }
 0x3d4   :  { %2525 = vmatpush.msra.mxu3 %v2440_v43  ;;  %2487 = vmatpush.msra.mxu1 %v2436_v51 }
 0x3d5   :  { %2506 = vmatpush.msra.mxu2 %v2423_v29  ;;  %2468 = vmatpush.msra.mxu0 %v2419_v44 }
 0x3d6   :  { %2526 = vmatpush.msra.mxu3 %v2439_v45  ;;  %2488 = vmatpush.msra.mxu1 %v2435_v52  ;;  %v2707_v45 = vld [vmem:[%s3931_s12 + $0xe8] sm:$0xff] }
 0x3d7   :  { %2507 = vmatpush.msra.mxu2 %v2422_v37  ;;  %2469 = vmatpush.msra.mxu0 %v2418_v46  ;;  %v2693_v37 = vld [vmem:[%s3931_s12 + $0x78] sm:$0xff] }
 0x3d8   :  { %2527 = vmatpush.msra.mxu3 %v2438_v47  ;;  %2489 = vmatpush.msra.mxu1 %v2434_v53  ;;  %v2690_v47 = vld [vmem:[%s3931_s12 + $0x60] sm:$0xff] }
 0x3d9   :  { %2508 = vmatpush.msra.mxu2 %v2421_v22  ;;  %2470 = vmatpush.msra.mxu0 %v2417_v48  ;;  %v2692_v22 = vld [vmem:[%s3931_s12 + $0x70] sm:$0xff] }
 0x3da   :  { %2528 = vmatpush.msra.mxu3 %v2437_v50  ;;  %2490 = vmatpush.msra.mxu1 %v2433_v54 }
 0x3db   :  { %2509 = vmatpush.msra.mxu2 %v2420_v42  ;;  %2595 = vmatpush.msrb.mxu0 %v2451_v21 }
 0x3dc   :  { %2529 = vmatpush.msra.mxu3 %v2436_v51  ;;  %2615 = vmatpush.msrb.mxu1 %v2452_v23  ;;  %v2689_v51 = vld [vmem:[%s3931_s12 + $0x58] sm:$0xff] }
 0x3dd   :  { %2510 = vmatpush.msra.mxu2 %v2419_v44  ;;  %2596 = vmatpush.msrb.mxu0 %v2449_v25  ;;  %v2691_v44 = vld [vmem:[%s3931_s12 + $0x68] sm:$0xff] }
 0x3de   :  { %2530 = vmatpush.msra.mxu3 %v2435_v52  ;;  %2616 = vmatpush.msrb.mxu1 %v2450_v40  ;;  %v2705_v52 = vld [vmem:[%s3931_s12 + $0xd8] sm:$0xff] }
 0x3df   :  { %2511 = vmatpush.msra.mxu2 %v2418_v46 }
 0x3e0   :  { %2531 = vmatpush.msra.mxu3 %v2434_v53  ;;  %v2688_v53 = vld [vmem:[%s3931_s12 + $0x50] sm:$0xff] }
 0x3e1   :  { %2512 = vmatpush.msra.mxu2 %v2417_v48  ;;  %v2706_v48 = vld [vmem:[%s3931_s12 + $0xe0] sm:$0xff] }
 0x3e2   :  { %2532 = vmatpush.msra.mxu3 %v2433_v54  ;;  %v2704_v54 = vld [vmem:[%s3931_s12 + $0xd0] sm:$0xff] }
 0x3e3   :  { %2642 = vmatpush.msrb.mxu2 %v2451_v21  ;;  %v2695_v21 = vld [vmem:[%s3931_s12 + $0x88] sm:$0xff] }
 0x3e4   :  { %2662 = vmatpush.msrb.mxu3 %v2452_v23  ;;  %v2678_v23 = vld [vmem:[%s3931_s12] sm:$0xff] }
 0x3e5   :  { %2643 = vmatpush.msrb.mxu2 %v2449_v25 }
 0x3e6   :  { %2663 = vmatpush.msrb.mxu3 %v2450_v40 }
 0x435   :  { %v2274_v55 = vpop.f32.mrf.mxu0  ;;  %v2294_v56 = vpop.f32.mrf.mxu1 }
 0x436   :  { %v2295_v58 = vadd.f32 %v2294_v56, %v2274_v55  ;;  %v2687_v55 = vld [vmem:[%s3931_s12 + $0x48] sm:$0xff] }
 0x437   :  { %v2703_v56 = vld [vmem:[%s3931_s12 + $0xc8] sm:$0xff] }
 0x43e   :  { %v2354_v1 = vpop.f32.mrf.mxu0  ;;  %v2374_v2 = vpop.f32.mrf.mxu1 }
 0x43f   :  { %v2375_v5 = vadd.f32 %v2374_v2, %v2354_v1  ;;  %v2453_v2 = vld [vmem:[#allocation16] sm:$0x1] }
 0x443   :  { %v2314_v59 = vpop.f32.mrf.mxu2  ;;  %v2334_v60 = vpop.f32.mrf.mxu3 }
 0x444   :  { %v2315_v61 = vadd.f32 %v2314_v59, %v2295_v58 }
 0x446   :  { %v3805_v0 = vadd.f32 %v2334_v60, %v2315_v61 }
 0x448   :  { %v2495_v3 = vmul.f32 %v3805_v0, %v3805_v0  ;;  %2471 = vmatmul.f32.vlgmr.msra.gmra.mxu0 %v3805_v0 }
 0x449   :  { %2710 = vmatpush.msra.mxu0 %v2693_v37 }
 0x44a   :  { %2513 = vmatmul.f32.vlgmr.msra.gmra.mxu2 %v2495_v3 }
 0x44b   :  { %v2394_v6 = vpop.f32.mrf.mxu2  ;;  %v2414_v8 = vpop.f32.mrf.mxu3  ;;  %2711 = vmatpush.msra.mxu0 %v2692_v22 }
 0x44c   :  { %v2395_v7 = vadd.f32 %v2394_v6, %v2375_v5 }
 0x44d   :  { %2712 = vmatpush.msra.mxu0 %v2691_v44 }
 0x44e   :  { %v3810_v9 = vadd.f32 %v2414_v8, %v2395_v7  ;;  %v2454_v7 = vld [vmem:[#allocation17] sm:$0x1] }
 0x44f   :  { %2713 = vmatpush.msra.mxu0 %v2690_v47 }
 0x450   :  { %v2496_v10 = vmul.f32 %v3810_v9, %v3810_v9  ;;  %2491 = vmatmul.f32.vlgmr.msra.gmra.mxu1 %v3810_v9 }
 0x451   :  { %2730 = vmatpush.msra.mxu1 %v2709_v38  ;;  %2714 = vmatpush.msra.mxu0 %v2689_v51 }
 0x452   :  { %2533 = vmatmul.f32.vlgmr.msra.gmra.mxu3 %v2496_v10 }
 0x453   :  { %2731 = vmatpush.msra.mxu1 %v2708_v39  ;;  %2715 = vmatpush.msra.mxu0 %v2688_v53 }
 0x455   :  { %2732 = vmatpush.msra.mxu1 %v2707_v45  ;;  %2716 = vmatpush.msra.mxu0 %v2687_v55 }
 0x457   :  { %2733 = vmatpush.msra.mxu1 %v2706_v48  ;;  %2717 = vmatpush.msra.mxu0 %v2686_v11 }
 0x459   :  { %2734 = vmatpush.msra.mxu1 %v2705_v52 }
 0x45b   :  { %2735 = vmatpush.msra.mxu1 %v2704_v54 }
 0x45d   :  { %2736 = vmatpush.msra.mxu1 %v2703_v56 }
 0x45f   :  { %2737 = vmatpush.msra.mxu1 %v2702_v12 }
 0x4c5   :  { %v2472_v13 = vpop.f32.mrf.mxu0 }
 0x4cd   :  { %v2492_v20 = vpop.f32.mrf.mxu1  ;;  %v2514_v62 = vpop.f32.mrf.mxu2 }
 0x4ce   :  { %v2493_v14 = vadd.f32 %v2492_v20, %v2472_v13  ;;  %v2685_v13 = vld [vmem:[%s3931_s12 + $0x38] sm:$0xff] }
 0x4cf   :  { %v2701_v20 = vld [vmem:[%s3931_s12 + $0xb8] sm:$0xff]  ;;  %2718 = vmatpush.msra.mxu0 %v2685_v13 }
 0x4d0   :  { %v2538_v35 = vsel %vm2537_vm14, %v2493_v14, 0.0  ;;  %v2684_v14 = vld [vmem:[%s3931_s12 + $0x30] sm:$0xff]  ;;  %2738 = vmatpush.msra.mxu1 %v2701_v20 }
 0x4d1   :  { %v2539_v57 = vrot.slane %v2538_v35, 4  ;;  %2719 = vmatpush.msra.mxu0 %v2684_v14 }
 0x4d2   :  { %2739 = vmatpush.msra.mxu1 %v2700_v34 }
 0x4d3   :  { %v2540_v16 = vadd.f32 %v2539_v57, %v2538_v35  ;;  %v2683_v35 = vld [vmem:[%s3931_s12 + $0x28] sm:$0xff] }
 0x4d4   :  { %v2699_v57 = vld [vmem:[%s3931_s12 + $0xa8] sm:$0xff]  ;;  %2720 = vmatpush.msra.mxu0 %v2683_v35 }
 0x4d5   :  { %v2541_v18 = vrot.slane %v2540_v16, 2  ;;  %v2534_v63 = vpop.f32.mrf.mxu3  ;;  %2740 = vmatpush.msra.mxu1 %v2699_v57 }
 0x4d6   :  { %v2535_v4 = vadd.f32 %v2534_v63, %v2514_v62  ;;  %2721 = vmatpush.msra.mxu0 %v2682_v15  ;;  %v2697_v62 = vld [vmem:[%s3931_s12 + $0x98] sm:$0xff]  ;;  %v2680_v63 = vld [vmem:[%s3931_s12 + $0x10] sm:$0xff] }
 0x4d7   :  { %v2542_v24 = vadd.f32 %v2541_v18, %v2540_v16  ;;  %v2698_v16 = vld [vmem:[%s3931_s12 + $0xa0] sm:$0xff]  ;;  %v2681_v18 = vld [vmem:[%s3931_s12 + $0x18] sm:$0xff] }
 0x4d8   :  { %v2553_v49 = vsel %vm2537_vm14, %v2535_v4, 0.0  ;;  %2741 = vmatpush.msra.mxu1 %v2698_v16  ;;  %2722 = vmatpush.msra.mxu0 %v2681_v18  ;;  %v2679_v4 = vld [vmem:[%s3931_s12 + $0x8] sm:$0xff] }
 0x4d9   :  { %v2543_v26 = vrot.slane %v2542_v24, 1  ;;  %v2554_v27 = vrot.slane %v2553_v49, 4 }
 0x4da   :  { %2742 = vmatpush.msra.mxu1 %v2697_v62  ;;  %2723 = vmatpush.msra.mxu0 %v2680_v63 }
 0x4db   :  { %v2555_v30 = vadd.f32 %v2554_v27, %v2553_v49  ;;  %v2544_v31 = vadd.f32 %v2543_v26, %v2542_v24  ;;  %v2694_v24 = vld [vmem:[%s3931_s12 + $0x80] sm:$0xff]  ;;  %s3109_s12 = smov [#allocation19]  }
 0x4dc   :  { %2743 = vmatpush.msra.mxu1 %v2696_v19  ;;  %2724 = vmatpush.msra.mxu0 %v2679_v4  ;;  %s2756_s9 = sshll.u32 %s3109_s12, 4  ;;  %s2757_s9 = int_to_ptr.vmem [resolvable:$true] %s2756_s9 }
 0x4dd   :  { %v2556_v32 = vrot.slane %v2555_v30, 2  ;;  %v2552_v36 = vmul.f32 %v2551_v33, %v2544_v31 }
 0x4de   :  { %2744 = vmatpush.msra.mxu1 %v2695_v21  ;;  %2725 = vmatpush.msra.mxu0 %v2678_v23 }
 0x4df   :  { %v2557_v17 = vadd.f32 %v2556_v32, %v2555_v30  ;;  %v2561_v42 = vmul.f32 %v2552_v36, %v2552_v36 }
 0x4e0   :  { %2745 = vmatpush.msra.mxu1 %v2694_v24 }
 0x4e1   :  { %v2558_v29 = vrot.slane %v2557_v17, 1 }
 0x4e3   :  { %v2559_v41 = vadd.f32 %v2558_v29, %v2557_v17 }
 0x4e5   :  { %v2560_v43 = vmul.f32 %v2559_v41, %v2551_v33 }
 0x4e7   :  { %v2562_v46 = vsub.f32 %v2560_v43, %v2561_v42 }
 0x4e9   :  { %v2563_v50 = vadd.f32 1e-05, %v2562_v46 }
 0x4eb   :  { %2808 = vrsqrt.f32 %v2563_v50  ;;  %vm2570_vm1 = vweird.f32 %v2563_v50 }
 0x4f1   :  { %v2809_v58 = vpop.eup %2808 }
 0x4f2   :  { %v2565_v59 = vmul.f32 %v2809_v58, %v2563_v50  ;;  %vm2571_vm0 = vweird.f32 %v2809_v58 }
 0x4f3   :  { %vm2572_vm2 = vmor %vm2570_vm1, %vm2571_vm0 }
 0x4f4   :  { %v2566_v60 = vmul.f32 %v2809_v58, %v2565_v59 }
 0x4f6   :  { %v2567_v61 = vmul.f32 0.5, %v2566_v60 }
 0x4f8   :  { %v2568_v1 = vsub.f32 1.5, %v2567_v61 }
 0x4fa   :  { %v2569_v3 = vmul.f32 %v2809_v58, %v2568_v1 }
 0x4fc   :  { %v2573_v5 = vsel %vm2572_vm2, %v2809_v58, %v2569_v3 }
 0x4fd   :  { %v2574_v6 = vmul.f32 %v2573_v5, %v2453_v2 }
 0x4ff   :  { %2781 = vmatmul.msk.f32.vlgmr.msrb.gmra.mxu0 %vm2577_vm3, %v2574_v6  ;;  %2782 = vmatmul.msk.f32.vlgmr.msrb.gmra.mxu1 %vm2577_vm3, %v2574_v6  ;;  %v2575_v8 = vmul.f32 %v2574_v6, %v2552_v36 }
 0x501   :  { %v2576_v10 = vsub.f32 %v2454_v7, %v2575_v8 }
 0x503   :  { %2783 = vmatmul.msk.f32.vlgmr.msrb.gmra.mxu2 %vm2577_vm3, %v2576_v10  ;;  %2784 = vmatmul.msk.f32.vlgmr.msrb.gmra.mxu3 %vm2577_vm3, %v2576_v10 }
 0x57c   :  { %v2598_v25 = vpop.f32.mrf.mxu0  ;;  %v2618_v40 = vpop.f32.mrf.mxu1 }
 0x57d   :  { %v2621_v49 = vperm.slane %v2598_v25, 0  ;;  %v2622_v26 = vperm.slane %v2618_v40, 0 }
 0x57f   :  { %v2623_v30 = vmul.f32 %v2621_v49, %v3805_v0  ;;  %v2624_v31 = vmul.f32 %v2622_v26, %v3810_v9 }
 0x586   :  { %v2645_v27 = vpop.f32.mrf.mxu2  ;;  %v2665_v28 = vpop.f32.mrf.mxu3 }
 0x587   :  { %v2668_v32 = vperm.slane %v2645_v27, 0  ;;  %v2669_v33 = vperm.slane %v2665_v28, 0 }
 0x589   :  { %v2670_v17 = vadd.f32 %v2668_v32, %v2623_v30  ;;  %v2671_v36 = vadd.f32 %v2669_v33, %v2624_v31 }
 0x58b   :  { %v2674_v29 = vmul.f32 0.2, %v2670_v17  ;;  %v2675_v41 = vmul.f32 0.2, %v2671_v36  ;;  %vm2672_vm5 = vcmp.ge.f32.partialorder %v2670_v17, 0.0  ;;  %vm2673_vm6 = vcmp.ge.f32.partialorder %v2671_v36, 0.0 }
 0x58d   :  { %v2676_v37 = vsel %vm2672_vm5, %v2670_v17, %v2674_v29  ;;  %v2677_v38 = vsel %vm2673_vm6, %v2671_v36, %v2675_v41 }
 0x58e   :  { %2726 = vmatmul.f32.vlgmr.msra.gmra.mxu0 %v2676_v37  ;;  %2746 = vmatmul.f32.vlgmr.msra.gmra.mxu1 %v2677_v38 }
 0x60b   :  { %v2727_v0 = vpop.f32.mrf.mxu0  ;;  %v2747_v9 = vpop.f32.mrf.mxu1 }
 0x60c   :  { %v2748_v22 = vadd.f32 %v2747_v9, %v2727_v0 }
 0x60e   :  { %2750 = vst.msk [vmem:[#allocation19] sm:$0x3] %vm1894_vm4, %v2748_v22 }
 0x60f   :  { %2761 = dma.vmem_to_hbm [thread:$0]  %s2757_s9, 32, %s2759_s23, [#allocation4]  }
 0x610   :  { %3091 = dma.done.wait [#allocation4], 32  }
 0x611   :  { %3092 = vsyncadd [#allocation4], 4294967264 }
 0x612   :  { %2766 = vsyncpa [#allocation3], 1 }
 0x613   :  { %2767 = vsyncpa [#allocation6], 1 }
 0x614   :  { %2768 = vsyncpa [#allocation9], 1 }
 0x615   :  { %2769 = vsyncpa [#allocation12], 1 }
 0x616   :  { %2770 = vsyncpa [#allocation15], 1 }
 0x617   :  { %2771 = vsyncpa [#allocation18], 1 }
 0x618   :  { %2772 = vsyncpa [#allocation4], 1 }

</bundles_post_ra>
